<compile_context>
chip_gen: v6e
topology: v6e:2x2x1
jax: 0.10.0
libtpu: 0.0.40
codegen_flags: <defaults>
</compile_context>

<pallas_src>
import math
import functools

import jax
import jax.numpy as jnp
from jax.experimental import pallas as pl
from jax.experimental.pallas import tpu as pltpu

LN_EPS = 1e-5   # nn.LayerNorm default
BN_EPS = 1e-5   # nn.BatchNorm1d default


# ---------------------------------------------------------------------------
# VMEM budget & weight-BlockSpec helpers
# ---------------------------------------------------------------------------

@functools.lru_cache(maxsize=None)
def _vmem_limit_bytes():
    """Scoped-VMEM budget derived from the chip (v5e/v6e: 128 MiB, v7x: 64 MiB physical),
    keeping ~25% headroom for compiler-internal scratch and spills."""
    try:
        cap = int(pltpu.get_tpu_info().vmem_capacity_bytes)
    except Exception:
        cap = 64 * 1024 * 1024            # conservative (v7x physical) fallback
    return min((cap * 3) // 4, 96 * 1024 * 1024)


def _probe_single_buffered_weights():
    """Best-effort probe: do constant-index-map weights accept pipeline_mode=pl.Buffered(1)
    (single VMEM buffer instead of the default double-buffer) on this jax/libtpu build?
    Fall back to default buffering if construction / lowering / execution fails."""
    try:
        w_spec = pl.BlockSpec((8, 128), lambda i: (0, 0), pipeline_mode=pl.Buffered(1))

        def _k(x_ref, w_ref, o_ref):
            o_ref[...] = x_ref[...] + w_ref[...]

        out = pl.pallas_call(
            _k,
            out_shape=jax.ShapeDtypeStruct((2, 8, 128), jnp.float32),
            grid=(2,),
            in_specs=[pl.BlockSpec((1, 8, 128), lambda i: (i, 0, 0)), w_spec],
            out_specs=pl.BlockSpec((1, 8, 128), lambda i: (i, 0, 0)),
            compiler_params=pltpu.CompilerParams(dimension_semantics=("parallel",)),
        )(jnp.zeros((2, 8, 128), jnp.float32), jnp.ones((8, 128), jnp.float32))
        jax.block_until_ready(out)
        return True
    except Exception:
        return False


_SINGLE_BUFFER_WEIGHTS = _probe_single_buffered_weights()


def _weight_spec(shape):
    """Weight BlockSpec: full array, constant block index -> DMA'd once, VMEM-resident across
    grid steps; single-buffered when supported (double-buffering a constant block is waste)."""
    idx = lambda b, _n=len(shape): (0,) * _n
    if _SINGLE_BUFFER_WEIGHTS:
        return pl.BlockSpec(shape, idx, pipeline_mode=pl.Buffered(1))
    return pl.BlockSpec(shape, idx)


# ---------------------------------------------------------------------------
# Fused EncoderLayer kernel (one grid step per batch element)
# ---------------------------------------------------------------------------

def _encoder_layer_kernel(x_ref,
                          wqkv_ref, bqkv_ref, wo_ref, bo_ref,
                          ln1g_ref, ln1b_ref,
                          w1_ref, b1_ref, w2_ref, b2_ref,
                          ln2g_ref, ln2b_ref,
                          *rest, n_heads, final_ln):
    if final_ln:
        lnfg_ref, lnfb_ref, o_ref = rest
    else:
        (o_ref,) = rest

    x = x_ref[0]                                   # (L, D) f32
    L, D = x.shape
    E = D // n_heads
    scale = 1.0 / math.sqrt(E)
    xb = x.astype(jnp.bfloat16)

    # Fused QKV projection: one full-width (L,D)@(D,3D) bf16 MXU matmul, f32 accumulation.
    qkv = jnp.dot(xb, wqkv_ref[...], preferred_element_type=jnp.float32) + bqkv_ref[...]
    q = (qkv[:, 0:D] * scale).astype(jnp.bfloat16)        # 1/sqrt(E) folded into q
    k = qkv[:, D:2 * D].astype(jnp.bfloat16)
    v = qkv[:, 2 * D:3 * D].astype(jnp.bfloat16)

    # Multi-head full attention (mask_flag=False) with the output projection fused in:
    # concat_h(o_h) @ Wo == sum_h o_h @ Wo[h*E:(h+1)*E, :], accumulated per head.
    wo = wo_ref[...]                               # (D, D) bf16
    new_x = bo_ref[...]                            # (1, D) f32, broadcasts on first add
    for h in range(n_heads):                       # static, unrolled head loop
        sl = slice(h * E, (h + 1) * E)
        qh, kh, vh = q[:, sl], k[:, sl], v[:, sl]
        s = jax.lax.dot_general(qh, kh, (((1,), (1,)), ((), ())),
                                preferred_element_type=jnp.float32)      # (L, L) f32
        s = s - jnp.max(s, axis=-1, keepdims=True)
        p = jnp.exp(s)                             # f32 softmax statistics
        l = jnp.sum(p, axis=-1, keepdims=True)     # (L, 1)
        oh = jnp.dot(p.astype(jnp.bfloat16), vh, preferred_element_type=jnp.float32)  # (L, E)
        oh = oh * pl.reciprocal(l, approx=True)    # deferred normalization: (L,E) not (L,L)
        new_x = new_x + jnp.dot(oh.astype(jnp.bfloat16), wo[sl, :],
                                preferred_element_type=jnp.float32)

    # x = x + dropout(new_x); x1 = norm1(x)   (dropout == identity in eval)
    z = x + new_x
    mu = jnp.mean(z, axis=-1, keepdims=True)
    var = jnp.mean((z - mu) ** 2, axis=-1, keepdims=True)   # biased, as in PyTorch LN
    x1 = (z - mu) * jax.lax.rsqrt(var + LN_EPS) * ln1g_ref[...] + ln1b_ref[...]

    # FFN: conv1(k=1) -> relu -> conv2(k=1) as bf16 matmuls with f32 accumulation
    ff = jnp.dot(x1.astype(jnp.bfloat16), w1_ref[...],
                 preferred_element_type=jnp.float32) + b1_ref[...]
    ff = jnp.maximum(ff, 0.0)                      # Informer default activation = relu
    y = jnp.dot(ff.astype(jnp.bfloat16), w2_ref[...],
                preferred_element_type=jnp.float32) + b2_ref[...]

    # out = norm2(x1 + y)
    z2 = x1 + y
    mu2 = jnp.mean(z2, axis=-1, keepdims=True)
    var2 = jnp.mean((z2 - mu2) ** 2, axis=-1, keepdims=True)
    x2 = (z2 - mu2) * jax.lax.rsqrt(var2 + LN_EPS) * ln2g_ref[...] + ln2b_ref[...]

    # Optional fused final encoder LayerNorm (last layer only) -> no extra HBM round trip
    if final_ln:
        mu3 = jnp.mean(x2, axis=-1, keepdims=True)
        var3 = jnp.mean((x2 - mu3) ** 2, axis=-1, keepdims=True)
        x2 = (x2 - mu3) * jax.lax.rsqrt(var3 + LN_EPS) * lnfg_ref[...] + lnfb_ref[...]

    o_ref[0] = x2


def encoder_layer_forward(x, p, n_heads, final_norm=None):
    B, L, D = x.shape
    F_ = p["w1"].shape[1]
    fuse = final_norm is not None
    kern = functools.partial(_encoder_layer_kernel, n_heads=n_heads, final_ln=fuse)

    in_specs = [
        pl.BlockSpec((1, L, D), lambda b: (b, 0, 0)),
        _weight_spec((D, 3 * D)), _weight_spec((1, 3 * D)),
        _weight_spec((D, D)), _weight_spec((1, D)),
        _weight_spec((1, D)), _weight_spec((1, D)),
        _weight_spec((D, F_)), _weight_spec((1, F_)),
        _weight_spec((F_, D)), _weight_spec((1, D)),
        _weight_spec((1, D)), _weight_spec((1, D)),
    ]
    args = [x,
            p["wqkv"], p["bqkv"].reshape(1, 3 * D),
            p["wo"], p["bo"].reshape(1, D),
            p["ln1_g"].reshape(1, D), p["ln1_b"].reshape(1, D),
            p["w1"], p["b1"].reshape(1, F_),
            p["w2"], p["b2"].reshape(1, D),
            p["ln2_g"].reshape(1, D), p["ln2_b"].reshape(1, D)]
    if fuse:
        in_specs += [_weight_spec((1, D)), _weight_spec((1, D))]
        args += [final_norm["g"].reshape(1, D), final_norm["b"].reshape(1, D)]

    # grid=(B,) with "parallel" shards batches across v7x's two TensorCores when B >= 2.
    # TODO(synk): for B == 1 on v7x add a second parallel axis (query-tile) to keep both TCs busy.
    out = pl.pallas_call(
        kern,
        out_shape=jax.ShapeDtypeStruct((B, L, D), jnp.float32),
        grid=(B,),
        in_specs=in_specs,
        out_specs=pl.BlockSpec((1, L, D), lambda b: (b, 0, 0)),
        compiler_params=pltpu.CompilerParams(
            dimension_semantics=("parallel",),
            vmem_limit_bytes=_vmem_limit_bytes()),
    )(*args)
    # FullAttention(output_attention=False) returns attn=None
    return out, None


# ---------------------------------------------------------------------------
# Distilling ConvLayer kernel (one grid step per batch element)
# ---------------------------------------------------------------------------

def _conv_distill_kernel(x_ref, w_ref, b_ref, bn_ref, o_ref, ye_scr, yo_scr):
    x = x_ref[0]                                    # (L, D) f32
    L, D = x.shape
    Lh = L // 2

    # circular Conv1d(k=3, pad=1): lane-concat the 3 shifted copies (XLU rolls) and run ONE
    # (L,3D)@(3D,D) bf16 MXU matmul instead of three (L,D)@(D,D) matmuls.
    x_m1 = pltpu.roll(x, shift=1, axis=0)           # x[(l-1) mod L]
    x_p1 = pltpu.roll(x, shift=L - 1, axis=0)       # x[(l+1) mod L]
    xcat = jnp.concatenate([x_m1, x, x_p1], axis=-1).astype(jnp.bfloat16)   # (L, 3D)
    y = jnp.dot(xcat, w_ref[...], preferred_element_type=jnp.float32) + b_ref[...]

    # BatchNorm1d in eval mode (running stats), folded to a per-channel affine in f32
    bn = bn_ref[...]                                # (4, D): gamma, beta, mean, var
    bn_scale = bn[0:1] * jax.lax.rsqrt(bn[3:4] + BN_EPS)
    bn_shift = bn[1:2] - bn[2:3] * bn_scale
    y = y * bn_scale + bn_shift

    # ELU(alpha=1); exp only on the clamped-negative branch
    y = jnp.where(y > 0, y, jnp.exp(jnp.minimum(y, 0.0)) - 1.0)

    # MaxPool1d(k=3, s=2, p=1): decimate FIRST into even/odd streams (both stride-2 loads start
    # at an aligned row 0), then a window-of-3 max on half-length data.
    ye_scr[...] = y                                 # y[l]
    yo_scr[...] = pltpu.roll(y, shift=L - 1, axis=0)    # y[(l+1) mod L]
    ye = ye_scr[pl.ds(0, Lh, stride=2), :]          # y[2j]
    yo = yo_scr[pl.ds(0, Lh, stride=2), :]          # y[2j+1]
    row0 = jax.lax.broadcasted_iota(jnp.int32, (Lh, 1), 0) == 0
    y_prev = jnp.where(row0, -jnp.inf, pltpu.roll(yo, shift=1, axis=0))     # y[2j-1]; -inf pad at j=0
    o_ref[0] = jnp.maximum(jnp.maximum(y_prev, ye), yo)


def conv_layer_forward(x, p):
    B, L, D = x.shape
    assert L % 2 == 0, "distilling ConvLayer implemented for even L"
    # TODO(synk): odd L would need (L+1)//2 pooled outputs to match PyTorch MaxPool1d exactly.
    return pl.pallas_call(
        _conv_distill_kernel,
        out_shape=jax.ShapeDtypeStruct((B, L // 2, D), jnp.float32),
        grid=(B,),
        in_specs=[
            pl.BlockSpec((1, L, D), lambda b: (b, 0, 0)),
            _weight_spec((3 * D, D)),
            _weight_spec((1, D)),
            _weight_spec((4, D)),
        ],
        out_specs=pl.BlockSpec((1, L // 2, D), lambda b: (b, 0, 0)),
        scratch_shapes=[pltpu.VMEM((L, D), jnp.float32),
                        pltpu.VMEM((L, D), jnp.float32)],
        compiler_params=pltpu.CompilerParams(
            dimension_semantics=("parallel",),
            vmem_limit_bytes=_vmem_limit_bytes()),
    )(x, p["w_cat"], p["b"].reshape(1, D), p["bn"])


# ---------------------------------------------------------------------------
# Module composition (final LayerNorm is fused into the last EncoderLayer's epilogue)
# ---------------------------------------------------------------------------

def encoder_forward(x, params, n_heads, attn_mask=None):
    # Informer builds FullAttention(mask_flag=False): no mask is ever applied in the encoder.
    if attn_mask is not None:
        raise NotImplementedError("Encoder uses FullAttention(mask_flag=False); attn_mask must be None.")
    attns = []
    attn_layers = params["attn_layers"]
    conv_layers = params["conv_layers"]
    norm = params["norm"]
    if conv_layers is not None:
        for al, cl in zip(attn_layers, conv_layers):
            x, attn = encoder_layer_forward(x, al, n_heads)
            x = conv_layer_forward(x, cl)
            attns.append(attn)
        x, attn = encoder_layer_forward(x, attn_layers[-1], n_heads, final_norm=norm)
        attns.append(attn)
    else:
        last = len(attn_layers) - 1
        for i, al in enumerate(attn_layers):
            x, attn = encoder_layer_forward(x, al, n_heads,
                                            final_norm=norm if i == last else None)
            attns.append(attn)
    return x, attns


# ---------------------------------------------------------------------------
# Deterministic parameter init (freshly-initialized synthetic module, eval mode)
# ---------------------------------------------------------------------------

def _normal(key, shape, scale=0.05, dtype=jnp.float32):
    return (scale * jax.random.normal(key, shape, dtype=jnp.float32)).astype(dtype)


def init_encoder_params(key, d_model, d_ff, n_heads, n_attn_layers, n_conv_layers):
    params = {"attn_layers": [], "conv_layers": [] if n_conv_layers > 0 else None}
    for _ in range(n_attn_layers):
        key, *ks = jax.random.split(key, 9)
        params["attn_layers"].append({
            # wqkv == [W_query.weight.T | W_key.weight.T | W_value.weight.T] (D, 3D); head h of
            # each block is columns h*E:(h+1)*E (matches .view(B, L, H, E) in PyTorch).
            "wqkv": _normal(ks[0], (d_model, 3 * d_model), dtype=jnp.bfloat16),
            "bqkv": _normal(ks[1], (3 * d_model,)),
            # wo == out_projection.weight.T
            "wo": _normal(ks[2], (d_model, d_model), dtype=jnp.bfloat16),
            "bo": _normal(ks[3], (d_model,)),
            "w1": _normal(ks[4], (d_model, d_ff), dtype=jnp.bfloat16),
            "b1": _normal(ks[5], (d_ff,)),
            "w2": _normal(ks[6], (d_ff, d_model), dtype=jnp.bfloat16),
            "b2": _normal(ks[7], (d_model,)),
            "ln1_g": jnp.ones((d_model,), jnp.float32), "ln1_b": jnp.zeros((d_model,), jnp.float32),
            "ln2_g": jnp.ones((d_model,), jnp.float32), "ln2_b": jnp.zeros((d_model,), jnp.float32),
        })
    for _ in range(n_conv_layers):
        key, k1, k2 = jax.random.split(key, 3)
        params["conv_layers"].append({
            # w_cat rows [k*D:(k+1)*D] == (PyTorch Conv1d weight)[:, :, k].T, stacked over 3 taps
            "w_cat": _normal(k1, (3 * d_model, d_model), dtype=jnp.bfloat16),
            "b": _normal(k2, (d_model,)),
            # BatchNorm1d defaults: gamma=1, beta=0, running_mean=0, running_var=1
            "bn": jnp.stack([jnp.ones((d_model,)), jnp.zeros((d_model,)),
                             jnp.zeros((d_model,)), jnp.ones((d_model,))]).astype(jnp.float32),
        })
    params["norm"] = {"g": jnp.ones((d_model,), jnp.float32),
                      "b": jnp.zeros((d_model,), jnp.float32)}
    return params


# ---------------------------------------------------------------------------

if __name__ == "__main__":
    B, L, D, H, FF = 2, 16, 32, 4, 64          # batch, seq, d_model, heads, d_ff
    key = jax.random.PRNGKey(0)
    k_x, k_p = jax.random.split(key)
    x = jax.random.normal(k_x, (B, L, D), dtype=jnp.float32)
    params = init_encoder_params(k_p, D, FF, n_heads=H, n_attn_layers=2, n_conv_layers=1)

    fwd = jax.jit(lambda xx, pp: encoder_forward(xx, pp, H))
    out, attns = fwd(x, params)
    out = jax.block_until_ready(out)

    assert out.shape == (B, L // 2, D), out.shape   # one distilling conv halves L
    assert len(attns) == 2
    assert bool(jnp.all(jnp.isfinite(out)))
    print("KERNEL_OK")
</pallas_src>

<mosaic_0001>
module attributes {stable_mosaic.version = 11 : i64} {
  func.func @_k(%arg0: i32, %arg1: memref<1x8x128xf32, #tpu.memory_space<vmem>>, %arg2: memref<8x128xf32, #tpu.memory_space<vmem>>, %arg3: memref<1x8x128xf32, #tpu.memory_space<vmem>>) attributes {dimension_semantics = [#tpu.dimension_semantics<parallel>], iteration_bounds = array<i64: 2>, scalar_prefetch = 0 : i64, scratch_operands = 0 : i64, tpu.core_type = #tpu.core_type<tc>, window_params = [{transform_indices = @transform_0, window_bounds = array<i64: 1, 8, 128>}, {pipeline_mode = #tpu.pipeline_mode<synchronous>, transform_indices = @transform_1, window_bounds = array<i64: 8, 128>}, {transform_indices = @transform_2, window_bounds = array<i64: 1, 8, 128>}]} {
    %c0 = arith.constant 0 : index
    %c0_0 = arith.constant 0 : index
    %c0_1 = arith.constant 0 : index
    %0 = vector.load %arg1[%c0, %c0_0, %c0_1] : memref<1x8x128xf32, #tpu.memory_space<vmem>>, vector<1x8x128xf32>
    %c0_2 = arith.constant 0 : index
    %c0_3 = arith.constant 0 : index
    %1 = vector.load %arg2[%c0_2, %c0_3] : memref<8x128xf32, #tpu.memory_space<vmem>>, vector<8x128xf32>
    %2 = vector.shape_cast %1 : vector<8x128xf32> to vector<1x8x128xf32>
    %3 = arith.addf %0, %2 : vector<1x8x128xf32>
    %c0_4 = arith.constant 0 : index
    %c0_5 = arith.constant 0 : index
    %c0_6 = arith.constant 0 : index
    %4 = vector.load %arg3[%c0_4, %c0_5, %c0_6] : memref<1x8x128xf32, #tpu.memory_space<vmem>>, vector<1x8x128xf32>
    tpu.vector_store %arg3[%c0_4, %c0_5, %c0_6], %3 {strides = array<i32>} : memref<1x8x128xf32, #tpu.memory_space<vmem>>, vector<1x8x128xf32>,
    return
  }
  func.func @transform_0(%arg0: i32) -> (i32, i32, i32) {
    %c0_i32 = arith.constant 0 : i32
    %c0_i32_0 = arith.constant 0 : i32
    %c0_i32_1 = arith.constant 0 : i32
    return %arg0, %c0_i32, %c0_i32_0 : i32, i32, i32
  }
  func.func @transform_1(%arg0: i32) -> (i32, i32) {
    %c0_i32 = arith.constant 0 : i32
    %c0_i32_0 = arith.constant 0 : i32
    %c0_i32_1 = arith.constant 0 : i32
    return %c0_i32, %c0_i32_0 : i32, i32
  }
  func.func @transform_2(%arg0: i32) -> (i32, i32, i32) {
    %c0_i32 = arith.constant 0 : i32
    %c0_i32_0 = arith.constant 0 : i32
    %c0_i32_1 = arith.constant 0 : i32
    return %arg0, %c0_i32, %c0_i32_0 : i32, i32, i32
  }
}

module attributes {stable_mosaic.version = 11 : i64} {
  func.func @_conv_distill_kernel(%arg0: i32, %arg1: memref<1x16x32xf32, #tpu.memory_space<vmem>>, %arg2: memref<96x32xbf16, #tpu.memory_space<vmem>>, %arg3: memref<1x32xf32, #tpu.memory_space<vmem>>, %arg4: memref<4x32xf32, #tpu.memory_space<vmem>>, %arg5: memref<1x8x32xf32, #tpu.memory_space<vmem>>, %arg6: memref<16x32xf32, #tpu.memory_space<vmem>>, %arg7: memref<16x32xf32, #tpu.memory_space<vmem>>) attributes {dimension_semantics = [#tpu.dimension_semantics<parallel>], iteration_bounds = array<i64: 2>, scalar_prefetch = 0 : i64, scratch_operands = 2 : i64, tpu.core_type = #tpu.core_type<tc>, window_params = [{transform_indices = @transform_0, window_bounds = array<i64: 1, 16, 32>}, {pipeline_mode = #tpu.pipeline_mode<synchronous>, transform_indices = @transform_1, window_bounds = array<i64: 96, 32>}, {pipeline_mode = #tpu.pipeline_mode<synchronous>, transform_indices = @transform_2, window_bounds = array<i64: 1, 32>}, {pipeline_mode = #tpu.pipeline_mode<synchronous>, transform_indices = @transform_3, window_bounds = array<i64: 4, 32>}, {transform_indices = @transform_4, window_bounds = array<i64: 1, 8, 32>}]} {
    %c0 = arith.constant 0 : index
    %c0_0 = arith.constant 0 : index
    %c0_1 = arith.constant 0 : index
    %0 = vector.load %arg1[%c0, %c0_0, %c0_1] : memref<1x16x32xf32, #tpu.memory_space<vmem>>, vector<1x16x32xf32>
    %1 = vector.shape_cast %0 : vector<1x16x32xf32> to vector<16x32xf32>
    %c1_i32 = arith.constant 1 : i32
    %2 = tpu.dynamic_rotate %1 by %c1_i32 dim 0 : vector<16x32xf32>, i32 -> vector<16x32xf32>
    %c15_i32 = arith.constant 15 : i32
    %3 = tpu.dynamic_rotate %1 by %c15_i32 dim 0 : vector<16x32xf32>, i32 -> vector<16x32xf32>
    %4 = tpu.concatenate %2, %1, %3 in 1 : vector<16x32xf32>, vector<16x32xf32>, vector<16x32xf32> -> vector<16x96xf32>
    %5 = arith.truncf %4 : vector<16x96xf32> to vector<16x96xbf16>
    %c0_2 = arith.constant 0 : index
    %c0_3 = arith.constant 0 : index
    %6 = vector.load %arg2[%c0_2, %c0_3] : memref<96x32xbf16, #tpu.memory_space<vmem>>, vector<96x32xbf16>
    %cst = arith.constant dense<0.000000e+00> : vector<16x32xf32>
    %7 = tpu.matmul %5, %6, %cst {dimension_numbers = #tpu.dot_dimension_numbers<[1], [0], [0], [1], [0, 0, 1, 1], [], []>} : vector<16x96xbf16>, vector<96x32xbf16>, vector<16x32xf32> -> vector<16x32xf32>
    %c0_4 = arith.constant 0 : index
    %c0_5 = arith.constant 0 : index
    %8 = vector.load %arg3[%c0_4, %c0_5] : memref<1x32xf32, #tpu.memory_space<vmem>>, vector<1x32xf32>
    %9 = vector.broadcast %8 : vector<1x32xf32> to vector<16x32xf32>
    %10 = arith.addf %7, %9 : vector<16x32xf32>
    %c0_6 = arith.constant 0 : index
    %c0_7 = arith.constant 0 : index
    %11 = vector.load %arg4[%c0_6, %c0_7] : memref<4x32xf32, #tpu.memory_space<vmem>>, vector<4x32xf32>
    %12 = vector.extract_strided_slice %11 {offsets = [0, 0], sizes = [1, 32], strides = [1, 1]} : vector<4x32xf32> to vector<1x32xf32>
    %13 = vector.extract_strided_slice %11 {offsets = [3, 0], sizes = [1, 32], strides = [1, 1]} : vector<4x32xf32> to vector<1x32xf32>
    %cst_8 = arith.constant 9.99999974E-6 : f32
    %14 = vector.broadcast %cst_8 : f32 to vector<1x32xf32>
    %15 = arith.addf %13, %14 : vector<1x32xf32>
    %16 = math.rsqrt %15 : vector<1x32xf32>
    %17 = arith.mulf %12, %16 : vector<1x32xf32>
    %18 = vector.extract_strided_slice %11 {offsets = [1, 0], sizes = [1, 32], strides = [1, 1]} : vector<4x32xf32> to vector<1x32xf32>
    %19 = vector.extract_strided_slice %11 {offsets = [2, 0], sizes = [1, 32], strides = [1, 1]} : vector<4x32xf32> to vector<1x32xf32>
    %20 = arith.mulf %19, %17 : vector<1x32xf32>
    %21 = arith.subf %18, %20 : vector<1x32xf32>
    %22 = vector.broadcast %17 : vector<1x32xf32> to vector<16x32xf32>
    %23 = arith.mulf %10, %22 : vector<16x32xf32>
    %24 = vector.broadcast %21 : vector<1x32xf32> to vector<16x32xf32>
    %25 = arith.addf %23, %24 : vector<16x32xf32>
    %cst_9 = arith.constant 0.000000e+00 : f32
    %26 = vector.broadcast %cst_9 : f32 to vector<16x32xf32>
    %27 = arith.cmpf ogt, %25, %26 : vector<16x32xf32>
    %cst_10 = arith.constant 0.000000e+00 : f32
    %28 = vector.broadcast %cst_10 : f32 to vector<16x32xf32>
    %29 = arith.minimumf %25, %28 : vector<16x32xf32>
    %30 = math.exp %29 : vector<16x32xf32>
    %cst_11 = arith.constant 1.000000e+00 : f32
    %31 = vector.broadcast %cst_11 : f32 to vector<16x32xf32>
    %32 = arith.subf %30, %31 : vector<16x32xf32>
    %33 = arith.select %27, %25, %32 : vector<16x32xi1>, vector<16x32xf32>
    %c0_12 = arith.constant 0 : index
    %c0_13 = arith.constant 0 : index
    %34 = vector.load %arg6[%c0_12, %c0_13] : memref<16x32xf32, #tpu.memory_space<vmem>>, vector<16x32xf32>
    tpu.vector_store %arg6[%c0_12, %c0_13], %33 {strides = array<i32>} : memref<16x32xf32, #tpu.memory_space<vmem>>, vector<16x32xf32>,
    %c15_i32_14 = arith.constant 15 : i32
    %35 = tpu.dynamic_rotate %33 by %c15_i32_14 dim 0 : vector<16x32xf32>, i32 -> vector<16x32xf32>
    %c0_15 = arith.constant 0 : index
    %c0_16 = arith.constant 0 : index
    %36 = vector.load %arg7[%c0_15, %c0_16] : memref<16x32xf32, #tpu.memory_space<vmem>>, vector<16x32xf32>
    tpu.vector_store %arg7[%c0_15, %c0_16], %35 {strides = array<i32>} : memref<16x32xf32, #tpu.memory_space<vmem>>, vector<16x32xf32>,
    %c0_17 = arith.constant 0 : index
    %c0_18 = arith.constant 0 : index
    %37 = tpu.strided_load %arg6[%c0_17, %c0_18] {strides = array<i32: 2, 1>} : memref<16x32xf32, #tpu.memory_space<vmem>>, vector<8x32xf32>
    %c0_19 = arith.constant 0 : index
    %c0_20 = arith.constant 0 : index
    %38 = tpu.strided_load %arg7[%c0_19, %c0_20] {strides = array<i32: 2, 1>} : memref<16x32xf32, #tpu.memory_space<vmem>>, vector<8x32xf32>
    %39 = tpu.iota {dimensions = array<i32: 0>} : vector<8x1xi32>
    %c0_i32 = arith.constant 0 : i32
    %40 = vector.broadcast %c0_i32 : i32 to vector<8x1xi32>
    %41 = arith.cmpi eq, %39, %40 : vector<8x1xi32>
    %c1_i32_21 = arith.constant 1 : i32
    %42 = tpu.dynamic_rotate %38 by %c1_i32_21 dim 0 : vector<8x32xf32>, i32 -> vector<8x32xf32>
    %cst_22 = arith.constant 0xFF800000 : f32
    %43 = vector.shape_cast %41 : vector<8x1xi1> to vector<8x1xi1>
    %44 = vector.broadcast %43 : vector<8x1xi1> to vector<8x32xi1>
    %45 = vector.broadcast %cst_22 : f32 to vector<8x32xf32>
    %46 = arith.select %44, %45, %42 : vector<8x32xi1>, vector<8x32xf32>
    %47 = arith.maximumf %46, %37 : vector<8x32xf32>
    %48 = arith.maximumf %47, %38 : vector<8x32xf32>
    %c0_23 = arith.constant 0 : index
    %c0_24 = arith.constant 0 : index
    %c0_25 = arith.constant 0 : index
    %49 = vector.load %arg5[%c0_23, %c0_24, %c0_25] : memref<1x8x32xf32, #tpu.memory_space<vmem>>, vector<1x8x32xf32>
    %50 = vector.shape_cast %49 : vector<1x8x32xf32> to vector<8x32xf32>
    %51 = vector.shape_cast %48 : vector<8x32xf32> to vector<1x8x32xf32>
    tpu.vector_store %arg5[%c0_23, %c0_24, %c0_25], %51 {strides = array<i32>} : memref<1x8x32xf32, #tpu.memory_space<vmem>>, vector<1x8x32xf32>,
    return
  }
  func.func @transform_0(%arg0: i32) -> (i32, i32, i32) {
    %c0_i32 = arith.constant 0 : i32
    %c0_i32_0 = arith.constant 0 : i32
    %c0_i32_1 = arith.constant 0 : i32
    return %arg0, %c0_i32, %c0_i32_0 : i32, i32, i32
  }
  func.func @transform_1(%arg0: i32) -> (i32, i32) {
    %c0_i32 = arith.constant 0 : i32
    %c0_i32_0 = arith.constant 0 : i32
    %c0_i32_1 = arith.constant 0 : i32
    return %c0_i32, %c0_i32_0 : i32, i32
  }
  func.func @transform_2(%arg0: i32) -> (i32, i32) {
    %c0_i32 = arith.constant 0 : i32
    %c0_i32_0 = arith.constant 0 : i32
    %c0_i32_1 = arith.constant 0 : i32
    return %c0_i32, %c0_i32_0 : i32, i32
  }
  func.func @transform_3(%arg0: i32) -> (i32, i32) {
    %c0_i32 = arith.constant 0 : i32
    %c0_i32_0 = arith.constant 0 : i32
    %c0_i32_1 = arith.constant 0 : i32
    return %c0_i32, %c0_i32_0 : i32, i32
  }
  func.func @transform_4(%arg0: i32) -> (i32, i32, i32) {
    %c0_i32 = arith.constant 0 : i32
    %c0_i32_0 = arith.constant 0 : i32
    %c0_i32_1 = arith.constant 0 : i32
    return %arg0, %c0_i32, %c0_i32_0 : i32, i32, i32
  }
}

module attributes {stable_mosaic.version = 11 : i64} {
  func.func @_encoder_layer_kernel(%arg0: i32, %arg1: memref<1x16x32xf32, #tpu.memory_space<vmem>>, %arg2: memref<32x96xbf16, #tpu.memory_space<vmem>>, %arg3: memref<1x96xf32, #tpu.memory_space<vmem>>, %arg4: memref<32x32xbf16, #tpu.memory_space<vmem>>, %arg5: memref<1x32xf32, #tpu.memory_space<vmem>>, %arg6: memref<1x32xf32, #tpu.memory_space<vmem>>, %arg7: memref<1x32xf32, #tpu.memory_space<vmem>>, %arg8: memref<32x64xbf16, #tpu.memory_space<vmem>>, %arg9: memref<1x64xf32, #tpu.memory_space<vmem>>, %arg10: memref<64x32xbf16, #tpu.memory_space<vmem>>, %arg11: memref<1x32xf32, #tpu.memory_space<vmem>>, %arg12: memref<1x32xf32, #tpu.memory_space<vmem>>, %arg13: memref<1x32xf32, #tpu.memory_space<vmem>>, %arg14: memref<1x16x32xf32, #tpu.memory_space<vmem>>) attributes {dimension_semantics = [#tpu.dimension_semantics<parallel>], iteration_bounds = array<i64: 2>, scalar_prefetch = 0 : i64, scratch_operands = 0 : i64, tpu.core_type = #tpu.core_type<tc>, window_params = [{transform_indices = @transform_0, window_bounds = array<i64: 1, 16, 32>}, {pipeline_mode = #tpu.pipeline_mode<synchronous>, transform_indices = @transform_1, window_bounds = array<i64: 32, 96>}, {pipeline_mode = #tpu.pipeline_mode<synchronous>, transform_indices = @transform_2, window_bounds = array<i64: 1, 96>}, {pipeline_mode = #tpu.pipeline_mode<synchronous>, transform_indices = @transform_3, window_bounds = array<i64: 32, 32>}, {pipeline_mode = #tpu.pipeline_mode<synchronous>, transform_indices = @transform_4, window_bounds = array<i64: 1, 32>}, {pipeline_mode = #tpu.pipeline_mode<synchronous>, transform_indices = @transform_5, window_bounds = array<i64: 1, 32>}, {pipeline_mode = #tpu.pipeline_mode<synchronous>, transform_indices = @transform_6, window_bounds = array<i64: 1, 32>}, {pipeline_mode = #tpu.pipeline_mode<synchronous>, transform_indices = @transform_7, window_bounds = array<i64: 32, 64>}, {pipeline_mode = #tpu.pipeline_mode<synchronous>, transform_indices = @transform_8, window_bounds = array<i64: 1, 64>}, {pipeline_mode = #tpu.pipeline_mode<synchronous>, transform_indices = @transform_9, window_bounds = array<i64: 64, 32>}, {pipeline_mode = #tpu.pipeline_mode<synchronous>, transform_indices = @transform_10, window_bounds = array<i64: 1, 32>}, {pipeline_mode = #tpu.pipeline_mode<synchronous>, transform_indices = @transform_11, window_bounds = array<i64: 1, 32>}, {pipeline_mode = #tpu.pipeline_mode<synchronous>, transform_indices = @transform_12, window_bounds = array<i64: 1, 32>}, {transform_indices = @transform_13, window_bounds = array<i64: 1, 16, 32>}]} {
    %c0 = arith.constant 0 : index
    %c0_0 = arith.constant 0 : index
    %c0_1 = arith.constant 0 : index
    %0 = vector.load %arg1[%c0, %c0_0, %c0_1] : memref<1x16x32xf32, #tpu.memory_space<vmem>>, vector<1x16x32xf32>
    %1 = vector.shape_cast %0 : vector<1x16x32xf32> to vector<16x32xf32>
    %2 = arith.truncf %1 : vector<16x32xf32> to vector<16x32xbf16>
    %c0_2 = arith.constant 0 : index
    %c0_3 = arith.constant 0 : index
    %3 = vector.load %arg2[%c0_2, %c0_3] : memref<32x96xbf16, #tpu.memory_space<vmem>>, vector<32x96xbf16>
    %cst = arith.constant dense<0.000000e+00> : vector<16x96xf32>
    %4 = tpu.matmul %2, %3, %cst {dimension_numbers = #tpu.dot_dimension_numbers<[1], [0], [0], [1], [0, 0, 1, 1], [], []>} : vector<16x32xbf16>, vector<32x96xbf16>, vector<16x96xf32> -> vector<16x96xf32>
    %c0_4 = arith.constant 0 : index
    %c0_5 = arith.constant 0 : index
    %5 = vector.load %arg3[%c0_4, %c0_5] : memref<1x96xf32, #tpu.memory_space<vmem>>, vector<1x96xf32>
    %6 = vector.broadcast %5 : vector<1x96xf32> to vector<16x96xf32>
    %7 = arith.addf %4, %6 : vector<16x96xf32>
    %8 = vector.extract_strided_slice %7 {offsets = [0, 0], sizes = [16, 32], strides = [1, 1]} : vector<16x96xf32> to vector<16x32xf32>
    %cst_6 = arith.constant 0.353553385 : f32
    %9 = vector.broadcast %cst_6 : f32 to vector<16x32xf32>
    %10 = arith.mulf %8, %9 : vector<16x32xf32>
    %11 = arith.truncf %10 : vector<16x32xf32> to vector<16x32xbf16>
    %12 = vector.extract_strided_slice %7 {offsets = [0, 32], sizes = [16, 32], strides = [1, 1]} : vector<16x96xf32> to vector<16x32xf32>
    %13 = arith.truncf %12 : vector<16x32xf32> to vector<16x32xbf16>
    %14 = vector.extract_strided_slice %7 {offsets = [0, 64], sizes = [16, 32], strides = [1, 1]} : vector<16x96xf32> to vector<16x32xf32>
    %15 = arith.truncf %14 : vector<16x32xf32> to vector<16x32xbf16>
    %c0_7 = arith.constant 0 : index
    %c0_8 = arith.constant 0 : index
    %16 = vector.load %arg4[%c0_7, %c0_8] : memref<32x32xbf16, #tpu.memory_space<vmem>>, vector<32x32xbf16>
    %c0_9 = arith.constant 0 : index
    %c0_10 = arith.constant 0 : index
    %17 = vector.load %arg5[%c0_9, %c0_10] : memref<1x32xf32, #tpu.memory_space<vmem>>, vector<1x32xf32>
    %18 = vector.extract_strided_slice %11 {offsets = [0, 0], sizes = [16, 8], strides = [1, 1]} : vector<16x32xbf16> to vector<16x8xbf16>
    %19 = vector.extract_strided_slice %13 {offsets = [0, 0], sizes = [16, 8], strides = [1, 1]} : vector<16x32xbf16> to vector<16x8xbf16>
    %20 = vector.extract_strided_slice %15 {offsets = [0, 0], sizes = [16, 8], strides = [1, 1]} : vector<16x32xbf16> to vector<16x8xbf16>
    %cst_11 = arith.constant dense<0.000000e+00> : vector<16x16xf32>
    %21 = tpu.matmul %18, %19, %cst_11 {dimension_numbers = #tpu.dot_dimension_numbers<[1], [1], [0], [0], [0, 0, 1, 0], [], []>} : vector<16x8xbf16>, vector<16x8xbf16>, vector<16x16xf32> -> vector<16x16xf32>
    %cst_12 = arith.constant dense<0xFF800000> : vector<16xf32>
    %22 = vector.multi_reduction <maximumf>, %21, %cst_12 [1] : vector<16x16xf32> to vector<16xf32>
    %23 = vector.shape_cast %22 : vector<16xf32> to vector<16x1xf32>
    %24 = vector.broadcast %23 : vector<16x1xf32> to vector<16x16xf32>
    %25 = arith.subf %21, %24 : vector<16x16xf32>
    %26 = math.exp %25 : vector<16x16xf32>
    %cst_13 = arith.constant dense<0.000000e+00> : vector<16xf32>
    %27 = vector.multi_reduction <add>, %26, %cst_13 [1] : vector<16x16xf32> to vector<16xf32>
    %28 = vector.shape_cast %27 : vector<16xf32> to vector<16x1xf32>
    %29 = arith.truncf %26 : vector<16x16xf32> to vector<16x16xbf16>
    %cst_14 = arith.constant dense<0.000000e+00> : vector<16x8xf32>
    %30 = tpu.matmul %29, %20, %cst_14 {dimension_numbers = #tpu.dot_dimension_numbers<[1], [0], [0], [1], [0, 0, 1, 1], [], []>} : vector<16x16xbf16>, vector<16x8xbf16>, vector<16x8xf32> -> vector<16x8xf32>
    %31 = tpu.reciprocal %28 {approx = true} : vector<16x1xf32> -> vector<16x1xf32>
    %32 = vector.broadcast %31 : vector<16x1xf32> to vector<16x8xf32>
    %33 = arith.mulf %30, %32 : vector<16x8xf32>
    %34 = arith.truncf %33 : vector<16x8xf32> to vector<16x8xbf16>
    %35 = vector.extract_strided_slice %16 {offsets = [0, 0], sizes = [8, 32], strides = [1, 1]} : vector<32x32xbf16> to vector<8x32xbf16>
    %cst_15 = arith.constant dense<0.000000e+00> : vector<16x32xf32>
    %36 = tpu.matmul %34, %35, %cst_15 {dimension_numbers = #tpu.dot_dimension_numbers<[1], [0], [0], [1], [0, 0, 1, 1], [], []>} : vector<16x8xbf16>, vector<8x32xbf16>, vector<16x32xf32> -> vector<16x32xf32>
    %37 = vector.broadcast %17 : vector<1x32xf32> to vector<16x32xf32>
    %38 = arith.addf %37, %36 : vector<16x32xf32>
    %39 = vector.extract_strided_slice %11 {offsets = [0, 8], sizes = [16, 8], strides = [1, 1]} : vector<16x32xbf16> to vector<16x8xbf16>
    %40 = vector.extract_strided_slice %13 {offsets = [0, 8], sizes = [16, 8], strides = [1, 1]} : vector<16x32xbf16> to vector<16x8xbf16>
    %41 = vector.extract_strided_slice %15 {offsets = [0, 8], sizes = [16, 8], strides = [1, 1]} : vector<16x32xbf16> to vector<16x8xbf16>
    %cst_16 = arith.constant dense<0.000000e+00> : vector<16x16xf32>
    %42 = tpu.matmul %39, %40, %cst_16 {dimension_numbers = #tpu.dot_dimension_numbers<[1], [1], [0], [0], [0, 0, 1, 0], [], []>} : vector<16x8xbf16>, vector<16x8xbf16>, vector<16x16xf32> -> vector<16x16xf32>
    %cst_17 = arith.constant dense<0xFF800000> : vector<16xf32>
    %43 = vector.multi_reduction <maximumf>, %42, %cst_17 [1] : vector<16x16xf32> to vector<16xf32>
    %44 = vector.shape_cast %43 : vector<16xf32> to vector<16x1xf32>
    %45 = vector.broadcast %44 : vector<16x1xf32> to vector<16x16xf32>
    %46 = arith.subf %42, %45 : vector<16x16xf32>
    %47 = math.exp %46 : vector<16x16xf32>
    %cst_18 = arith.constant dense<0.000000e+00> : vector<16xf32>
    %48 = vector.multi_reduction <add>, %47, %cst_18 [1] : vector<16x16xf32> to vector<16xf32>
    %49 = vector.shape_cast %48 : vector<16xf32> to vector<16x1xf32>
    %50 = arith.truncf %47 : vector<16x16xf32> to vector<16x16xbf16>
    %cst_19 = arith.constant dense<0.000000e+00> : vector<16x8xf32>
    %51 = tpu.matmul %50, %41, %cst_19 {dimension_numbers = #tpu.dot_dimension_numbers<[1], [0], [0], [1], [0, 0, 1, 1], [], []>} : vector<16x16xbf16>, vector<16x8xbf16>, vector<16x8xf32> -> vector<16x8xf32>
    %52 = tpu.reciprocal %49 {approx = true} : vector<16x1xf32> -> vector<16x1xf32>
    %53 = vector.broadcast %52 : vector<16x1xf32> to vector<16x8xf32>
    %54 = arith.mulf %51, %53 : vector<16x8xf32>
    %55 = arith.truncf %54 : vector<16x8xf32> to vector<16x8xbf16>
    %56 = vector.extract_strided_slice %16 {offsets = [8, 0], sizes = [8, 32], strides = [1, 1]} : vector<32x32xbf16> to vector<8x32xbf16>
    %cst_20 = arith.constant dense<0.000000e+00> : vector<16x32xf32>
    %57 = tpu.matmul %55, %56, %cst_20 {dimension_numbers = #tpu.dot_dimension_numbers<[1], [0], [0], [1], [0, 0, 1, 1], [], []>} : vector<16x8xbf16>, vector<8x32xbf16>, vector<16x32xf32> -> vector<16x32xf32>
    %58 = arith.addf %38, %57 : vector<16x32xf32>
    %59 = vector.extract_strided_slice %11 {offsets = [0, 16], sizes = [16, 8], strides = [1, 1]} : vector<16x32xbf16> to vector<16x8xbf16>
    %60 = vector.extract_strided_slice %13 {offsets = [0, 16], sizes = [16, 8], strides = [1, 1]} : vector<16x32xbf16> to vector<16x8xbf16>
    %61 = vector.extract_strided_slice %15 {offsets = [0, 16], sizes = [16, 8], strides = [1, 1]} : vector<16x32xbf16> to vector<16x8xbf16>
    %cst_21 = arith.constant dense<0.000000e+00> : vector<16x16xf32>
    %62 = tpu.matmul %59, %60, %cst_21 {dimension_numbers = #tpu.dot_dimension_numbers<[1], [1], [0], [0], [0, 0, 1, 0], [], []>} : vector<16x8xbf16>, vector<16x8xbf16>, vector<16x16xf32> -> vector<16x16xf32>
    %cst_22 = arith.constant dense<0xFF800000> : vector<16xf32>
    %63 = vector.multi_reduction <maximumf>, %62, %cst_22 [1] : vector<16x16xf32> to vector<16xf32>
    %64 = vector.shape_cast %63 : vector<16xf32> to vector<16x1xf32>
    %65 = vector.broadcast %64 : vector<16x1xf32> to vector<16x16xf32>
    %66 = arith.subf %62, %65 : vector<16x16xf32>
    %67 = math.exp %66 : vector<16x16xf32>
    %cst_23 = arith.constant dense<0.000000e+00> : vector<16xf32>
    %68 = vector.multi_reduction <add>, %67, %cst_23 [1] : vector<16x16xf32> to vector<16xf32>
    %69 = vector.shape_cast %68 : vector<16xf32> to vector<16x1xf32>
    %70 = arith.truncf %67 : vector<16x16xf32> to vector<16x16xbf16>
    %cst_24 = arith.constant dense<0.000000e+00> : vector<16x8xf32>
    %71 = tpu.matmul %70, %61, %cst_24 {dimension_numbers = #tpu.dot_dimension_numbers<[1], [0], [0], [1], [0, 0, 1, 1], [], []>} : vector<16x16xbf16>, vector<16x8xbf16>, vector<16x8xf32> -> vector<16x8xf32>
    %72 = tpu.reciprocal %69 {approx = true} : vector<16x1xf32> -> vector<16x1xf32>
    %73 = vector.broadcast %72 : vector<16x1xf32> to vector<16x8xf32>
    %74 = arith.mulf %71, %73 : vector<16x8xf32>
    %75 = arith.truncf %74 : vector<16x8xf32> to vector<16x8xbf16>
    %76 = vector.extract_strided_slice %16 {offsets = [16, 0], sizes = [8, 32], strides = [1, 1]} : vector<32x32xbf16> to vector<8x32xbf16>
    %cst_25 = arith.constant dense<0.000000e+00> : vector<16x32xf32>
    %77 = tpu.matmul %75, %76, %cst_25 {dimension_numbers = #tpu.dot_dimension_numbers<[1], [0], [0], [1], [0, 0, 1, 1], [], []>} : vector<16x8xbf16>, vector<8x32xbf16>, vector<16x32xf32> -> vector<16x32xf32>
    %78 = arith.addf %58, %77 : vector<16x32xf32>
    %79 = vector.extract_strided_slice %11 {offsets = [0, 24], sizes = [16, 8], strides = [1, 1]} : vector<16x32xbf16> to vector<16x8xbf16>
    %80 = vector.extract_strided_slice %13 {offsets = [0, 24], sizes = [16, 8], strides = [1, 1]} : vector<16x32xbf16> to vector<16x8xbf16>
    %81 = vector.extract_strided_slice %15 {offsets = [0, 24], sizes = [16, 8], strides = [1, 1]} : vector<16x32xbf16> to vector<16x8xbf16>
    %cst_26 = arith.constant dense<0.000000e+00> : vector<16x16xf32>
    %82 = tpu.matmul %79, %80, %cst_26 {dimension_numbers = #tpu.dot_dimension_numbers<[1], [1], [0], [0], [0, 0, 1, 0], [], []>} : vector<16x8xbf16>, vector<16x8xbf16>, vector<16x16xf32> -> vector<16x16xf32>
    %cst_27 = arith.constant dense<0xFF800000> : vector<16xf32>
    %83 = vector.multi_reduction <maximumf>, %82, %cst_27 [1] : vector<16x16xf32> to vector<16xf32>
    %84 = vector.shape_cast %83 : vector<16xf32> to vector<16x1xf32>
    %85 = vector.broadcast %84 : vector<16x1xf32> to vector<16x16xf32>
    %86 = arith.subf %82, %85 : vector<16x16xf32>
    %87 = math.exp %86 : vector<16x16xf32>
    %cst_28 = arith.constant dense<0.000000e+00> : vector<16xf32>
    %88 = vector.multi_reduction <add>, %87, %cst_28 [1] : vector<16x16xf32> to vector<16xf32>
    %89 = vector.shape_cast %88 : vector<16xf32> to vector<16x1xf32>
    %90 = arith.truncf %87 : vector<16x16xf32> to vector<16x16xbf16>
    %cst_29 = arith.constant dense<0.000000e+00> : vector<16x8xf32>
    %91 = tpu.matmul %90, %81, %cst_29 {dimension_numbers = #tpu.dot_dimension_numbers<[1], [0], [0], [1], [0, 0, 1, 1], [], []>} : vector<16x16xbf16>, vector<16x8xbf16>, vector<16x8xf32> -> vector<16x8xf32>
    %92 = tpu.reciprocal %89 {approx = true} : vector<16x1xf32> -> vector<16x1xf32>
    %93 = vector.broadcast %92 : vector<16x1xf32> to vector<16x8xf32>
    %94 = arith.mulf %91, %93 : vector<16x8xf32>
    %95 = arith.truncf %94 : vector<16x8xf32> to vector<16x8xbf16>
    %96 = vector.extract_strided_slice %16 {offsets = [24, 0], sizes = [8, 32], strides = [1, 1]} : vector<32x32xbf16> to vector<8x32xbf16>
    %cst_30 = arith.constant dense<0.000000e+00> : vector<16x32xf32>
    %97 = tpu.matmul %95, %96, %cst_30 {dimension_numbers = #tpu.dot_dimension_numbers<[1], [0], [0], [1], [0, 0, 1, 1], [], []>} : vector<16x8xbf16>, vector<8x32xbf16>, vector<16x32xf32> -> vector<16x32xf32>
    %98 = arith.addf %78, %97 : vector<16x32xf32>
    %99 = arith.addf %1, %98 : vector<16x32xf32>
    %cst_31 = arith.constant dense<0.000000e+00> : vector<16xf32>
    %100 = vector.multi_reduction <add>, %99, %cst_31 [1] : vector<16x32xf32> to vector<16xf32>
    %101 = vector.shape_cast %100 : vector<16xf32> to vector<16x1xf32>
    %cst_32 = arith.constant 3.200000e+01 : f32
    %102 = vector.broadcast %cst_32 : f32 to vector<16x1xf32>
    %103 = arith.divf %101, %102 : vector<16x1xf32>
    %104 = vector.broadcast %103 : vector<16x1xf32> to vector<16x32xf32>
    %105 = arith.subf %99, %104 : vector<16x32xf32>
    %106 = arith.mulf %105, %105 : vector<16x32xf32>
    %cst_33 = arith.constant dense<0.000000e+00> : vector<16xf32>
    %107 = vector.multi_reduction <add>, %106, %cst_33 [1] : vector<16x32xf32> to vector<16xf32>
    %108 = vector.shape_cast %107 : vector<16xf32> to vector<16x1xf32>
    %cst_34 = arith.constant 3.200000e+01 : f32
    %109 = vector.broadcast %cst_34 : f32 to vector<16x1xf32>
    %110 = arith.divf %108, %109 : vector<16x1xf32>
    %111 = vector.broadcast %103 : vector<16x1xf32> to vector<16x32xf32>
    %112 = arith.subf %99, %111 : vector<16x32xf32>
    %cst_35 = arith.constant 9.99999974E-6 : f32
    %113 = vector.broadcast %cst_35 : f32 to vector<16x1xf32>
    %114 = arith.addf %110, %113 : vector<16x1xf32>
    %115 = math.rsqrt %114 : vector<16x1xf32>
    %116 = vector.broadcast %115 : vector<16x1xf32> to vector<16x32xf32>
    %117 = arith.mulf %112, %116 : vector<16x32xf32>
    %c0_36 = arith.constant 0 : index
    %c0_37 = arith.constant 0 : index
    %118 = vector.load %arg6[%c0_36, %c0_37] : memref<1x32xf32, #tpu.memory_space<vmem>>, vector<1x32xf32>
    %119 = vector.broadcast %118 : vector<1x32xf32> to vector<16x32xf32>
    %120 = arith.mulf %117, %119 : vector<16x32xf32>
    %c0_38 = arith.constant 0 : index
    %c0_39 = arith.constant 0 : index
    %121 = vector.load %arg7[%c0_38, %c0_39] : memref<1x32xf32, #tpu.memory_space<vmem>>, vector<1x32xf32>
    %122 = vector.broadcast %121 : vector<1x32xf32> to vector<16x32xf32>
    %123 = arith.addf %120, %122 : vector<16x32xf32>
    %124 = arith.truncf %123 : vector<16x32xf32> to vector<16x32xbf16>
    %c0_40 = arith.constant 0 : index
    %c0_41 = arith.constant 0 : index
    %125 = vector.load %arg8[%c0_40, %c0_41] : memref<32x64xbf16, #tpu.memory_space<vmem>>, vector<32x64xbf16>
    %cst_42 = arith.constant dense<0.000000e+00> : vector<16x64xf32>
    %126 = tpu.matmul %124, %125, %cst_42 {dimension_numbers = #tpu.dot_dimension_numbers<[1], [0], [0], [1], [0, 0, 1, 1], [], []>} : vector<16x32xbf16>, vector<32x64xbf16>, vector<16x64xf32> -> vector<16x64xf32>
    %c0_43 = arith.constant 0 : index
    %c0_44 = arith.constant 0 : index
    %127 = vector.load %arg9[%c0_43, %c0_44] : memref<1x64xf32, #tpu.memory_space<vmem>>, vector<1x64xf32>
    %128 = vector.broadcast %127 : vector<1x64xf32> to vector<16x64xf32>
    %129 = arith.addf %126, %128 : vector<16x64xf32>
    %cst_45 = arith.constant 0.000000e+00 : f32
    %130 = vector.broadcast %cst_45 : f32 to vector<16x64xf32>
    %131 = arith.maximumf %129, %130 : vector<16x64xf32>
    %132 = arith.truncf %131 : vector<16x64xf32> to vector<16x64xbf16>
    %c0_46 = arith.constant 0 : index
    %c0_47 = arith.constant 0 : index
    %133 = vector.load %arg10[%c0_46, %c0_47] : memref<64x32xbf16, #tpu.memory_space<vmem>>, vector<64x32xbf16>
    %cst_48 = arith.constant dense<0.000000e+00> : vector<16x32xf32>
    %134 = tpu.matmul %132, %133, %cst_48 {dimension_numbers = #tpu.dot_dimension_numbers<[1], [0], [0], [1], [0, 0, 1, 1], [], []>} : vector<16x64xbf16>, vector<64x32xbf16>, vector<16x32xf32> -> vector<16x32xf32>
    %c0_49 = arith.constant 0 : index
    %c0_50 = arith.constant 0 : index
    %135 = vector.load %arg11[%c0_49, %c0_50] : memref<1x32xf32, #tpu.memory_space<vmem>>, vector<1x32xf32>
    %136 = vector.broadcast %135 : vector<1x32xf32> to vector<16x32xf32>
    %137 = arith.addf %134, %136 : vector<16x32xf32>
    %138 = arith.addf %123, %137 : vector<16x32xf32>
    %cst_51 = arith.constant dense<0.000000e+00> : vector<16xf32>
    %139 = vector.multi_reduction <add>, %138, %cst_51 [1] : vector<16x32xf32> to vector<16xf32>
    %140 = vector.shape_cast %139 : vector<16xf32> to vector<16x1xf32>
    %cst_52 = arith.constant 3.200000e+01 : f32
    %141 = vector.broadcast %cst_52 : f32 to vector<16x1xf32>
    %142 = arith.divf %140, %141 : vector<16x1xf32>
    %143 = vector.broadcast %142 : vector<16x1xf32> to vector<16x32xf32>
    %144 = arith.subf %138, %143 : vector<16x32xf32>
    %145 = arith.mulf %144, %144 : vector<16x32xf32>
    %cst_53 = arith.constant dense<0.000000e+00> : vector<16xf32>
    %146 = vector.multi_reduction <add>, %145, %cst_53 [1] : vector<16x32xf32> to vector<16xf32>
    %147 = vector.shape_cast %146 : vector<16xf32> to vector<16x1xf32>
    %cst_54 = arith.constant 3.200000e+01 : f32
    %148 = vector.broadcast %cst_54 : f32 to vector<16x1xf32>
    %149 = arith.divf %147, %148 : vector<16x1xf32>
    %150 = vector.broadcast %142 : vector<16x1xf32> to vector<16x32xf32>
    %151 = arith.subf %138, %150 : vector<16x32xf32>
    %cst_55 = arith.constant 9.99999974E-6 : f32
    %152 = vector.broadcast %cst_55 : f32 to vector<16x1xf32>
    %153 = arith.addf %149, %152 : vector<16x1xf32>
    %154 = math.rsqrt %153 : vector<16x1xf32>
    %155 = vector.broadcast %154 : vector<16x1xf32> to vector<16x32xf32>
    %156 = arith.mulf %151, %155 : vector<16x32xf32>
    %c0_56 = arith.constant 0 : index
    %c0_57 = arith.constant 0 : index
    %157 = vector.load %arg12[%c0_56, %c0_57] : memref<1x32xf32, #tpu.memory_space<vmem>>, vector<1x32xf32>
    %158 = vector.broadcast %157 : vector<1x32xf32> to vector<16x32xf32>
    %159 = arith.mulf %156, %158 : vector<16x32xf32>
    %c0_58 = arith.constant 0 : index
    %c0_59 = arith.constant 0 : index
    %160 = vector.load %arg13[%c0_58, %c0_59] : memref<1x32xf32, #tpu.memory_space<vmem>>, vector<1x32xf32>
    %161 = vector.broadcast %160 : vector<1x32xf32> to vector<16x32xf32>
    %162 = arith.addf %159, %161 : vector<16x32xf32>
    %c0_60 = arith.constant 0 : index
    %c0_61 = arith.constant 0 : index
    %c0_62 = arith.constant 0 : index
    %163 = vector.load %arg14[%c0_60, %c0_61, %c0_62] : memref<1x16x32xf32, #tpu.memory_space<vmem>>, vector<1x16x32xf32>
    %164 = vector.shape_cast %163 : vector<1x16x32xf32> to vector<16x32xf32>
    %165 = vector.shape_cast %162 : vector<16x32xf32> to vector<1x16x32xf32>
    tpu.vector_store %arg14[%c0_60, %c0_61, %c0_62], %165 {strides = array<i32>} : memref<1x16x32xf32, #tpu.memory_space<vmem>>, vector<1x16x32xf32>,
    return
  }
  func.func @transform_0(%arg0: i32) -> (i32, i32, i32) {
    %c0_i32 = arith.constant 0 : i32
    %c0_i32_0 = arith.constant 0 : i32
    %c0_i32_1 = arith.constant 0 : i32
    return %arg0, %c0_i32, %c0_i32_0 : i32, i32, i32
  }
  func.func @transform_1(%arg0: i32) -> (i32, i32) {
    %c0_i32 = arith.constant 0 : i32
    %c0_i32_0 = arith.constant 0 : i32
    %c0_i32_1 = arith.constant 0 : i32
    return %c0_i32, %c0_i32_0 : i32, i32
  }
  func.func @transform_2(%arg0: i32) -> (i32, i32) {
    %c0_i32 = arith.constant 0 : i32
    %c0_i32_0 = arith.constant 0 : i32
    %c0_i32_1 = arith.constant 0 : i32
    return %c0_i32, %c0_i32_0 : i32, i32
  }
  func.func @transform_3(%arg0: i32) -> (i32, i32) {
    %c0_i32 = arith.constant 0 : i32
    %c0_i32_0 = arith.constant 0 : i32
    %c0_i32_1 = arith.constant 0 : i32
    return %c0_i32, %c0_i32_0 : i32, i32
  }
  func.func @transform_4(%arg0: i32) -> (i32, i32) {
    %c0_i32 = arith.constant 0 : i32
    %c0_i32_0 = arith.constant 0 : i32
    %c0_i32_1 = arith.constant 0 : i32
    return %c0_i32, %c0_i32_0 : i32, i32
  }
  func.func @transform_5(%arg0: i32) -> (i32, i32) {
    %c0_i32 = arith.constant 0 : i32
    %c0_i32_0 = arith.constant 0 : i32
    %c0_i32_1 = arith.constant 0 : i32
    return %c0_i32, %c0_i32_0 : i32, i32
  }
  func.func @transform_6(%arg0: i32) -> (i32, i32) {
    %c0_i32 = arith.constant 0 : i32
    %c0_i32_0 = arith.constant 0 : i32
    %c0_i32_1 = arith.constant 0 : i32
    return %c0_i32, %c0_i32_0 : i32, i32
  }
  func.func @transform_7(%arg0: i32) -> (i32, i32) {
    %c0_i32 = arith.constant 0 : i32
    %c0_i32_0 = arith.constant 0 : i32
    %c0_i32_1 = arith.constant 0 : i32
    return %c0_i32, %c0_i32_0 : i32, i32
  }
  func.func @transform_8(%arg0: i32) -> (i32, i32) {
    %c0_i32 = arith.constant 0 : i32
    %c0_i32_0 = arith.constant 0 : i32
    %c0_i32_1 = arith.constant 0 : i32
    return %c0_i32, %c0_i32_0 : i32, i32
  }
  func.func @transform_9(%arg0: i32) -> (i32, i32) {
    %c0_i32 = arith.constant 0 : i32
    %c0_i32_0 = arith.constant 0 : i32
    %c0_i32_1 = arith.constant 0 : i32
    return %c0_i32, %c0_i32_0 : i32, i32
  }
  func.func @transform_10(%arg0: i32) -> (i32, i32) {
    %c0_i32 = arith.constant 0 : i32
    %c0_i32_0 = arith.constant 0 : i32
    %c0_i32_1 = arith.constant 0 : i32
    return %c0_i32, %c0_i32_0 : i32, i32
  }
  func.func @transform_11(%arg0: i32) -> (i32, i32) {
    %c0_i32 = arith.constant 0 : i32
    %c0_i32_0 = arith.constant 0 : i32
    %c0_i32_1 = arith.constant 0 : i32
    return %c0_i32, %c0_i32_0 : i32, i32
  }
  func.func @transform_12(%arg0: i32) -> (i32, i32) {
    %c0_i32 = arith.constant 0 : i32
    %c0_i32_0 = arith.constant 0 : i32
    %c0_i32_1 = arith.constant 0 : i32
    return %c0_i32, %c0_i32_0 : i32, i32
  }
  func.func @transform_13(%arg0: i32) -> (i32, i32, i32) {
    %c0_i32 = arith.constant 0 : i32
    %c0_i32_0 = arith.constant 0 : i32
    %c0_i32_1 = arith.constant 0 : i32
    return %arg0, %c0_i32, %c0_i32_0 : i32, i32, i32
  }
}

module attributes {stable_mosaic.version = 11 : i64} {
  func.func @_encoder_layer_kernel(%arg0: i32, %arg1: memref<1x8x32xf32, #tpu.memory_space<vmem>>, %arg2: memref<32x96xbf16, #tpu.memory_space<vmem>>, %arg3: memref<1x96xf32, #tpu.memory_space<vmem>>, %arg4: memref<32x32xbf16, #tpu.memory_space<vmem>>, %arg5: memref<1x32xf32, #tpu.memory_space<vmem>>, %arg6: memref<1x32xf32, #tpu.memory_space<vmem>>, %arg7: memref<1x32xf32, #tpu.memory_space<vmem>>, %arg8: memref<32x64xbf16, #tpu.memory_space<vmem>>, %arg9: memref<1x64xf32, #tpu.memory_space<vmem>>, %arg10: memref<64x32xbf16, #tpu.memory_space<vmem>>, %arg11: memref<1x32xf32, #tpu.memory_space<vmem>>, %arg12: memref<1x32xf32, #tpu.memory_space<vmem>>, %arg13: memref<1x32xf32, #tpu.memory_space<vmem>>, %arg14: memref<1x32xf32, #tpu.memory_space<vmem>>, %arg15: memref<1x32xf32, #tpu.memory_space<vmem>>, %arg16: memref<1x8x32xf32, #tpu.memory_space<vmem>>) attributes {dimension_semantics = [#tpu.dimension_semantics<parallel>], iteration_bounds = array<i64: 2>, scalar_prefetch = 0 : i64, scratch_operands = 0 : i64, tpu.core_type = #tpu.core_type<tc>, window_params = [{transform_indices = @transform_0, window_bounds = array<i64: 1, 8, 32>}, {pipeline_mode = #tpu.pipeline_mode<synchronous>, transform_indices = @transform_1, window_bounds = array<i64: 32, 96>}, {pipeline_mode = #tpu.pipeline_mode<synchronous>, transform_indices = @transform_2, window_bounds = array<i64: 1, 96>}, {pipeline_mode = #tpu.pipeline_mode<synchronous>, transform_indices = @transform_3, window_bounds = array<i64: 32, 32>}, {pipeline_mode = #tpu.pipeline_mode<synchronous>, transform_indices = @transform_4, window_bounds = array<i64: 1, 32>}, {pipeline_mode = #tpu.pipeline_mode<synchronous>, transform_indices = @transform_5, window_bounds = array<i64: 1, 32>}, {pipeline_mode = #tpu.pipeline_mode<synchronous>, transform_indices = @transform_6, window_bounds = array<i64: 1, 32>}, {pipeline_mode = #tpu.pipeline_mode<synchronous>, transform_indices = @transform_7, window_bounds = array<i64: 32, 64>}, {pipeline_mode = #tpu.pipeline_mode<synchronous>, transform_indices = @transform_8, window_bounds = array<i64: 1, 64>}, {pipeline_mode = #tpu.pipeline_mode<synchronous>, transform_indices = @transform_9, window_bounds = array<i64: 64, 32>}, {pipeline_mode = #tpu.pipeline_mode<synchronous>, transform_indices = @transform_10, window_bounds = array<i64: 1, 32>}, {pipeline_mode = #tpu.pipeline_mode<synchronous>, transform_indices = @transform_11, window_bounds = array<i64: 1, 32>}, {pipeline_mode = #tpu.pipeline_mode<synchronous>, transform_indices = @transform_12, window_bounds = array<i64: 1, 32>}, {pipeline_mode = #tpu.pipeline_mode<synchronous>, transform_indices = @transform_13, window_bounds = array<i64: 1, 32>}, {pipeline_mode = #tpu.pipeline_mode<synchronous>, transform_indices = @transform_14, window_bounds = array<i64: 1, 32>}, {transform_indices = @transform_15, window_bounds = array<i64: 1, 8, 32>}]} {
    %c0 = arith.constant 0 : index
    %c0_0 = arith.constant 0 : index
    %c0_1 = arith.constant 0 : index
    %0 = vector.load %arg1[%c0, %c0_0, %c0_1] : memref<1x8x32xf32, #tpu.memory_space<vmem>>, vector<1x8x32xf32>
    %1 = vector.shape_cast %0 : vector<1x8x32xf32> to vector<8x32xf32>
    %2 = arith.truncf %1 : vector<8x32xf32> to vector<8x32xbf16>
    %c0_2 = arith.constant 0 : index
    %c0_3 = arith.constant 0 : index
    %3 = vector.load %arg2[%c0_2, %c0_3] : memref<32x96xbf16, #tpu.memory_space<vmem>>, vector<32x96xbf16>
    %cst = arith.constant dense<0.000000e+00> : vector<8x96xf32>
    %4 = tpu.matmul %2, %3, %cst {dimension_numbers = #tpu.dot_dimension_numbers<[1], [0], [0], [1], [0, 0, 1, 1], [], []>} : vector<8x32xbf16>, vector<32x96xbf16>, vector<8x96xf32> -> vector<8x96xf32>
    %c0_4 = arith.constant 0 : index
    %c0_5 = arith.constant 0 : index
    %5 = vector.load %arg3[%c0_4, %c0_5] : memref<1x96xf32, #tpu.memory_space<vmem>>, vector<1x96xf32>
    %6 = vector.broadcast %5 : vector<1x96xf32> to vector<8x96xf32>
    %7 = arith.addf %4, %6 : vector<8x96xf32>
    %8 = vector.extract_strided_slice %7 {offsets = [0, 0], sizes = [8, 32], strides = [1, 1]} : vector<8x96xf32> to vector<8x32xf32>
    %cst_6 = arith.constant 0.353553385 : f32
    %9 = vector.broadcast %cst_6 : f32 to vector<8x32xf32>
    %10 = arith.mulf %8, %9 : vector<8x32xf32>
    %11 = arith.truncf %10 : vector<8x32xf32> to vector<8x32xbf16>
    %12 = vector.extract_strided_slice %7 {offsets = [0, 32], sizes = [8, 32], strides = [1, 1]} : vector<8x96xf32> to vector<8x32xf32>
    %13 = arith.truncf %12 : vector<8x32xf32> to vector<8x32xbf16>
    %14 = vector.extract_strided_slice %7 {offsets = [0, 64], sizes = [8, 32], strides = [1, 1]} : vector<8x96xf32> to vector<8x32xf32>
    %15 = arith.truncf %14 : vector<8x32xf32> to vector<8x32xbf16>
    %c0_7 = arith.constant 0 : index
    %c0_8 = arith.constant 0 : index
    %16 = vector.load %arg4[%c0_7, %c0_8] : memref<32x32xbf16, #tpu.memory_space<vmem>>, vector<32x32xbf16>
    %c0_9 = arith.constant 0 : index
    %c0_10 = arith.constant 0 : index
    %17 = vector.load %arg5[%c0_9, %c0_10] : memref<1x32xf32, #tpu.memory_space<vmem>>, vector<1x32xf32>
    %18 = vector.extract_strided_slice %11 {offsets = [0, 0], sizes = [8, 8], strides = [1, 1]} : vector<8x32xbf16> to vector<8x8xbf16>
    %19 = vector.extract_strided_slice %13 {offsets = [0, 0], sizes = [8, 8], strides = [1, 1]} : vector<8x32xbf16> to vector<8x8xbf16>
    %20 = vector.extract_strided_slice %15 {offsets = [0, 0], sizes = [8, 8], strides = [1, 1]} : vector<8x32xbf16> to vector<8x8xbf16>
    %cst_11 = arith.constant dense<0.000000e+00> : vector<8x8xf32>
    %21 = tpu.matmul %18, %19, %cst_11 {dimension_numbers = #tpu.dot_dimension_numbers<[1], [1], [0], [0], [0, 0, 1, 0], [], []>} : vector<8x8xbf16>, vector<8x8xbf16>, vector<8x8xf32> -> vector<8x8xf32>
    %cst_12 = arith.constant dense<0xFF800000> : vector<8xf32>
    %22 = vector.multi_reduction <maximumf>, %21, %cst_12 [1] : vector<8x8xf32> to vector<8xf32>
    %23 = vector.shape_cast %22 : vector<8xf32> to vector<8x1xf32>
    %24 = vector.broadcast %23 : vector<8x1xf32> to vector<8x8xf32>
    %25 = arith.subf %21, %24 : vector<8x8xf32>
    %26 = math.exp %25 : vector<8x8xf32>
    %cst_13 = arith.constant dense<0.000000e+00> : vector<8xf32>
    %27 = vector.multi_reduction <add>, %26, %cst_13 [1] : vector<8x8xf32> to vector<8xf32>
    %28 = vector.shape_cast %27 : vector<8xf32> to vector<8x1xf32>
    %29 = arith.truncf %26 : vector<8x8xf32> to vector<8x8xbf16>
    %cst_14 = arith.constant dense<0.000000e+00> : vector<8x8xf32>
    %30 = tpu.matmul %29, %20, %cst_14 {dimension_numbers = #tpu.dot_dimension_numbers<[1], [0], [0], [1], [0, 0, 1, 1], [], []>} : vector<8x8xbf16>, vector<8x8xbf16>, vector<8x8xf32> -> vector<8x8xf32>
    %31 = tpu.reciprocal %28 {approx = true} : vector<8x1xf32> -> vector<8x1xf32>
    %32 = vector.broadcast %31 : vector<8x1xf32> to vector<8x8xf32>
    %33 = arith.mulf %30, %32 : vector<8x8xf32>
    %34 = arith.truncf %33 : vector<8x8xf32> to vector<8x8xbf16>
    %35 = vector.extract_strided_slice %16 {offsets = [0, 0], sizes = [8, 32], strides = [1, 1]} : vector<32x32xbf16> to vector<8x32xbf16>
    %cst_15 = arith.constant dense<0.000000e+00> : vector<8x32xf32>
    %36 = tpu.matmul %34, %35, %cst_15 {dimension_numbers = #tpu.dot_dimension_numbers<[1], [0], [0], [1], [0, 0, 1, 1], [], []>} : vector<8x8xbf16>, vector<8x32xbf16>, vector<8x32xf32> -> vector<8x32xf32>
    %37 = vector.broadcast %17 : vector<1x32xf32> to vector<8x32xf32>
    %38 = arith.addf %37, %36 : vector<8x32xf32>
    %39 = vector.extract_strided_slice %11 {offsets = [0, 8], sizes = [8, 8], strides = [1, 1]} : vector<8x32xbf16> to vector<8x8xbf16>
    %40 = vector.extract_strided_slice %13 {offsets = [0, 8], sizes = [8, 8], strides = [1, 1]} : vector<8x32xbf16> to vector<8x8xbf16>
    %41 = vector.extract_strided_slice %15 {offsets = [0, 8], sizes = [8, 8], strides = [1, 1]} : vector<8x32xbf16> to vector<8x8xbf16>
    %cst_16 = arith.constant dense<0.000000e+00> : vector<8x8xf32>
    %42 = tpu.matmul %39, %40, %cst_16 {dimension_numbers = #tpu.dot_dimension_numbers<[1], [1], [0], [0], [0, 0, 1, 0], [], []>} : vector<8x8xbf16>, vector<8x8xbf16>, vector<8x8xf32> -> vector<8x8xf32>
    %cst_17 = arith.constant dense<0xFF800000> : vector<8xf32>
    %43 = vector.multi_reduction <maximumf>, %42, %cst_17 [1] : vector<8x8xf32> to vector<8xf32>
    %44 = vector.shape_cast %43 : vector<8xf32> to vector<8x1xf32>
    %45 = vector.broadcast %44 : vector<8x1xf32> to vector<8x8xf32>
    %46 = arith.subf %42, %45 : vector<8x8xf32>
    %47 = math.exp %46 : vector<8x8xf32>
    %cst_18 = arith.constant dense<0.000000e+00> : vector<8xf32>
    %48 = vector.multi_reduction <add>, %47, %cst_18 [1] : vector<8x8xf32> to vector<8xf32>
    %49 = vector.shape_cast %48 : vector<8xf32> to vector<8x1xf32>
    %50 = arith.truncf %47 : vector<8x8xf32> to vector<8x8xbf16>
    %cst_19 = arith.constant dense<0.000000e+00> : vector<8x8xf32>
    %51 = tpu.matmul %50, %41, %cst_19 {dimension_numbers = #tpu.dot_dimension_numbers<[1], [0], [0], [1], [0, 0, 1, 1], [], []>} : vector<8x8xbf16>, vector<8x8xbf16>, vector<8x8xf32> -> vector<8x8xf32>
    %52 = tpu.reciprocal %49 {approx = true} : vector<8x1xf32> -> vector<8x1xf32>
    %53 = vector.broadcast %52 : vector<8x1xf32> to vector<8x8xf32>
    %54 = arith.mulf %51, %53 : vector<8x8xf32>
    %55 = arith.truncf %54 : vector<8x8xf32> to vector<8x8xbf16>
    %56 = vector.extract_strided_slice %16 {offsets = [8, 0], sizes = [8, 32], strides = [1, 1]} : vector<32x32xbf16> to vector<8x32xbf16>
    %cst_20 = arith.constant dense<0.000000e+00> : vector<8x32xf32>
    %57 = tpu.matmul %55, %56, %cst_20 {dimension_numbers = #tpu.dot_dimension_numbers<[1], [0], [0], [1], [0, 0, 1, 1], [], []>} : vector<8x8xbf16>, vector<8x32xbf16>, vector<8x32xf32> -> vector<8x32xf32>
    %58 = arith.addf %38, %57 : vector<8x32xf32>
    %59 = vector.extract_strided_slice %11 {offsets = [0, 16], sizes = [8, 8], strides = [1, 1]} : vector<8x32xbf16> to vector<8x8xbf16>
    %60 = vector.extract_strided_slice %13 {offsets = [0, 16], sizes = [8, 8], strides = [1, 1]} : vector<8x32xbf16> to vector<8x8xbf16>
    %61 = vector.extract_strided_slice %15 {offsets = [0, 16], sizes = [8, 8], strides = [1, 1]} : vector<8x32xbf16> to vector<8x8xbf16>
    %cst_21 = arith.constant dense<0.000000e+00> : vector<8x8xf32>
    %62 = tpu.matmul %59, %60, %cst_21 {dimension_numbers = #tpu.dot_dimension_numbers<[1], [1], [0], [0], [0, 0, 1, 0], [], []>} : vector<8x8xbf16>, vector<8x8xbf16>, vector<8x8xf32> -> vector<8x8xf32>
    %cst_22 = arith.constant dense<0xFF800000> : vector<8xf32>
    %63 = vector.multi_reduction <maximumf>, %62, %cst_22 [1] : vector<8x8xf32> to vector<8xf32>
    %64 = vector.shape_cast %63 : vector<8xf32> to vector<8x1xf32>
    %65 = vector.broadcast %64 : vector<8x1xf32> to vector<8x8xf32>
    %66 = arith.subf %62, %65 : vector<8x8xf32>
    %67 = math.exp %66 : vector<8x8xf32>
    %cst_23 = arith.constant dense<0.000000e+00> : vector<8xf32>
    %68 = vector.multi_reduction <add>, %67, %cst_23 [1] : vector<8x8xf32> to vector<8xf32>
    %69 = vector.shape_cast %68 : vector<8xf32> to vector<8x1xf32>
    %70 = arith.truncf %67 : vector<8x8xf32> to vector<8x8xbf16>
    %cst_24 = arith.constant dense<0.000000e+00> : vector<8x8xf32>
    %71 = tpu.matmul %70, %61, %cst_24 {dimension_numbers = #tpu.dot_dimension_numbers<[1], [0], [0], [1], [0, 0, 1, 1], [], []>} : vector<8x8xbf16>, vector<8x8xbf16>, vector<8x8xf32> -> vector<8x8xf32>
    %72 = tpu.reciprocal %69 {approx = true} : vector<8x1xf32> -> vector<8x1xf32>
    %73 = vector.broadcast %72 : vector<8x1xf32> to vector<8x8xf32>
    %74 = arith.mulf %71, %73 : vector<8x8xf32>
    %75 = arith.truncf %74 : vector<8x8xf32> to vector<8x8xbf16>
    %76 = vector.extract_strided_slice %16 {offsets = [16, 0], sizes = [8, 32], strides = [1, 1]} : vector<32x32xbf16> to vector<8x32xbf16>
    %cst_25 = arith.constant dense<0.000000e+00> : vector<8x32xf32>
    %77 = tpu.matmul %75, %76, %cst_25 {dimension_numbers = #tpu.dot_dimension_numbers<[1], [0], [0], [1], [0, 0, 1, 1], [], []>} : vector<8x8xbf16>, vector<8x32xbf16>, vector<8x32xf32> -> vector<8x32xf32>
    %78 = arith.addf %58, %77 : vector<8x32xf32>
    %79 = vector.extract_strided_slice %11 {offsets = [0, 24], sizes = [8, 8], strides = [1, 1]} : vector<8x32xbf16> to vector<8x8xbf16>
    %80 = vector.extract_strided_slice %13 {offsets = [0, 24], sizes = [8, 8], strides = [1, 1]} : vector<8x32xbf16> to vector<8x8xbf16>
    %81 = vector.extract_strided_slice %15 {offsets = [0, 24], sizes = [8, 8], strides = [1, 1]} : vector<8x32xbf16> to vector<8x8xbf16>
    %cst_26 = arith.constant dense<0.000000e+00> : vector<8x8xf32>
    %82 = tpu.matmul %79, %80, %cst_26 {dimension_numbers = #tpu.dot_dimension_numbers<[1], [1], [0], [0], [0, 0, 1, 0], [], []>} : vector<8x8xbf16>, vector<8x8xbf16>, vector<8x8xf32> -> vector<8x8xf32>
    %cst_27 = arith.constant dense<0xFF800000> : vector<8xf32>
    %83 = vector.multi_reduction <maximumf>, %82, %cst_27 [1] : vector<8x8xf32> to vector<8xf32>
    %84 = vector.shape_cast %83 : vector<8xf32> to vector<8x1xf32>
    %85 = vector.broadcast %84 : vector<8x1xf32> to vector<8x8xf32>
    %86 = arith.subf %82, %85 : vector<8x8xf32>
    %87 = math.exp %86 : vector<8x8xf32>
    %cst_28 = arith.constant dense<0.000000e+00> : vector<8xf32>
    %88 = vector.multi_reduction <add>, %87, %cst_28 [1] : vector<8x8xf32> to vector<8xf32>
    %89 = vector.shape_cast %88 : vector<8xf32> to vector<8x1xf32>
    %90 = arith.truncf %87 : vector<8x8xf32> to vector<8x8xbf16>
    %cst_29 = arith.constant dense<0.000000e+00> : vector<8x8xf32>
    %91 = tpu.matmul %90, %81, %cst_29 {dimension_numbers = #tpu.dot_dimension_numbers<[1], [0], [0], [1], [0, 0, 1, 1], [], []>} : vector<8x8xbf16>, vector<8x8xbf16>, vector<8x8xf32> -> vector<8x8xf32>
    %92 = tpu.reciprocal %89 {approx = true} : vector<8x1xf32> -> vector<8x1xf32>
    %93 = vector.broadcast %92 : vector<8x1xf32> to vector<8x8xf32>
    %94 = arith.mulf %91, %93 : vector<8x8xf32>
    %95 = arith.truncf %94 : vector<8x8xf32> to vector<8x8xbf16>
    %96 = vector.extract_strided_slice %16 {offsets = [24, 0], sizes = [8, 32], strides = [1, 1]} : vector<32x32xbf16> to vector<8x32xbf16>
    %cst_30 = arith.constant dense<0.000000e+00> : vector<8x32xf32>
    %97 = tpu.matmul %95, %96, %cst_30 {dimension_numbers = #tpu.dot_dimension_numbers<[1], [0], [0], [1], [0, 0, 1, 1], [], []>} : vector<8x8xbf16>, vector<8x32xbf16>, vector<8x32xf32> -> vector<8x32xf32>
    %98 = arith.addf %78, %97 : vector<8x32xf32>
    %99 = arith.addf %1, %98 : vector<8x32xf32>
    %cst_31 = arith.constant dense<0.000000e+00> : vector<8xf32>
    %100 = vector.multi_reduction <add>, %99, %cst_31 [1] : vector<8x32xf32> to vector<8xf32>
    %101 = vector.shape_cast %100 : vector<8xf32> to vector<8x1xf32>
    %cst_32 = arith.constant 3.200000e+01 : f32
    %102 = vector.broadcast %cst_32 : f32 to vector<8x1xf32>
    %103 = arith.divf %101, %102 : vector<8x1xf32>
    %104 = vector.broadcast %103 : vector<8x1xf32> to vector<8x32xf32>
    %105 = arith.subf %99, %104 : vector<8x32xf32>
    %106 = arith.mulf %105, %105 : vector<8x32xf32>
    %cst_33 = arith.constant dense<0.000000e+00> : vector<8xf32>
    %107 = vector.multi_reduction <add>, %106, %cst_33 [1] : vector<8x32xf32> to vector<8xf32>
    %108 = vector.shape_cast %107 : vector<8xf32> to vector<8x1xf32>
    %cst_34 = arith.constant 3.200000e+01 : f32
    %109 = vector.broadcast %cst_34 : f32 to vector<8x1xf32>
    %110 = arith.divf %108, %109 : vector<8x1xf32>
    %111 = vector.broadcast %103 : vector<8x1xf32> to vector<8x32xf32>
    %112 = arith.subf %99, %111 : vector<8x32xf32>
    %cst_35 = arith.constant 9.99999974E-6 : f32
    %113 = vector.broadcast %cst_35 : f32 to vector<8x1xf32>
    %114 = arith.addf %110, %113 : vector<8x1xf32>
    %115 = math.rsqrt %114 : vector<8x1xf32>
    %116 = vector.broadcast %115 : vector<8x1xf32> to vector<8x32xf32>
    %117 = arith.mulf %112, %116 : vector<8x32xf32>
    %c0_36 = arith.constant 0 : index
    %c0_37 = arith.constant 0 : index
    %118 = vector.load %arg6[%c0_36, %c0_37] : memref<1x32xf32, #tpu.memory_space<vmem>>, vector<1x32xf32>
    %119 = vector.broadcast %118 : vector<1x32xf32> to vector<8x32xf32>
    %120 = arith.mulf %117, %119 : vector<8x32xf32>
    %c0_38 = arith.constant 0 : index
    %c0_39 = arith.constant 0 : index
    %121 = vector.load %arg7[%c0_38, %c0_39] : memref<1x32xf32, #tpu.memory_space<vmem>>, vector<1x32xf32>
    %122 = vector.broadcast %121 : vector<1x32xf32> to vector<8x32xf32>
    %123 = arith.addf %120, %122 : vector<8x32xf32>
    %124 = arith.truncf %123 : vector<8x32xf32> to vector<8x32xbf16>
    %c0_40 = arith.constant 0 : index
    %c0_41 = arith.constant 0 : index
    %125 = vector.load %arg8[%c0_40, %c0_41] : memref<32x64xbf16, #tpu.memory_space<vmem>>, vector<32x64xbf16>
    %cst_42 = arith.constant dense<0.000000e+00> : vector<8x64xf32>
    %126 = tpu.matmul %124, %125, %cst_42 {dimension_numbers = #tpu.dot_dimension_numbers<[1], [0], [0], [1], [0, 0, 1, 1], [], []>} : vector<8x32xbf16>, vector<32x64xbf16>, vector<8x64xf32> -> vector<8x64xf32>
    %c0_43 = arith.constant 0 : index
    %c0_44 = arith.constant 0 : index
    %127 = vector.load %arg9[%c0_43, %c0_44] : memref<1x64xf32, #tpu.memory_space<vmem>>, vector<1x64xf32>
    %128 = vector.broadcast %127 : vector<1x64xf32> to vector<8x64xf32>
    %129 = arith.addf %126, %128 : vector<8x64xf32>
    %cst_45 = arith.constant 0.000000e+00 : f32
    %130 = vector.broadcast %cst_45 : f32 to vector<8x64xf32>
    %131 = arith.maximumf %129, %130 : vector<8x64xf32>
    %132 = arith.truncf %131 : vector<8x64xf32> to vector<8x64xbf16>
    %c0_46 = arith.constant 0 : index
    %c0_47 = arith.constant 0 : index
    %133 = vector.load %arg10[%c0_46, %c0_47] : memref<64x32xbf16, #tpu.memory_space<vmem>>, vector<64x32xbf16>
    %cst_48 = arith.constant dense<0.000000e+00> : vector<8x32xf32>
    %134 = tpu.matmul %132, %133, %cst_48 {dimension_numbers = #tpu.dot_dimension_numbers<[1], [0], [0], [1], [0, 0, 1, 1], [], []>} : vector<8x64xbf16>, vector<64x32xbf16>, vector<8x32xf32> -> vector<8x32xf32>
    %c0_49 = arith.constant 0 : index
    %c0_50 = arith.constant 0 : index
    %135 = vector.load %arg11[%c0_49, %c0_50] : memref<1x32xf32, #tpu.memory_space<vmem>>, vector<1x32xf32>
    %136 = vector.broadcast %135 : vector<1x32xf32> to vector<8x32xf32>
    %137 = arith.addf %134, %136 : vector<8x32xf32>
    %138 = arith.addf %123, %137 : vector<8x32xf32>
    %cst_51 = arith.constant dense<0.000000e+00> : vector<8xf32>
    %139 = vector.multi_reduction <add>, %138, %cst_51 [1] : vector<8x32xf32> to vector<8xf32>
    %140 = vector.shape_cast %139 : vector<8xf32> to vector<8x1xf32>
    %cst_52 = arith.constant 3.200000e+01 : f32
    %141 = vector.broadcast %cst_52 : f32 to vector<8x1xf32>
    %142 = arith.divf %140, %141 : vector<8x1xf32>
    %143 = vector.broadcast %142 : vector<8x1xf32> to vector<8x32xf32>
    %144 = arith.subf %138, %143 : vector<8x32xf32>
    %145 = arith.mulf %144, %144 : vector<8x32xf32>
    %cst_53 = arith.constant dense<0.000000e+00> : vector<8xf32>
    %146 = vector.multi_reduction <add>, %145, %cst_53 [1] : vector<8x32xf32> to vector<8xf32>
    %147 = vector.shape_cast %146 : vector<8xf32> to vector<8x1xf32>
    %cst_54 = arith.constant 3.200000e+01 : f32
    %148 = vector.broadcast %cst_54 : f32 to vector<8x1xf32>
    %149 = arith.divf %147, %148 : vector<8x1xf32>
    %150 = vector.broadcast %142 : vector<8x1xf32> to vector<8x32xf32>
    %151 = arith.subf %138, %150 : vector<8x32xf32>
    %cst_55 = arith.constant 9.99999974E-6 : f32
    %152 = vector.broadcast %cst_55 : f32 to vector<8x1xf32>
    %153 = arith.addf %149, %152 : vector<8x1xf32>
    %154 = math.rsqrt %153 : vector<8x1xf32>
    %155 = vector.broadcast %154 : vector<8x1xf32> to vector<8x32xf32>
    %156 = arith.mulf %151, %155 : vector<8x32xf32>
    %c0_56 = arith.constant 0 : index
    %c0_57 = arith.constant 0 : index
    %157 = vector.load %arg12[%c0_56, %c0_57] : memref<1x32xf32, #tpu.memory_space<vmem>>, vector<1x32xf32>
    %158 = vector.broadcast %157 : vector<1x32xf32> to vector<8x32xf32>
    %159 = arith.mulf %156, %158 : vector<8x32xf32>
    %c0_58 = arith.constant 0 : index
    %c0_59 = arith.constant 0 : index
    %160 = vector.load %arg13[%c0_58, %c0_59] : memref<1x32xf32, #tpu.memory_space<vmem>>, vector<1x32xf32>
    %161 = vector.broadcast %160 : vector<1x32xf32> to vector<8x32xf32>
    %162 = arith.addf %159, %161 : vector<8x32xf32>
    %cst_60 = arith.constant dense<0.000000e+00> : vector<8xf32>
    %163 = vector.multi_reduction <add>, %162, %cst_60 [1] : vector<8x32xf32> to vector<8xf32>
    %164 = vector.shape_cast %163 : vector<8xf32> to vector<8x1xf32>
    %cst_61 = arith.constant 3.200000e+01 : f32
    %165 = vector.broadcast %cst_61 : f32 to vector<8x1xf32>
    %166 = arith.divf %164, %165 : vector<8x1xf32>
    %167 = vector.broadcast %166 : vector<8x1xf32> to vector<8x32xf32>
    %168 = arith.subf %162, %167 : vector<8x32xf32>
    %169 = arith.mulf %168, %168 : vector<8x32xf32>
    %cst_62 = arith.constant dense<0.000000e+00> : vector<8xf32>
    %170 = vector.multi_reduction <add>, %169, %cst_62 [1] : vector<8x32xf32> to vector<8xf32>
    %171 = vector.shape_cast %170 : vector<8xf32> to vector<8x1xf32>
    %cst_63 = arith.constant 3.200000e+01 : f32
    %172 = vector.broadcast %cst_63 : f32 to vector<8x1xf32>
    %173 = arith.divf %171, %172 : vector<8x1xf32>
    %174 = vector.broadcast %166 : vector<8x1xf32> to vector<8x32xf32>
    %175 = arith.subf %162, %174 : vector<8x32xf32>
    %cst_64 = arith.constant 9.99999974E-6 : f32
    %176 = vector.broadcast %cst_64 : f32 to vector<8x1xf32>
    %177 = arith.addf %173, %176 : vector<8x1xf32>
    %178 = math.rsqrt %177 : vector<8x1xf32>
    %179 = vector.broadcast %178 : vector<8x1xf32> to vector<8x32xf32>
    %180 = arith.mulf %175, %179 : vector<8x32xf32>
    %c0_65 = arith.constant 0 : index
    %c0_66 = arith.constant 0 : index
    %181 = vector.load %arg14[%c0_65, %c0_66] : memref<1x32xf32, #tpu.memory_space<vmem>>, vector<1x32xf32>
    %182 = vector.broadcast %181 : vector<1x32xf32> to vector<8x32xf32>
    %183 = arith.mulf %180, %182 : vector<8x32xf32>
    %c0_67 = arith.constant 0 : index
    %c0_68 = arith.constant 0 : index
    %184 = vector.load %arg15[%c0_67, %c0_68] : memref<1x32xf32, #tpu.memory_space<vmem>>, vector<1x32xf32>
    %185 = vector.broadcast %184 : vector<1x32xf32> to vector<8x32xf32>
    %186 = arith.addf %183, %185 : vector<8x32xf32>
    %c0_69 = arith.constant 0 : index
    %c0_70 = arith.constant 0 : index
    %c0_71 = arith.constant 0 : index
    %187 = vector.load %arg16[%c0_69, %c0_70, %c0_71] : memref<1x8x32xf32, #tpu.memory_space<vmem>>, vector<1x8x32xf32>
    %188 = vector.shape_cast %187 : vector<1x8x32xf32> to vector<8x32xf32>
    %189 = vector.shape_cast %186 : vector<8x32xf32> to vector<1x8x32xf32>
    tpu.vector_store %arg16[%c0_69, %c0_70, %c0_71], %189 {strides = array<i32>} : memref<1x8x32xf32, #tpu.memory_space<vmem>>, vector<1x8x32xf32>,
    return
  }
  func.func @transform_0(%arg0: i32) -> (i32, i32, i32) {
    %c0_i32 = arith.constant 0 : i32
    %c0_i32_0 = arith.constant 0 : i32
    %c0_i32_1 = arith.constant 0 : i32
    return %arg0, %c0_i32, %c0_i32_0 : i32, i32, i32
  }
  func.func @transform_1(%arg0: i32) -> (i32, i32) {
    %c0_i32 = arith.constant 0 : i32
    %c0_i32_0 = arith.constant 0 : i32
    %c0_i32_1 = arith.constant 0 : i32
    return %c0_i32, %c0_i32_0 : i32, i32
  }
  func.func @transform_2(%arg0: i32) -> (i32, i32) {
    %c0_i32 = arith.constant 0 : i32
    %c0_i32_0 = arith.constant 0 : i32
    %c0_i32_1 = arith.constant 0 : i32
    return %c0_i32, %c0_i32_0 : i32, i32
  }
  func.func @transform_3(%arg0: i32) -> (i32, i32) {
    %c0_i32 = arith.constant 0 : i32
    %c0_i32_0 = arith.constant 0 : i32
    %c0_i32_1 = arith.constant 0 : i32
    return %c0_i32, %c0_i32_0 : i32, i32
  }
  func.func @transform_4(%arg0: i32) -> (i32, i32) {
    %c0_i32 = arith.constant 0 : i32
    %c0_i32_0 = arith.constant 0 : i32
    %c0_i32_1 = arith.constant 0 : i32
    return %c0_i32, %c0_i32_0 : i32, i32
  }
  func.func @transform_5(%arg0: i32) -> (i32, i32) {
    %c0_i32 = arith.constant 0 : i32
    %c0_i32_0 = arith.constant 0 : i32
    %c0_i32_1 = arith.constant 0 : i32
    return %c0_i32, %c0_i32_0 : i32, i32
  }
  func.func @transform_6(%arg0: i32) -> (i32, i32) {
    %c0_i32 = arith.constant 0 : i32
    %c0_i32_0 = arith.constant 0 : i32
    %c0_i32_1 = arith.constant 0 : i32
    return %c0_i32, %c0_i32_0 : i32, i32
  }
  func.func @transform_7(%arg0: i32) -> (i32, i32) {
    %c0_i32 = arith.constant 0 : i32
    %c0_i32_0 = arith.constant 0 : i32
    %c0_i32_1 = arith.constant 0 : i32
    return %c0_i32, %c0_i32_0 : i32, i32
  }
  func.func @transform_8(%arg0: i32) -> (i32, i32) {
    %c0_i32 = arith.constant 0 : i32
    %c0_i32_0 = arith.constant 0 : i32
    %c0_i32_1 = arith.constant 0 : i32
    return %c0_i32, %c0_i32_0 : i32, i32
  }
  func.func @transform_9(%arg0: i32) -> (i32, i32) {
    %c0_i32 = arith.constant 0 : i32
    %c0_i32_0 = arith.constant 0 : i32
    %c0_i32_1 = arith.constant 0 : i32
    return %c0_i32, %c0_i32_0 : i32, i32
  }
  func.func @transform_10(%arg0: i32) -> (i32, i32) {
    %c0_i32 = arith.constant 0 : i32
    %c0_i32_0 = arith.constant 0 : i32
    %c0_i32_1 = arith.constant 0 : i32
    return %c0_i32, %c0_i32_0 : i32, i32
  }
  func.func @transform_11(%arg0: i32) -> (i32, i32) {
    %c0_i32 = arith.constant 0 : i32
    %c0_i32_0 = arith.constant 0 : i32
    %c0_i32_1 = arith.constant 0 : i32
    return %c0_i32, %c0_i32_0 : i32, i32
  }
  func.func @transform_12(%arg0: i32) -> (i32, i32) {
    %c0_i32 = arith.constant 0 : i32
    %c0_i32_0 = arith.constant 0 : i32
    %c0_i32_1 = arith.constant 0 : i32
    return %c0_i32, %c0_i32_0 : i32, i32
  }
  func.func @transform_13(%arg0: i32) -> (i32, i32) {
    %c0_i32 = arith.constant 0 : i32
    %c0_i32_0 = arith.constant 0 : i32
    %c0_i32_1 = arith.constant 0 : i32
    return %c0_i32, %c0_i32_0 : i32, i32
  }
  func.func @transform_14(%arg0: i32) -> (i32, i32) {
    %c0_i32 = arith.constant 0 : i32
    %c0_i32_0 = arith.constant 0 : i32
    %c0_i32_1 = arith.constant 0 : i32
    return %c0_i32, %c0_i32_0 : i32, i32
  }
  func.func @transform_15(%arg0: i32) -> (i32, i32, i32) {
    %c0_i32 = arith.constant 0 : i32
    %c0_i32_0 = arith.constant 0 : i32
    %c0_i32_1 = arith.constant 0 : i32
    return %arg0, %c0_i32, %c0_i32_0 : i32, i32, i32
  }
}

</mosaic_0001>

<bundles_post_ra>
// kernel: tpu_custom_call.1
= control target key start
LH: loop header
LB: loop body
LE: loop exit
PB: predicated region body
PF: predicated region fallthrough
CT: control target
= control target key end

     0   :  { %7 = vsyncpa [#allocation3], 0  ;;  %s649_s0 = inlined_call_operand.hbm [shape: f32[2,8,128], index: 0, kind: input, shape index: {}]   ;;  %s650_s1 = inlined_call_operand.hbm [shape: f32[8,128], index: 1, kind: input, shape index: {}]   ;;  %s651_s2 = inlined_call_operand.hbm [shape: f32[2,8,128], index: 2, kind: output, shape index: {}]  }
   0x1   :  { %9 = vsyncpa [#allocation3 + $0x1], 0 }
   0x2   :  { %10 = vsyncpa [#allocation6], 0 }
   0x3   :  { %11 = vsyncpa [#allocation4], 0 }
   0x4   :  { %13 = vsyncpa [#allocation4 + $0x1], 0  ;;  %s483_s9 = smov 0   ;;  %s485_s10 = smov 0  }
   0x5   :  { %s487_s11 = smov 0   ;;  %s489_s12 = smov 0  }
   0x6 LB: > { %s504_s13 = sadd.s32 4294967295, %s463_s12   ;;  %s270_s14 = sadd.s32 4294967294, %s463_s12   ;;  %s463_s12 = sphi %s489_s12, %s674_s12   ;;  %s459_s11 = sphi %s487_s11, %s673_s11   ;;  %s455_s10 = sphi %s485_s10, %s672_s10   ;;  %s451_s9 = sphi %s483_s9, %s671_s9  }
   0x7   : > { %p39_p0 = scmp.ne.s32.totalorder %s455_s10, %s451_s9  ;;  %p652_p1 = scmp.eq.s32.totalorder %s504_s13, 0 }
   0x8   : > { %p90_p3 = scmp.eq.s32.totalorder %s270_s14, 1  ;;  %p271_p5 = scmp.ge.s32.totalorder %s463_s12, 1 }
   0x9   : > { %p513_p4 = por %p652_p1, %p39_p0  ;;  %p97_p7 = scmp.lt.s32.totalorder %s463_s12, 3 }
   0xa   : > { %p518_p6 = por %p90_p3, %p39_p0  ;;  %s465_s18 = smov [#allocation5]  }
   0xb   : > { %s656_s15 = scalar_select %p513_p4, 1, 0 }
   0xc   : > { %s657_s16 = scalar_select %p518_p6, 1, 0 }
   0xd   : > { %p523_p8 = pnand %p271_p5, %p97_p7  ;;  %s110_s19 = sshll.u32 %s465_s18, 4  ;;  %s111_s19 = int_to_ptr.vmem [resolvable:$true] %s110_s19 }
   0xe   : > { %s531_s20 = sadd.s32 1, %s463_s12   ;;  %s26_s24 = sadd.s32 1, %s459_s11 }
   0xf   : > { %s658_s17 = scalar_select %p523_p8, 1, 0 }
  0x10   : > { %p292_p10 = pneg %p523_p8  ;;  %s23_s22 = ssub.s32 %s463_s12, %s531_s20 }
  0x11   : > { %p541_p12 = scmp.eq.s32.totalorder %s23_s22, 0  ;;  %p33_p13 = scmp.ne.s32.totalorder %s459_s11, %s455_s10 }
  0x12   : > { %p535_p11 = pnand %p292_p10, %p652_p1  ;;  %s352_s25 = scalar_lea.vmem %s111_s19, 128 }
  0x13   : > { %p353_p3 = scmp.ne.s32.totalorder %s111_s19, %s352_s25  ;;  %p360_p9 = scmp.lt.s32.totalorder %s111_s19, %s111_s19 }
  0x14   : > { %p343_p0 = pneg %p535_p11  ;;  %p361_p2 = scmp.lt.s32.totalorder %s352_s25, %s352_s25 }
  0x16   : > { %p355_p5 = pnand %p353_p3, %p343_p0  ;;  %p362_p10 = por %p361_p2, %p360_p9 }
  0x18   : > { %p356_p7 = pneg %p355_p5 }
  0x1a   : > { %p363_p1 = pnand %p362_p10, %p356_p7 }
  0x1c   : > { %366 = shalt.err (!%p363_p1)
}
  0x1d   : > { %295 = dma.hbm_to_vmem [thread:$0]  (!%p535_p11), %s650_s1, 128, %s111_s19, [#allocation6]  }
  0x1e   : > { %s558_s28 = scalar_select %p541_p12, %s459_s11, %s26_s24  }
  0x1f   : > { %p34_p1 = scmp.eq.s32.totalorder %s463_s12, 0  ;;  %p661_p2 = scmp.eq.s32.totalorder %s504_s13, 1 }
  0x20   : > { %p305_p0 = scmp.lt.s32.totalorder %s463_s12, 2  ;;  %s121_s30 = sand.u32 1, %s459_s11  }
  0x21   : > { %p566_p9 = por %p661_p2, %p33_p13  ;;  %p35_p3 = por %p34_p1, %p33_p13 }
  0x22   : > { %s274_s3 = sshll.u32 %s121_s30, 3  ;;  %s275_s4 = sshll.u32 %s463_s12, 7 }
  0x23   : > { %s662_s29 = scalar_select %p566_p9, 1, 0 }
  0x24   : > { %s579_s7 = scalar_lea.hbm %s649_s0, %s275_s4  ;;  %s125_s8 = scalar_lea.vmem [#allocation2], %s274_s3 }
  0x25   : > { %s132_s14 = sshll.u32 %s125_s8, 4  ;;  %p581_p11 = pnand %p305_p0, %p35_p3  ;;  %s133_s14 = int_to_ptr.vmem [resolvable:$true] %s132_s14 }
  0x26   : > { %s122_s19 = scalar_lea.sflag [#allocation3], %s121_s30  ;;  %s367_s21 = scalar_lea.hbm %s579_s7, 128 }
  0x27   : > { %p368_p12 = scmp.ne.s32.totalorder %s579_s7, %s367_s21  ;;  %p369_p13 = pneg %p581_p11 }
  0x28   : > { %s372_s24 = scalar_lea.hbm %s649_s0, 256  ;;  %p373_p10 = scmp.lt.s32.totalorder %s579_s7, %s649_s0 }
  0x29   : > { %p370_p5 = pnand %p369_p13, %p368_p12  ;;  %p374_p1 = scmp.lt.s32.totalorder %s372_s24, %s367_s21 }
  0x2b   : > { %p371_p7 = pneg %p370_p5  ;;  %p375_p2 = por %p374_p1, %p373_p10 }
  0x2d   : > { %p376_p0 = pnand %p375_p2, %p371_p7 }
  0x2f   : > { %379 = shalt.err (!%p376_p0)
}
  0x30   : > { %s380_s27 = scalar_lea.vmem %s133_s14, 128  ;;  %s466_s30 = smov [#allocation2]  }
  0x31   : > { %p381_p3 = scmp.ne.s32.totalorder %s133_s14, %s380_s27  ;;  %s385_s3 = sshll.u32 %s466_s30, 4  ;;  %s386_s3 = int_to_ptr.vmem [resolvable:$false] %s385_s3 }
  0x32   : > { %s387_s4 = scalar_lea.vmem %s386_s3, 256  ;;  %p388_p12 = scmp.lt.s32.totalorder %s133_s14, %s386_s3 }
  0x33   : > { %p383_p6 = pnand %p381_p3, %p369_p13  ;;  %p389_p5 = scmp.lt.s32.totalorder %s387_s4, %s380_s27 }
  0x35   : > { %p384_p9 = pneg %p383_p6  ;;  %p390_p4 = por %p389_p5, %p388_p12 }
  0x37   : > { %p391_p8 = pnand %p390_p4, %p384_p9 }
  0x39   : > { %394 = shalt.err (!%p391_p8)
}
  0x3a   : > { %299 = dma.hbm_to_vmem [thread:$0]  (!%p581_p11), %s579_s7, 128, %s133_s14, %s122_s19  }
  0x3b   : > { %p664_p7 = scmp.ne.s32.totalorder %s658_s17, 0 }
  0x3c   : > { %s602_s5 = sand.u32 (!%p664_p7), 1, %s455_s10   ;;  %p665_p6 = scmp.ne.s32.totalorder (!%p664_p7), %s656_s15, 0 }
  0x3d   : > { %141 = sbr.rel (%p664_p7) target bundleno = 95 (0x5f), region = 28  ;;  %s277_s6 = sshll.u32 (!%p664_p7), %s602_s5, 3 }
  0x3e   : > { %s144_s8 = scalar_lea.sflag (!%p664_p7), [#allocation3], %s602_s5  ;;  %s147_s21 = scalar_lea.vmem (!%p664_p7), [#allocation2], %s277_s6 }
  0x42   : > { %438 = dma.done.wait (%p665_p6), %s144_s8, 128  }
  0x43   : > { %440 = vsyncadd (%p665_p6), %s144_s8, 4294967168  ;;  %p666_p4 = scmp.eq.s32.totalorder %s504_s13, 0 }
  0x45   : > { %442 = dma.done.wait (%p666_p4), [#allocation6], 128   ;;  %p667_p8 = pmov %p666_p4 }
  0x46   : > { %s171_s17 = scalar_lea.vmem [#allocation7], %s277_s6  ;;  %s281_s14 = sshll.u32 %s504_s13, 7  ;;  %v172_v0 = vld [vmem:[%s147_s21] sm:$0xff]  ;;  %v173_v1 = vld [vmem:[#allocation5] sm:$0xff] }
  0x47   : > { %444 = vsyncadd (%p667_p8), [#allocation6], 4294967168  ;;  %s190_s7 = sshll.u32 %s171_s17, 4  ;;  %v174_v2 = vadd.f32 %v173_v1, %v172_v0  ;;  %s188_s15 = scalar_lea.hbm %s651_s2, %s281_s14  ;;  %s191_s7 = int_to_ptr.vmem [resolvable:$true] %s190_s7 }
  0x48   : > { %s177_s22 = scalar_lea.sflag [#allocation4], %s602_s5  ;;  %s395_s23 = scalar_lea.vmem %s191_s7, 128 }
  0x49   : > { %175 = vst [vmem:[%s171_s17] sm:$0xff] %v174_v2  ;;  %p396_p9 = scmp.ne.s32.totalorder %s191_s7, %s395_s23  ;;  %p668_p11 = scmp.ne.s32.totalorder %s662_s29, 0 }
  0x4a   : > { %s467_s24 = smov [#allocation7]  }
  0x4b   : > { %p397_p13 = pnand %p396_p9, %p668_p11  ;;  %s399_s25 = sshll.u32 %s467_s24, 4  ;;  %s400_s25 = int_to_ptr.vmem [resolvable:$false] %s399_s25 }
  0x4c   : > { %s401_s26 = scalar_lea.vmem %s400_s25, 256  ;;  %p402_p1 = scmp.lt.s32.totalorder %s191_s7, %s400_s25 }
  0x4d   : > { %p398_p10 = pneg %p397_p13  ;;  %p403_p2 = scmp.lt.s32.totalorder %s401_s26, %s395_s23 }
  0x4f   : > { %p404_p0 = por %p403_p2, %p402_p1 }
  0x51   : > { %p405_p3 = pnand %p404_p0, %p398_p10 }
  0x53   : > { %408 = shalt.err (!%p405_p3)
}
  0x54   : > { %s409_s13 = scalar_lea.hbm %s188_s15, 128  ;;  %s413_s3 = scalar_lea.hbm %s651_s2, 256 }
  0x55   : > { %p410_p12 = scmp.ne.s32.totalorder %s188_s15, %s409_s13  ;;  %p414_p6 = scmp.lt.s32.totalorder %s188_s15, %s651_s2 }
  0x56   : > { %p415_p4 = scmp.lt.s32.totalorder %s413_s3, %s409_s13 }
  0x57   : > { %p411_p5 = pnand %p410_p12, %p668_p11 }
  0x58   : > { %p416_p8 = por %p415_p4, %p414_p6 }
  0x59   : > { %p412_p7 = pneg %p411_p5 }
  0x5b   : > { %p417_p9 = pnand %p416_p8, %p412_p7 }
  0x5d   : > { %420 = shalt.err (!%p417_p9)
}
  0x5e   : > { %290 = dma.vmem_to_hbm [thread:$0]  (%p668_p11), %s191_s7, 128, %s188_s15, %s177_s22  }
  0x5f PF: > { %s202_s6 = sand.u32 1, %s451_s9   ;;  %p669_p13 = scmp.ne.s32.totalorder %s657_s16, 0 }
  0x60   : > { %p670_p10 = scmp.ge.s32.totalorder %s463_s12, 2  ;;  %s203_s8 = scalar_lea.sflag [#allocation4], %s202_s6 }
  0x62   : > { %p301_p1 = pnand %p670_p10, %p669_p13 }
  0x64   : > { %p302_p2 = pneg %p301_p1 }
  0x66   : > { %446 = dma.done.wait (%p302_p2), %s203_s8, 128  }
  0x67   : > { %448 = vsyncadd (%p302_p2), %s203_s8, 4294967168  ;;  %p16_p0 = scmp.ge.s32.totalorder %s531_s20, 4   ;;  %s671_s9 = smov %s455_s10 }
  0x68   : > { %s672_s10 = smov %s459_s11  ;;  %s673_s11 = smov %s558_s28 }
  0x69   : > { %s674_s12 = smov %s531_s20  ;;  %18 = sbr.rel (!%p16_p0) target bundleno = 6 (0x6), region = 77 }
  0x6e   :  { %208 = vsyncpa [#allocation3], 1 }
  0x6f   :  { %210 = vsyncpa [#allocation3 + $0x1], 1 }
  0x70   :  { %211 = vsyncpa [#allocation6], 1 }
  0x71   :  { %212 = vsyncpa [#allocation4], 1 }
  0x72   :  { %214 = vsyncpa [#allocation4 + $0x1], 1 }

// kernel: _lambda_.4
= control target key start
LH: loop header
LB: loop body
LE: loop exit
PB: predicated region body
PF: predicated region fallthrough
CT: control target
= control target key end

     0   :  { %s559_s15 = smov 0   ;;  %s626_s0 = inlined_call_operand.vmem [shape: f32[2,16,32], index: 0, kind: input, shape index: {}]   ;;  %s627_s1 = inlined_call_operand.vmem [shape: bf16[96,32], index: 1, kind: input, shape index: {}]   ;;  %s628_s2 = inlined_call_operand.vmem [shape: f32[1,32], index: 2, kind: input, shape index: {}]   ;;  %s629_s3 = inlined_call_operand.vmem [shape: f32[4,32], index: 3, kind: input, shape index: {}]   ;;  %s630_s4 = inlined_call_operand.vmem [shape: f32[2,8,32], index: 4, kind: output, shape index: {}]  }
   0x1 LB: > { %s444_s16 = sadd.s32 4294967295, %s528_s15   ;;  %p448_p0 = scmp.ge.s32.totalorder %s528_s15, 1  ;;  %s528_s15 = sphi %s559_s15, %s14_s15  }
   0x2   : > { %p162_p1 = scmp.lt.s32.totalorder %s528_s15, 3 }
   0x4   : > { %p163_p2 = pnand %p448_p0, %p162_p1 }
   0x5   : > { %p187_p3 = scmp.lt.s32.totalorder (!%p163_p2), %s444_s16, 1  ;;  %s532_s27 = smov (!%p163_p2), 32  }
   0x6   : > { %166 = sbr.rel (%p163_p2) target bundleno = 385 (0x181), region = 36  ;;  %s533_s30 = smov (!%p163_p2), 64  }
   0xb   : > { %v201_v0 = vlaneseq  ;;  %v510_v1 = vld [vmem:[%s627_s1 + $0x28] sm:$0xff]   ;;  %v530_v2 = vmov 0.0   ;;  %v511_v3 = vld [vmem:[%s627_s1 + $0x20] sm:$0xff]   ;;  %s632_s16 = smov (!%p187_p3, %s444_s16), 1  ;;  %v512_v7 = vld [vmem:[%s627_s1 + $0x18] sm:$0xff]   ;;  %vm531_vm2 = vmmov 0  }
   0xc   : > { %472 = vmatprep.subr.bf16.mxu0 %v530_v2  ;;  %s464_s21 = sshll.u32 %s632_s16, 4  ;;  %484 = vmatprep.mubr.msk.bf16.mxu0 %vm531_vm2, %v530_v2  ;;  %v513_v17 = vld [vmem:[%s627_s1 + $0x10] sm:$0xff]   ;;  %v514_v19 = vld [vmem:[%s627_s1 + $0x8] sm:$0xff]   ;;  %v515_v20 = vld [vmem:[%s627_s1] sm:$0xff]   ;;  %vm227_vm3 = vcmask 261120   ;;  %vm230_vm4 = vcmask 523264  }
   0xd   : > { %v575_v4 = vshrl.u32 %v201_v0, 7  ;;  %473 = vmatpush3.bf16.msra.mxu0 %v510_v1  ;;  %s191_s24 = scalar_lea.vmem %s626_s0, %s464_s21  ;;  %vm289_vm5 = vcmask 785408   ;;  %v334_v32 = vld [vmem:[%s629_s3] sm:$0xf]  ;;  %s451_s13 = sshll.u32 %s632_s16, 3 }
   0xe   : > { %474 = vmatprep.subr.bf16.mxu0 %v530_v2  ;;  %v197_v5 = vld [vmem:[%s191_s24] sm:$0xff]  ;;  %v198_v6 = vld [vmem:[%s191_s24 + $0x8] sm:$0xff]  ;;  %v335_v33 = vadd.f32 1e-05, %v334_v32  ;;  %s195_s18 = scalar_lea.vmem %s630_s4, %s451_s13 }
   0xf   : > { %vm208_vm0 = vcmp.lt.s32.totalorder %v575_v4, 7  ;;  %vm203_vm1 = vcmp.lt.s32.totalorder %v575_v4, 1  ;;  %v200_v8 = vrot.slane %v198_v6, 7  ;;  %v207_v9 = vrot.slane %v198_v6, 1  ;;  %v452_v43 = vld [vmem:[%s628_s2] ss:$0 sm:$0xff] }
  0x10   : > { %v500_v10 = vpack.i.bf16 %v198_v6, %v197_v5  ;;  %v199_v11 = vrot.slane %v197_v5, 7  ;;  %v206_v12 = vrot.slane %v197_v5, 1  ;;  %516 = vrsqrt.f32 %v335_v33 }
  0x11   : > { %475 = vmatpush3.bf16.msra.mxu0 %v511_v3  ;;  %v351_v40 = vsub.s32 0, %v575_v4  ;;  %v357_v42 = vsub.s32 1, %v575_v4  ;;  %vm383_vm8 = vcmp.eq.s32.totalorder %v575_v4, 0 }
  0x12   : > { %476 = vmatprep.subr.bf16.mxu0 %v530_v2  ;;  %501 = vrot.lane.b32.xlu0 %v500_v10, %s532_s27  ;;  %v204_v13 = vsel %vm203_vm1, %v199_v11, %v200_v8  ;;  %v205_v14 = vsel %vm203_vm1, %v200_v8, %v199_v11  ;;  %v209_v15 = vsel %vm208_vm0, %v206_v12, %v207_v9 }
  0x13   : > { %v210_v16 = vsel %vm208_vm0, %v207_v9, %v206_v12 }
  0x14   : > { %v505_v18 = vpack.i.bf16 %v210_v16, %v209_v15 }
  0x15   : > { %477 = vmatpush3.bf16.msra.mxu0 %v512_v7 }
  0x16   : > { %478 = vmatprep.subr.bf16.mxu0 %v530_v2  ;;  %506 = vrot.lane.b32.xlu0 %v505_v18, %s533_s30 }
  0x19   : > { %479 = vmatpush3.bf16.msra.mxu0 %v513_v17 }
  0x1a   : > { %480 = vmatprep.subr.bf16.mxu0 %v530_v2 }
  0x1d   : > { %481 = vmatpush3.bf16.msra.mxu0 %v514_v19  ;;  %v517_v34 = vpop.eup %516 }
  0x1e   : > { %482 = vmatprep.subr.bf16.mxu0 %v530_v2  ;;  %v338_v35 = vrot.slane %v517_v34, 3 }
  0x20   : > { %v340_v36 = vmul.f32 %v338_v35, %v334_v32 }
  0x21   : > { %483 = vmatpush3.bf16.msra.mxu0 %v515_v20 }
  0x22   : > { %v342_v37 = vrot.slane %v340_v36, 6  ;;  %v352_v44 = vrot.slane %v340_v36, %v351_v40 }
  0x24   : > { %v344_v38 = vmul.f32 %v342_v37, %v334_v32 }
  0x26   : > { %v346_v39 = vrot.slane %v344_v38, 1 }
  0x28   : > { %v348_v41 = vsub.f32 %v334_v32, %v346_v39 }
  0x2a   : > { %v358_v47 = vrot.slane %v348_v41, %v357_v42 }
  0x84   : > { %v502_v21 = vpop.permute.xlu0 %501 }
  0x85   : > { %v504_v22 = vunpack.i.h.bf16 %v502_v21  ;;  %v503_v23 = vunpack.i.l.bf16 %v502_v21 }
  0x87   : > { %v228_v27 = vsel %vm227_vm3, %v205_v14, %v503_v23  ;;  %v229_v28 = vsel %vm227_vm3, %v204_v13, %v504_v22 }
  0x88   : > { %v507_v24 = vpop.permute.xlu0 %506 }
  0x89   : > { %v509_v25 = vunpack.i.h.bf16 %v507_v24  ;;  %v508_v26 = vunpack.i.l.bf16 %v507_v24 }
  0x8b   : > { %v231_v29 = vsel %vm230_vm4, %v228_v27, %v508_v26  ;;  %v232_v30 = vsel %vm230_vm4, %v229_v28, %v509_v25 }
  0x8c   : > { %v233_v31 = vpack.c.bf16 %v232_v30, %v231_v29 }
  0x8e   : > { %485 = vmatmul.mubr.msk.bf16.vlgmr.msra.gmra.mxu0 %vm289_vm5, %v233_v31 }
 0x14e   : > { %v327_v45 = vpop.f32.mrf.mxu0 }
 0x14f   : > { %v328_v46 = vadd.f32 %v452_v43, %v327_v45 }
 0x150   : > { %v486_v48 = vpop.f32.mrf.mxu0 }
 0x151   : > { %v353_v49 = vmul.f32 %v352_v44, %v328_v46 }
 0x152   : > { %v330_v50 = vpop.f32.mrf.mxu0 }
 0x153   : > { %v359_v51 = vadd.f32 %v358_v47, %v353_v49  ;;  %v331_v52 = vadd.f32 %v452_v43, %v330_v50 }
 0x154   : > { %v487_v53 = vpop.f32.mrf.mxu0 }
 0x155   : > { %v363_v54 = vmin.f32 %v359_v51, 0.0  ;;  %v354_v55 = vmul.f32 %v352_v44, %v331_v52  ;;  %vm361_vm6 = vcmp.gt.f32.partialorder %v359_v51, 0.0 }
 0x157   : > { %v365_v56 = vmul.f32 1.442695, %v363_v54  ;;  %v360_v57 = vadd.f32 %v358_v47, %v354_v55 }
 0x159   : > { %518 = vpow2.f32 %v365_v56  ;;  %v364_v58 = vmin.f32 %v360_v57, 0.0  ;;  %vm362_vm7 = vcmp.gt.f32.partialorder %v360_v57, 0.0 }
 0x15b   : > { %v367_v59 = vmul.f32 1.442695, %v364_v58 }
 0x15d   : > { %520 = vpow2.f32 %v367_v59 }
 0x166   : > { %v519_v60 = vpop.eup %518 }
 0x167   : > { %v460_v61 = vadd.f32 -1.0, %v519_v60 }
 0x169   : > { %v371_v62 = vsel %vm361_vm6, %v359_v51, %v460_v61 }
 0x16a   : > { %v521_v63 = vpop.eup %520  ;;  %373 = vst.msk [vmem:[#allocation2] sm:$0xff] %vm227_vm3, %v371_v62  ;;  %v375_v2 = vrot.slane %v371_v62, 1 }
 0x16b   : > { %v461_v0 = vadd.f32 -1.0, %v521_v63 }
 0x16d   : > { %v372_v1 = vsel %vm362_vm7, %v360_v57, %v461_v0 }
 0x16e   : > { %374 = vst.msk [vmem:[#allocation2 + $0x8] sm:$0xff] %vm227_vm3, %v372_v1  ;;  %v376_v3 = vrot.slane %v372_v1, 1 }
 0x170   : > { %v377_v5 = vsel %vm208_vm0, %v375_v2, %v376_v3  ;;  %v378_v6 = vsel %vm208_vm0, %v376_v3, %v375_v2 }
 0x171   : > { %379 = vst.msk [vmem:[#allocation3] sm:$0xff] %vm227_vm3, %v377_v5  ;;  %380 = vst.msk [vmem:[#allocation3 + $0x8] sm:$0xff] %vm227_vm3, %v378_v6 }
 0x175   : > { %v381_v9 = vld [vmem:[#allocation2] ss:$2 sm:$0xff] }
 0x178   : > { %v382_v7 = vld [vmem:[#allocation3] ss:$2 sm:$0xff] }
 0x179   : > { %v384_v8 = vrot.slane %v382_v7, 7 }
 0x17b   : > { %v387_v10 = vsel %vm383_vm8, -inf, %v384_v8 }
 0x17c   : > { %v388_v11 = vmax.f32 %v387_v10, %v381_v9 }
 0x17e   : > { %v389_v12 = vmax.f32 %v388_v11, %v382_v7 }
 0x180   : > { %390 = vst.msk [vmem:[%s195_s18] sm:$0xff] %vm227_vm3, %v389_v12 }
 0x181 PF: > { %s14_s15 = sadd.s32 1, %s528_s15  }
 0x182   : > { %p11_p4 = scmp.ge.s32.totalorder %s14_s15, 4  }
 0x184   :  { %13 = sbr.rel (!%p11_p4) target bundleno = 1 (0x1), region = 66 }

// kernel: _lambda_.3
= control target key start
LH: loop header
LB: loop body
LE: loop exit
PB: predicated region body
PF: predicated region fallthrough
CT: control target
= control target key end

     0   :  { %18 = vsyncpa [#allocation3], 0  ;;  %s2245_s0 = inlined_call_operand.vmem [shape: f32[2,16,32], index: 0, kind: input, shape index: {}]   ;;  %s2246_s1 = inlined_call_operand.vmem [shape: bf16[32,96], index: 1, kind: input, shape index: {}]   ;;  %s2247_s2 = inlined_call_operand.vmem [shape: f32[1,96], index: 2, kind: input, shape index: {}]   ;;  %s2248_s3 = inlined_call_operand.vmem [shape: bf16[32,32], index: 3, kind: input, shape index: {}]   ;;  %s2249_s4 = inlined_call_operand.vmem [shape: f32[1,32], index: 4, kind: input, shape index: {}]   ;;  %s2250_s5 = inlined_call_operand.vmem [shape: f32[1,32], index: 5, kind: input, shape index: {}]   ;;  %s2251_s6 = inlined_call_operand.vmem [shape: f32[1,32], index: 6, kind: input, shape index: {}]   ;;  %s2252_s7 = inlined_call_operand.vmem [shape: bf16[32,64], index: 7, kind: input, shape index: {}]   ;;  %s2253_s8 = inlined_call_operand.vmem [shape: f32[1,64], index: 8, kind: input, shape index: {}]   ;;  %s2254_s9 = inlined_call_operand.vmem [shape: bf16[64,32], index: 9, kind: input, shape index: {}]   ;;  %s2255_s10 = inlined_call_operand.vmem [shape: f32[1,32], index: 10, kind: input, shape index: {}]   ;;  %s2256_s11 = inlined_call_operand.hbm [shape: f32[1,32], index: 11, kind: input, shape index: {}]   ;;  %s2257_s12 = inlined_call_operand.hbm [shape: f32[1,32], index: 12, kind: input, shape index: {}]   ;;  %s2258_s13 = inlined_call_operand.vmem [shape: f32[2,16,32], index: 13, kind: output, shape index: {}]  }
   0x1   :  { %19 = vsyncpa [#allocation5], 0  ;;  %s1994_s25 = smov 0  }
   0x2 LB: > { %s2000_s26 = sadd.s32 4294967295, %s1907_s25   ;;  %p1570_p0 = scmp.ge.s32.totalorder %s1907_s25, 1  ;;  %s1907_s25 = sphi %s1994_s25, %s25_s25  }
   0x3   : > { %p334_p1 = scmp.lt.s32.totalorder %s1907_s25, 3  ;;  %p2259_p2 = scmp.eq.s32.totalorder %s2000_s26, 0 }
   0x4   : > { %s1909_s28 = smov [#allocation2]   ;;  %s1910_s30 = smov [#allocation4]  }
   0x5   : > { %p2005_p3 = pnand %p1570_p0, %p334_p1  ;;  %s377_s29 = sshll.u32 %s1909_s28, 4  ;;  %s378_s29 = int_to_ptr.vmem [resolvable:$true] %s377_s29 }
   0x6   : > { %s388_s14 = sshll.u32 %s1910_s30, 4  ;;  %s1852_s16 = scalar_lea.vmem %s378_s29, 16  ;;  %s389_s14 = int_to_ptr.vmem [resolvable:$true] %s388_s14 }
   0x7   : > { %p1759_p4 = pneg %p2005_p3  ;;  %p1853_p7 = scmp.ne.s32.totalorder %s378_s29, %s1852_s16 }
   0x8   : > { %s1859_s17 = scalar_lea.vmem %s378_s29, 32  ;;  %p1860_p10 = scmp.lt.s32.totalorder %s378_s29, %s378_s29 }
   0x9   : > { %p2013_p5 = pnand %p2259_p2, %p1759_p4  ;;  %p1861_p11 = scmp.lt.s32.totalorder %s1859_s17, %s1852_s16 }
   0xb   : > { %p1843_p6 = pneg %p2013_p5  ;;  %p1862_p12 = por %p1861_p11, %p1860_p10 }
   0xd   : > { %p1855_p8 = pnand %p1853_p7, %p1843_p6 }
   0xf   : > { %p1856_p9 = pneg %p1855_p8 }
  0x11   : > { %p1863_p13 = pnand %p1862_p12, %p1856_p9 }
  0x13   : > { %1866 = shalt.err (!%p1863_p13)
}
  0x14   : > { %1762 = dma.hbm_to_vmem [thread:$0]  (!%p2013_p5), %s2256_s11, 16, %s378_s29, [#allocation3]  }
  0x15   : > { %s1878_s20 = scalar_lea.vmem %s389_s14, 16  ;;  %s1885_s21 = scalar_lea.vmem %s389_s14, 32 }
  0x16   : > { %p1879_p0 = scmp.ne.s32.totalorder %s389_s14, %s1878_s20  ;;  %p1886_p7 = scmp.lt.s32.totalorder %s389_s14, %s389_s14 }
  0x17   : > { %p1887_p8 = scmp.lt.s32.totalorder %s1885_s21, %s1878_s20 }
  0x18   : > { %p1881_p1 = pnand %p1879_p0, %p1843_p6 }
  0x19   : > { %p1888_p2 = por %p1887_p8, %p1886_p7 }
  0x1a   : > { %p1882_p4 = pneg %p1881_p1 }
  0x1c   : > { %p1889_p10 = pnand %p1888_p2, %p1882_p4 }
  0x1e   : > { %1892 = shalt.err (!%p1889_p10)
}
  0x1f   : > { %1765 = dma.hbm_to_vmem [thread:$0]  (!%p2013_p5), %s2257_s12, 16, %s389_s14, [#allocation5]  }
  0x20   : > { %409 = sbr.rel (%p2005_p3) target bundleno = 3249 (0xcb1), region = 72  ;;  %p2262_p9 = scmp.eq.s32.totalorder (!%p2005_p3), %s2000_s26, 0 }
  0x25   : > { %1898 = dma.done.wait (%p2262_p9), [#allocation3], 16   ;;  %p2263_p6 = pmov %p2262_p9 }
  0x27   : > { %1900 = vsyncadd (%p2263_p6), [#allocation3], 4294967280  ;;  %p2264_p11 = pmov %p2263_p6 }
  0x28   : > { %p2265_p2 = pmov %p2263_p6 }
  0x29   : > { %1902 = dma.done.wait (%p2264_p11), [#allocation5], 16  }
  0x2a   : > { %1904 = vsyncadd (%p2265_p2), [#allocation5], 4294967280  ;;  %p457_p12 = scmp.lt.s32.totalorder %s2000_s26, 1  ;;  %v1911_v0 = vmov 0.0   ;;  %vm1912_vm0 = vmmov 0   ;;  %v1793_v1 = vld [vmem:[%s2246_s1 + $0x8] sm:$0xff]  }
  0x2b   : > { %1651 = vmatprep.subr.bf16.mxu1 %v1911_v0  ;;  %1655 = vmatprep.mubr.msk.bf16.mxu1 %vm1912_vm0, %v1911_v0  ;;  %v1794_v2 = vld [vmem:[%s2246_s1] sm:$0xff]   ;;  %vm494_vm1 = vcmask 261120   ;;  %s1913_s19 = smov 64   ;;  %s1914_s20 = smov 96   ;;  %vm551_vm2 = vcmask 64512   ;;  %vm599_vm3 = vcmask 130048  }
  0x2c   : > { %s2267_s26 = smov (!%p457_p12, %s2000_s26), 1  ;;  %1665 = vmatprep.subr.bf16.mxu0 %v1911_v0  ;;  %1667 = vmatprep.mubr.msk.bf16.mxu0 %vm1912_vm0, %v1911_v0  ;;  %v1581_v6 = vld [vmem:[%s2247_s2] ss:$0 sm:$0xff]  ;;  %s1915_s21 = smov 88   ;;  %vm674_vm4 = vcmask 1043456   ;;  %vm1398_vm5 = vcmask 523264  }
  0x2d   : > { %s1614_s24 = sshll.u32 %s2267_s26, 4  ;;  %1652 = vmatpush3.bf16.msra.mxu1 %v1793_v1  ;;  %s1916_s22 = smov 120   ;;  %v543_v40 = vld [vmem:[%s2248_s3] sm:$0xf] }
  0x2e   : > { %s461_s29 = scalar_lea.vmem %s2245_s0, %s1614_s24  ;;  %1653 = vmatprep.subr.bf16.mxu1 %v1911_v0  ;;  %s1917_s23 = smov 80   ;;  %v676_v41 = vsel %vm674_vm4, %v543_v40, 0 }
  0x2f   : > { %v2067_v3 = vld [vmem:[%s461_s29] sm:$0xff]  ;;  %v2069_v4 = vld [vmem:[%s461_s29 + $0x8] sm:$0xff]  ;;  %s1918_s29 = smov 56   ;;  %s1919_s30 = smov 112  }
  0x30   : > { %v470_v5 = vpack.c.bf16 %v2069_v4, %v2067_v3  ;;  %s1920_s14 = smov 72   ;;  %s1921_s17 = smov 48  }
  0x31   : > { %1654 = vmatpush3.bf16.msra.mxu1 %v1794_v2  ;;  %s1922_s18 = smov 104  }
  0x32   : > { %1659 = vmatprep.subr.bf16.mxu1 %v1911_v0 }
  0x34   : > { %1656 = vmatmul.mubr.msk.bf16.vlgmr.msra.gmra.mxu1 %vm494_vm1, %v470_v5 }
  0x35   : > { %1661 = vmatprep.mubr.msk.bf16.mxu1 %vm1912_vm0, %v1911_v0 }
  0xf4   : > { %v532_v7 = vpop.f32.mrf.mxu1 }
  0xf5   : > { %v533_v9 = vadd.f32 %v1581_v6, %v532_v7 }
  0xf6   : > { %v1657_v8 = vpop.f32.mrf.mxu1 }
  0xf7   : > { %v539_v13 = vmul.f32 0.35355338, %v533_v9 }
  0xf8   : > { %v535_v10 = vpop.f32.mrf.mxu1 }
  0xf9   : > { %v536_v11 = vadd.f32 %v1581_v6, %v535_v10 }
  0xfa   : > { %v1658_v12 = vpop.f32.mrf.mxu1 }
  0xfb   : > { %v540_v14 = vmul.f32 0.35355338, %v536_v11  ;;  %v2081_v15 = vpack.c.bf16 %v536_v11, %v533_v9 }
  0xfd   : > { %v2083_v16 = vpack.c.bf16 %v540_v14, %v539_v13  ;;  %619 = vrot.lane.b32.xlu1 %v2081_v15, %s1913_s19  ;;  %549 = vrot.lane.b32.xlu0 %v2081_v15, %s1914_s20  ;;  %s466_s20 = scalar_lea.vmem %s2258_s13, %s1614_s24 }
 0x16f   : > { %v620_v17 = vpop.permute.xlu1 %619  ;;  %v550_v18 = vpop.permute.xlu0 %549 }
 0x170   : > { %v556_v19 = vsel %vm551_vm2, %v550_v18, 0  ;;  %1666 = vmatpush3.bf16.msra.mxu0 %v620_v17 }
 0x171   : > { %1660 = vmatpush3.bf16.xpose.msra.mxu1 %v556_v19  ;;  %1677 = vmatprep.subr.bf16.mxu0 %v1911_v0  ;;  %v544_v19 = vld [vmem:[%s2248_s3 + $0x4] sm:$0xf] }
 0x172   : > { %1671 = vmatprep.subr.bf16.mxu1 %v1911_v0 }
 0x178   : > { %1662 = vmatmul.mubr.msk.bf16.vlgmr.msra.gmra.mxu1 %vm551_vm2, %v2083_v16 }
 0x179   : > { %1673 = vmatprep.mubr.msk.bf16.mxu1 %vm1912_vm0, %v1911_v0  ;;  %1672 = vmatpush3.bf16.msra.mxu1 %v676_v41 }
 0x17a   : > { %1683 = vmatprep.subr.bf16.mxu1 %v1911_v0 }
 0x238   : > { %v592_v20 = vpop.f32.mrf.mxu1 }
 0x239   : > { %v600_v21 = vsel %vm599_vm3, %v592_v20, -inf }
 0x23a   : > { %601 = vmax.xlane.f32.xlu0 %v600_v21  ;;  %v1663_v22 = vpop.f32.mrf.mxu1 }
 0x23c   : > { %v595_v23 = vpop.f32.mrf.mxu1 }
 0x23d   : > { %v603_v24 = vsel %vm599_vm3, %v595_v23, -inf }
 0x23e   : > { %604 = vmax.xlane.f32.xlu1 %v603_v24  ;;  %v1664_v25 = vpop.f32.mrf.mxu1 }
 0x24f   : > { %730 = vrot.lane.b32.xlu1 %v2081_v15, %s1915_s21 }
 0x253   : > { %728 = vrot.lane.b32.xlu1 %v2083_v16, %s1916_s22 }
 0x2c3   : > { %v602_v26 = vpop.xlane.xlu0 %601 }
 0x2c4   : > { %v606_v27 = vsub.f32 %v592_v20, %v602_v26  ;;  %v854_v20 = vsel %vm674_vm4, %v544_v19, 0 }
 0x2c6   : > { %v608_v28 = vmul.f32 1.442695, %v606_v27 }
 0x2c7   : > { %v605_v29 = vpop.xlane.xlu1 %604 }
 0x2c8   : > { %1801 = vpow2.f32 %v608_v28  ;;  %v607_v30 = vsub.f32 %v595_v23, %v605_v29 }
 0x2ca   : > { %v610_v31 = vmul.f32 1.442695, %v607_v30 }
 0x2cb   : > { %v731_v35 = vpop.permute.xlu1 %730 }
 0x2cc   : > { %1803 = vpow2.f32 %v610_v31  ;;  %v736_v38 = vsel %vm551_vm2, %v731_v35, 0 }
 0x2cf   : > { %v729_v39 = vpop.permute.xlu1 %728 }
 0x2d5   : > { %v1802_v32 = vpop.eup %1801 }
 0x2d6   : > { %v612_v33 = vsel %vm599_vm3, %v1802_v32, 0.0 }
 0x2d7   : > { %613 = vadd.xlane.f32.xlu1 %v612_v33 }
 0x2d9   : > { %v1804_v34 = vpop.eup %1803 }
 0x2da   : > { %v615_v36 = vsel %vm599_vm3, %v1804_v34, 0.0  ;;  %v618_v37 = vpack.c.bf16 %v1804_v34, %v1802_v32 }
 0x2db   : > { %616 = vadd.xlane.f32.xlu0 %v615_v36 }
 0x2dc   : > { %1668 = vmatmul.mubr.msk.bf16.vlgmr.msra.gmra.mxu0 %vm599_vm3, %v618_v37 }
 0x2dd   : > { %1678 = vmatpush3.bf16.xpose.msra.mxu0 %v736_v38  ;;  %1679 = vmatprep.mubr.msk.bf16.mxu0 %vm1912_vm0, %v1911_v0 }
 0x2de   : > { %1689 = vmatprep.subr.bf16.mxu0 %v1911_v0 }
 0x2e4   : > { %1680 = vmatmul.mubr.msk.bf16.vlgmr.msra.gmra.mxu0 %vm551_vm2, %v729_v39 }
 0x2e5   : > { %1691 = vmatprep.mubr.msk.bf16.mxu0 %vm1912_vm0, %v1911_v0  ;;  %1690 = vmatpush3.bf16.msra.mxu0 %v854_v20 }
 0x2e6   : > { %1701 = vmatprep.subr.bf16.mxu0 %v1911_v0 }
 0x2e8   : > { %901 = vrot.lane.b32.xlu1 %v2081_v15, %s1917_s23  ;;  %s1923_s23 = smov 40  }
 0x360   : > { %v614_v42 = vpop.xlane.xlu1 %613 }
 0x361   : > { %1805 = vrcp.f32 %v614_v42 }
 0x364   : > { %v617_v43 = vpop.xlane.xlu0 %616  ;;  %v902_v8 = vpop.permute.xlu1 %901 }
 0x365   : > { %1807 = vrcp.f32 %v617_v43  ;;  %v907_v11 = vsel %vm551_vm2, %v902_v8, 0 }
 0x36e   : > { %v1806_v46 = vpop.eup %1805 }
 0x372   : > { %v1808_v47 = vpop.eup %1807 }
 0x39c   : > { %v659_v44 = vpop.f32.mrf.mxu0 }
 0x39d   : > { %v668_v49 = vmul.f32 %v1806_v46, %v659_v44 }
 0x39e   : > { %v1669_v45 = vpop.f32.mrf.mxu0 }
 0x3a0   : > { %v662_v48 = vpop.f32.mrf.mxu0 }
 0x3a1   : > { %v669_v50 = vmul.f32 %v1808_v47, %v662_v48 }
 0x3a2   : > { %v1670_v51 = vpop.f32.mrf.mxu0 }
 0x3a3   : > { %v670_v52 = vpack.c.bf16 %v669_v50, %v668_v49 }
 0x3a4   : > { %v772_v53 = vpop.f32.mrf.mxu0 }
 0x3a5   : > { %1674 = vmatmul.mubr.msk.bf16.vlgmr.msra.gmra.mxu1 %vm551_vm2, %v670_v52  ;;  %v779_v54 = vsel %vm599_vm3, %v772_v53, -inf  ;;  %v1588_v52 = vld [vmem:[%s2249_s4] ss:$0 sm:$0xff] }
 0x3a6   : > { %780 = vmax.xlane.f32.xlu0 %v779_v54  ;;  %v1681_v55 = vpop.f32.mrf.mxu0  ;;  %1685 = vmatprep.mubr.msk.bf16.mxu1 %vm1912_vm0, %v1911_v0 }
 0x3a8   : > { %v775_v56 = vpop.f32.mrf.mxu0 }
 0x3a9   : > { %v782_v57 = vsel %vm599_vm3, %v775_v56, -inf }
 0x3aa   : > { %783 = vmax.xlane.f32.xlu0 %v782_v57  ;;  %v1682_v58 = vpop.f32.mrf.mxu0 }
 0x3c0   : > { %798 = vrot.lane.b32.xlu0 %v2081_v15, %s1918_s29 }
 0x3c4   : > { %899 = vrot.lane.b32.xlu0 %v2083_v16, %s1919_s30 }
 0x42f   : > { %v781_v59 = vpop.xlane.xlu0 %780 }
 0x430   : > { %v785_v60 = vsub.f32 %v772_v53, %v781_v59 }
 0x432   : > { %v787_v61 = vmul.f32 1.442695, %v785_v60 }
 0x433   : > { %v784_v62 = vpop.xlane.xlu0 %783 }
 0x434   : > { %1809 = vpow2.f32 %v787_v61  ;;  %v786_v63 = vsub.f32 %v775_v56, %v784_v62  ;;  %v545_v61 = vld [vmem:[%s2248_s3 + $0x8] sm:$0xf] }
 0x435   : > { %v1025_v62 = vsel %vm674_vm4, %v545_v61, 0 }
 0x436   : > { %v789_v1 = vmul.f32 1.442695, %v786_v63 }
 0x437   : > { %v799_v2 = vpop.permute.xlu0 %798 }
 0x438   : > { %1811 = vpow2.f32 %v789_v1  ;;  %1684 = vmatpush3.bf16.msra.mxu1 %v799_v2 }
 0x439   : > { %1695 = vmatprep.subr.bf16.mxu1 %v1911_v0 }
 0x43b   : > { %v900_v12 = vpop.permute.xlu0 %899 }
 0x441   : > { %v1810_v5 = vpop.eup %1809 }
 0x442   : > { %v791_v6 = vsel %vm599_vm3, %v1810_v5, 0.0 }
 0x443   : > { %792 = vadd.xlane.f32.xlu0 %v791_v6 }
 0x445   : > { %v1812_v7 = vpop.eup %1811 }
 0x446   : > { %v794_v9 = vsel %vm599_vm3, %v1812_v7, 0.0  ;;  %v797_v10 = vpack.c.bf16 %v1812_v7, %v1810_v5 }
 0x447   : > { %795 = vadd.xlane.f32.xlu1 %v794_v9 }
 0x448   : > { %1686 = vmatmul.mubr.msk.bf16.vlgmr.msra.gmra.mxu1 %vm599_vm3, %v797_v10 }
 0x449   : > { %1696 = vmatpush3.bf16.xpose.msra.mxu1 %v907_v11  ;;  %1697 = vmatprep.mubr.msk.bf16.mxu1 %vm1912_vm0, %v1911_v0 }
 0x44a   : > { %1707 = vmatprep.subr.bf16.mxu1 %v1911_v0 }
 0x450   : > { %1698 = vmatmul.mubr.msk.bf16.vlgmr.msra.gmra.mxu1 %vm551_vm2, %v900_v12 }
 0x451   : > { %1709 = vmatprep.mubr.msk.bf16.mxu1 %vm1912_vm0, %v1911_v0  ;;  %1708 = vmatpush3.bf16.msra.mxu1 %v1025_v62 }
 0x452   : > { %1719 = vmatprep.subr.bf16.mxu1 %v1911_v0 }
 0x458   : > { %1072 = vrot.lane.b32.xlu1 %v2081_v15, %s1920_s14 }
 0x465   : > { %v2133_v13 = vpop.f32.mrf.mxu1 }
 0x466   : > { %v725_v53 = vadd.f32 %v1588_v52, %v2133_v13 }
 0x467   : > { %v1675_v14 = vpop.f32.mrf.mxu1 }
 0x469   : > { %v2135_v17 = vpop.f32.mrf.mxu1 }
 0x46a   : > { %v726_v57 = vadd.f32 %v1588_v52, %v2135_v17 }
 0x46b   : > { %v1676_v18 = vpop.f32.mrf.mxu1 }
 0x4cc   : > { %v793_v21 = vpop.xlane.xlu0 %792 }
 0x4cd   : > { %1813 = vrcp.f32 %v793_v21 }
 0x4d0   : > { %v796_v22 = vpop.xlane.xlu1 %795 }
 0x4d1   : > { %1815 = vrcp.f32 %v796_v22 }
 0x4d4   : > { %v1073_v48 = vpop.permute.xlu1 %1072 }
 0x4d5   : > { %v1078_v50 = vsel %vm551_vm2, %v1073_v48, 0 }
 0x4da   : > { %v1814_v25 = vpop.eup %1813 }
 0x4de   : > { %v1816_v26 = vpop.eup %1815 }
 0x508   : > { %v838_v23 = vpop.f32.mrf.mxu1 }
 0x509   : > { %v847_v28 = vmul.f32 %v1814_v25, %v838_v23 }
 0x50a   : > { %v1687_v24 = vpop.f32.mrf.mxu1 }
 0x50c   : > { %v841_v27 = vpop.f32.mrf.mxu1 }
 0x50d   : > { %v848_v29 = vmul.f32 %v1816_v26, %v841_v27 }
 0x50e   : > { %v1688_v30 = vpop.f32.mrf.mxu1 }
 0x50f   : > { %v849_v31 = vpack.c.bf16 %v848_v29, %v847_v28 }
 0x510   : > { %v943_v32 = vpop.f32.mrf.mxu1 }
 0x511   : > { %1692 = vmatmul.mubr.msk.bf16.vlgmr.msra.gmra.mxu0 %vm551_vm2, %v849_v31  ;;  %v950_v33 = vsel %vm599_vm3, %v943_v32, -inf }
 0x512   : > { %951 = vmax.xlane.f32.xlu0 %v950_v33  ;;  %v1699_v34 = vpop.f32.mrf.mxu1  ;;  %1703 = vmatprep.mubr.msk.bf16.mxu0 %vm1912_vm0, %v1911_v0 }
 0x514   : > { %v946_v35 = vpop.f32.mrf.mxu1 }
 0x515   : > { %v953_v36 = vsel %vm599_vm3, %v946_v35, -inf }
 0x516   : > { %954 = vmax.xlane.f32.xlu0 %v953_v36  ;;  %v1700_v37 = vpop.f32.mrf.mxu1 }
 0x52c   : > { %969 = vrot.lane.b32.xlu0 %v2081_v15, %s1921_s17 }
 0x530   : > { %1070 = vrot.lane.b32.xlu0 %v2083_v16, %s1922_s18 }
 0x59b   : > { %v952_v38 = vpop.xlane.xlu0 %951 }
 0x59c   : > { %v956_v39 = vsub.f32 %v943_v32, %v952_v38  ;;  %v546_v38 = vld [vmem:[%s2248_s3 + $0xc] sm:$0xf] }
 0x59e   : > { %v958_v40 = vmul.f32 1.442695, %v956_v39  ;;  %v1196_v39 = vsel %vm674_vm4, %v546_v38, 0 }
 0x59f   : > { %v955_v41 = vpop.xlane.xlu0 %954 }
 0x5a0   : > { %1817 = vpow2.f32 %v958_v40  ;;  %v957_v42 = vsub.f32 %v946_v35, %v955_v41 }
 0x5a2   : > { %v960_v43 = vmul.f32 1.442695, %v957_v42 }
 0x5a3   : > { %v970_v44 = vpop.permute.xlu0 %969 }
 0x5a4   : > { %1819 = vpow2.f32 %v960_v43  ;;  %1702 = vmatpush3.bf16.msra.mxu0 %v970_v44 }
 0x5a5   : > { %1713 = vmatprep.subr.bf16.mxu0 %v1911_v0 }
 0x5a7   : > { %v1071_v51 = vpop.permute.xlu0 %1070 }
 0x5ad   : > { %v1818_v45 = vpop.eup %1817 }
 0x5ae   : > { %v962_v46 = vsel %vm599_vm3, %v1818_v45, 0.0 }
 0x5af   : > { %963 = vadd.xlane.f32.xlu1 %v962_v46 }
 0x5b1   : > { %v1820_v47 = vpop.eup %1819 }
 0x5b2   : > { %v965_v16 = vsel %vm599_vm3, %v1820_v47, 0.0  ;;  %v968_v49 = vpack.c.bf16 %v1820_v47, %v1818_v45 }
 0x5b3   : > { %966 = vadd.xlane.f32.xlu0 %v965_v16 }
 0x5b4   : > { %1704 = vmatmul.mubr.msk.bf16.vlgmr.msra.gmra.mxu0 %vm599_vm3, %v968_v49 }
 0x5b5   : > { %1714 = vmatpush3.bf16.xpose.msra.mxu0 %v1078_v50  ;;  %1715 = vmatprep.mubr.msk.bf16.mxu0 %vm1912_vm0, %v1911_v0 }
 0x5b6   : > { %1725 = vmatprep.subr.bf16.mxu0 %v1911_v0 }
 0x5bc   : > { %1716 = vmatmul.mubr.msk.bf16.vlgmr.msra.gmra.mxu0 %vm551_vm2, %v1071_v51 }
 0x5bd   : > { %1727 = vmatprep.mubr.msk.bf16.mxu0 %vm1912_vm0, %v1911_v0  ;;  %1726 = vmatpush3.bf16.msra.mxu0 %v1196_v39 }
 0x5be   : > { %1739 = vmatprep.subr.bf16.mxu0 %v1911_v0 }
 0x5d1   : > { %v890_v54 = vpop.f32.mrf.mxu0 }
 0x5d2   : > { %v897_v55 = vadd.f32 %v890_v54, %v725_v53 }
 0x5d3   : > { %v1693_v56 = vpop.f32.mrf.mxu0 }
 0x5d5   : > { %v893_v58 = vpop.f32.mrf.mxu0 }
 0x5d6   : > { %v898_v59 = vadd.f32 %v893_v58, %v726_v57 }
 0x5d7   : > { %v1694_v60 = vpop.f32.mrf.mxu0 }
 0x638   : > { %v964_v63 = vpop.xlane.xlu1 %963 }
 0x639   : > { %1821 = vrcp.f32 %v964_v63 }
 0x63c   : > { %v967_v1 = vpop.xlane.xlu0 %966 }
 0x63d   : > { %1823 = vrcp.f32 %v967_v1 }
 0x646   : > { %v1822_v6 = vpop.eup %1821 }
 0x64a   : > { %v1824_v7 = vpop.eup %1823 }
 0x674   : > { %v1009_v2 = vpop.f32.mrf.mxu0 }
 0x675   : > { %v1018_v9 = vmul.f32 %v1822_v6, %v1009_v2 }
 0x676   : > { %v1705_v5 = vpop.f32.mrf.mxu0 }
 0x678   : > { %v1012_v8 = vpop.f32.mrf.mxu0 }
 0x679   : > { %v1019_v10 = vmul.f32 %v1824_v7, %v1012_v8  ;;  %v1796_v8 = vld [vmem:[%s2252_s7] sm:$0xff]  }
 0x67a   : > { %v1706_v11 = vpop.f32.mrf.mxu0 }
 0x67b   : > { %v1020_v12 = vpack.c.bf16 %v1019_v10, %v1018_v9  ;;  %v1797_v9 = vld [vmem:[%s2254_s9 + $0x18] sm:$0xff]  }
 0x67c   : > { %v1114_v13 = vpop.f32.mrf.mxu0 }
 0x67d   : > { %1710 = vmatmul.mubr.msk.bf16.vlgmr.msra.gmra.mxu1 %vm551_vm2, %v1020_v12  ;;  %v1121_v14 = vsel %vm599_vm3, %v1114_v13, -inf }
 0x67e   : > { %1122 = vmax.xlane.f32.xlu0 %v1121_v14  ;;  %v1717_v17 = vpop.f32.mrf.mxu0  ;;  %1721 = vmatprep.mubr.msk.bf16.mxu1 %vm1912_vm0, %v1911_v0 }
 0x680   : > { %v1117_v18 = vpop.f32.mrf.mxu0 }
 0x681   : > { %v1124_v19 = vsel %vm599_vm3, %v1117_v18, -inf }
 0x682   : > { %1125 = vmax.xlane.f32.xlu1 %v1124_v19  ;;  %v1718_v20 = vpop.f32.mrf.mxu0 }
 0x683   : > { %v1598_v20 = vld [vmem:[%s2250_s5] ss:$0 sm:$0xff] }
 0x694   : > { %1140 = vrot.lane.b32.xlu0 %v2081_v15, %s1923_s23 }
 0x707   : > { %v1123_v21 = vpop.xlane.xlu0 %1122 }
 0x708   : > { %v1127_v22 = vsub.f32 %v1114_v13, %v1123_v21 }
 0x70a   : > { %v1129_v23 = vmul.f32 1.442695, %v1127_v22 }
 0x70b   : > { %v1126_v24 = vpop.xlane.xlu1 %1125  ;;  %v1141_v25 = vpop.permute.xlu0 %1140 }
 0x70c   : > { %1825 = vpow2.f32 %v1129_v23  ;;  %v1128_v26 = vsub.f32 %v1117_v18, %v1126_v24  ;;  %1720 = vmatpush3.bf16.msra.mxu1 %v1141_v25  ;;  %v1599_v24 = vld [vmem:[%s2251_s6] ss:$0 sm:$0xff] }
 0x70d   : > { %1731 = vmatprep.subr.bf16.mxu1 %v1911_v0 }
 0x70e   : > { %v1131_v27 = vmul.f32 1.442695, %v1128_v26 }
 0x710   : > { %1827 = vpow2.f32 %v1131_v27 }
 0x719   : > { %v1826_v28 = vpop.eup %1825 }
 0x71a   : > { %v1133_v29 = vsel %vm599_vm3, %v1826_v28, 0.0 }
 0x71b   : > { %1134 = vadd.xlane.f32.xlu1 %v1133_v29  ;;  %v1798_v29 = vld [vmem:[%s2254_s9 + $0x10] sm:$0xff]  }
 0x71d   : > { %v1828_v30 = vpop.eup %1827 }
 0x71e   : > { %v1136_v31 = vsel %vm599_vm3, %v1828_v30, 0.0  ;;  %v1139_v15 = vpack.c.bf16 %v1828_v30, %v1826_v28  ;;  %v1799_v30 = vld [vmem:[%s2254_s9 + $0x8] sm:$0xff]  }
 0x71f   : > { %1137 = vadd.xlane.f32.xlu1 %v1136_v31  ;;  %v1800_v31 = vld [vmem:[%s2254_s9] sm:$0xff]  }
 0x720   : > { %1722 = vmatmul.mubr.msk.bf16.vlgmr.msra.gmra.mxu1 %vm599_vm3, %v1139_v15  ;;  %v1600_v15 = vld [vmem:[%s2253_s8] ss:$0 sm:$0xff] }
 0x721   : > { %1735 = vmatprep.mubr.msk.bf16.mxu1 %vm1912_vm0, %v1911_v0 }
 0x73d   : > { %v1061_v32 = vpop.f32.mrf.mxu1 }
 0x73e   : > { %v1068_v33 = vadd.f32 %v1061_v32, %v897_v55 }
 0x73f   : > { %v1711_v34 = vpop.f32.mrf.mxu1 }
 0x741   : > { %v1064_v35 = vpop.f32.mrf.mxu1 }
 0x742   : > { %v1069_v36 = vadd.f32 %v1064_v35, %v898_v59 }
 0x743   : > { %v1712_v37 = vpop.f32.mrf.mxu1 }
 0x7a4   : > { %v1135_v40 = vpop.xlane.xlu1 %1134 }
 0x7a5   : > { %1829 = vrcp.f32 %v1135_v40 }
 0x7a8   : > { %v1138_v41 = vpop.xlane.xlu1 %1137 }
 0x7a9   : > { %1831 = vrcp.f32 %v1138_v41 }
 0x7b2   : > { %v1830_v44 = vpop.eup %1829 }
 0x7b6   : > { %v1832_v45 = vpop.eup %1831 }
 0x7e0   : > { %v1180_v42 = vpop.f32.mrf.mxu1 }
 0x7e1   : > { %v1189_v47 = vmul.f32 %v1830_v44, %v1180_v42 }
 0x7e2   : > { %v1723_v43 = vpop.f32.mrf.mxu1 }
 0x7e4   : > { %v1183_v46 = vpop.f32.mrf.mxu1 }
 0x7e5   : > { %v1190_v48 = vmul.f32 %v1832_v45, %v1183_v46 }
 0x7e6   : > { %v1724_v16 = vpop.f32.mrf.mxu1 }
 0x7e7   : > { %v1191_v49 = vpack.c.bf16 %v1190_v48, %v1189_v47 }
 0x7e9   : > { %1728 = vmatmul.mubr.msk.bf16.vlgmr.msra.gmra.mxu0 %vm551_vm2, %v1191_v49 }
 0x7ea   : > { %1747 = vmatprep.mubr.msk.bf16.mxu0 %vm1912_vm0, %v1911_v0  ;;  %1740 = vmatpush3.bf16.msra.mxu0 %v1797_v9 }
 0x7eb   : > { %1741 = vmatprep.subr.bf16.mxu0 %v1911_v0 }
 0x7ee   : > { %1742 = vmatpush3.bf16.msra.mxu0 %v1798_v29 }
 0x7ef   : > { %1743 = vmatprep.subr.bf16.mxu0 %v1911_v0 }
 0x7f2   : > { %1744 = vmatpush3.bf16.msra.mxu0 %v1799_v30 }
 0x7f3   : > { %1745 = vmatprep.subr.bf16.mxu0 %v1911_v0 }
 0x7f6   : > { %1746 = vmatpush3.bf16.msra.mxu0 %v1800_v31 }
 0x8a9   : > { %v1232_v50 = vpop.f32.mrf.mxu0 }
 0x8aa   : > { %v1239_v51 = vadd.f32 %v1232_v50, %v1068_v33 }
 0x8ab   : > { %v1729_v52 = vpop.f32.mrf.mxu0 }
 0x8ac   : > { %v1241_v53 = vadd.f32 %v1239_v51, %v2067_v3 }
 0x8ad   : > { %v1235_v54 = vpop.f32.mrf.mxu0 }
 0x8ae   : > { %v1240_v55 = vadd.f32 %v1235_v54, %v1069_v36  ;;  %v1243_v56 = vsel %vm494_vm1, %v1241_v53, 0.0 }
 0x8af   : > { %1244 = vadd.xlane.f32.xlu1 %v1243_v56  ;;  %v1730_v57 = vpop.f32.mrf.mxu0 }
 0x8b0   : > { %v1242_v58 = vadd.f32 %v1240_v55, %v2069_v4  ;;  %v1795_v4 = vld [vmem:[%s2252_s7 + $0x8] sm:$0xff]  }
 0x8b1   : > { %1732 = vmatpush3.bf16.msra.mxu1 %v1795_v4 }
 0x8b2   : > { %v1246_v59 = vsel %vm494_vm1, %v1242_v58, 0.0  ;;  %1733 = vmatprep.subr.bf16.mxu1 %v1911_v0  ;;  %v1604_v0 = vld [vmem:[%s2255_s10] ss:$0 sm:$0xff] }
 0x8b3   : > { %1247 = vadd.xlane.f32.xlu1 %v1246_v59 }
 0x8b5   : > { %1734 = vmatpush3.bf16.msra.mxu1 %v1796_v8 }
 0x938   : > { %v1245_v60 = vpop.xlane.xlu1 %1244 }
 0x939   : > { %v1250_v61 = vmul.f32 0.03125, %v1245_v60 }
 0x93b   : > { %v1252_v62 = vsub.f32 %v1241_v53, %v1250_v61 }
 0x93c   : > { %v1248_v63 = vpop.xlane.xlu1 %1247 }
 0x93d   : > { %v1251_v1 = vmul.f32 0.03125, %v1248_v63  ;;  %v1254_v2 = vmul.f32 %v1252_v62, %v1252_v62 }
 0x93f   : > { %v1253_v5 = vsub.f32 %v1242_v58, %v1251_v1  ;;  %v1256_v3 = vsel %vm494_vm1, %v1254_v2, 0.0 }
 0x940   : > { %1257 = vadd.xlane.f32.xlu1 %v1256_v3  ;;  %v1610_v3 = vld [vmem:[#allocation2] ss:$0 sm:$0xff] }
 0x941   : > { %v1255_v6 = vmul.f32 %v1253_v5, %v1253_v5 }
 0x943   : > { %v1259_v7 = vsel %vm494_vm1, %v1255_v6, 0.0 }
 0x944   : > { %1260 = vadd.xlane.f32.xlu0 %v1259_v7  ;;  %v1611_v7 = vld [vmem:[#allocation4] ss:$0 sm:$0xff] }
 0x9c9   : > { %v1258_v10 = vpop.xlane.xlu1 %1257 }
 0x9ca   : > { %v1262_v11 = vmul.f32 0.03125, %v1258_v10 }
 0x9cc   : > { %v1264_v12 = vadd.f32 1e-05, %v1262_v11 }
 0x9cd   : > { %v1261_v13 = vpop.xlane.xlu0 %1260 }
 0x9ce   : > { %1833 = vrsqrt.f32 %v1264_v12  ;;  %v1263_v14 = vmul.f32 0.03125, %v1261_v13 }
 0x9d0   : > { %v1265_v17 = vadd.f32 1e-05, %v1263_v14 }
 0x9d2   : > { %1835 = vrsqrt.f32 %v1265_v17 }
 0x9db   : > { %v1834_v18 = vpop.eup %1833 }
 0x9dc   : > { %v1268_v19 = vmul.f32 %v1834_v18, %v1252_v62 }
 0x9de   : > { %v1277_v23 = vmul.f32 %v1598_v20, %v1268_v19 }
 0x9df   : > { %v1836_v21 = vpop.eup %1835 }
 0x9e0   : > { %v1269_v22 = vmul.f32 %v1836_v21, %v1253_v5  ;;  %v1286_v26 = vadd.f32 %v1599_v24, %v1277_v23 }
 0x9e2   : > { %v1278_v25 = vmul.f32 %v1598_v20, %v1269_v22 }
 0x9e4   : > { %v1287_v27 = vadd.f32 %v1599_v24, %v1278_v25 }
 0x9e6   : > { %v1288_v28 = vpack.c.bf16 %v1287_v27, %v1286_v26 }
 0x9e8   : > { %1736 = vmatmul.mubr.msk.bf16.vlgmr.msra.gmra.mxu1 %vm494_vm1, %v1288_v28 }
 0xaa8   : > { %v1349_v32 = vpop.f32.mrf.mxu1 }
 0xaa9   : > { %v1350_v34 = vadd.f32 %v1600_v15, %v1349_v32 }
 0xaaa   : > { %v1737_v33 = vpop.f32.mrf.mxu1 }
 0xaab   : > { %v1356_v38 = vmax.f32 %v1350_v34, 0.0 }
 0xaac   : > { %v1352_v35 = vpop.f32.mrf.mxu1 }
 0xaad   : > { %v1353_v36 = vadd.f32 %v1600_v15, %v1352_v35 }
 0xaae   : > { %v1738_v37 = vpop.f32.mrf.mxu1 }
 0xaaf   : > { %v1357_v39 = vmax.f32 %v1353_v36, 0.0 }
 0xab1   : > { %v1358_v40 = vpack.c.bf16 %v1357_v39, %v1356_v38 }
 0xab3   : > { %1748 = vmatmul.mubr.msk.bf16.vlgmr.msra.gmra.mxu0 %vm1398_vm5, %v1358_v40 }
 0xb73   : > { %v1436_v41 = vpop.f32.mrf.mxu0 }
 0xb74   : > { %v1437_v42 = vadd.f32 %v1604_v0, %v1436_v41 }
 0xb75   : > { %v1749_v43 = vpop.f32.mrf.mxu0 }
 0xb76   : > { %v1443_v44 = vadd.f32 %v1437_v42, %v1286_v26 }
 0xb77   : > { %v1439_v45 = vpop.f32.mrf.mxu0 }
 0xb78   : > { %v1440_v46 = vadd.f32 %v1604_v0, %v1439_v45  ;;  %v1445_v47 = vsel %vm494_vm1, %v1443_v44, 0.0 }
 0xb79   : > { %1446 = vadd.xlane.f32.xlu1 %v1445_v47  ;;  %v1750_v48 = vpop.f32.mrf.mxu0 }
 0xb7a   : > { %v1444_v16 = vadd.f32 %v1440_v46, %v1287_v27 }
 0xb7c   : > { %v1448_v49 = vsel %vm494_vm1, %v1444_v16, 0.0 }
 0xb7d   : > { %1449 = vadd.xlane.f32.xlu1 %v1448_v49 }
 0xc02   : > { %v1447_v50 = vpop.xlane.xlu1 %1446 }
 0xc03   : > { %v1451_v51 = vmul.f32 0.03125, %v1447_v50 }
 0xc05   : > { %v1453_v52 = vsub.f32 %v1443_v44, %v1451_v51 }
 0xc06   : > { %v1450_v53 = vpop.xlane.xlu1 %1449 }
 0xc07   : > { %v1452_v54 = vmul.f32 0.03125, %v1450_v53  ;;  %v1455_v55 = vmul.f32 %v1453_v52, %v1453_v52 }
 0xc09   : > { %v1454_v56 = vsub.f32 %v1444_v16, %v1452_v54  ;;  %v1457_v57 = vsel %vm494_vm1, %v1455_v55, 0.0 }
 0xc0a   : > { %1458 = vadd.xlane.f32.xlu1 %v1457_v57 }
 0xc0b   : > { %v1456_v58 = vmul.f32 %v1454_v56, %v1454_v56 }
 0xc0d   : > { %v1460_v59 = vsel %vm494_vm1, %v1456_v58, 0.0 }
 0xc0e   : > { %1461 = vadd.xlane.f32.xlu1 %v1460_v59 }
 0xc93   : > { %v1459_v60 = vpop.xlane.xlu1 %1458 }
 0xc94   : > { %v1463_v61 = vmul.f32 0.03125, %v1459_v60 }
 0xc96   : > { %v1465_v62 = vadd.f32 1e-05, %v1463_v61 }
 0xc97   : > { %v1462_v63 = vpop.xlane.xlu1 %1461 }
 0xc98   : > { %1837 = vrsqrt.f32 %v1465_v62  ;;  %v1464_v1 = vmul.f32 0.03125, %v1462_v63 }
 0xc9a   : > { %v1466_v2 = vadd.f32 1e-05, %v1464_v1 }
 0xc9c   : > { %1839 = vrsqrt.f32 %v1466_v2 }
 0xca5   : > { %v1838_v5 = vpop.eup %1837 }
 0xca6   : > { %v1469_v6 = vmul.f32 %v1838_v5, %v1453_v52 }
 0xca8   : > { %v1478_v4 = vmul.f32 %v1610_v3, %v1469_v6 }
 0xca9   : > { %v1840_v8 = vpop.eup %1839 }
 0xcaa   : > { %v1487_v9 = vadd.f32 %v1611_v7, %v1478_v4  ;;  %v1470_v10 = vmul.f32 %v1840_v8, %v1454_v56 }
 0xcac   : > { %1489 = vst.msk [vmem:[%s466_s20] sm:$0xff] %vm494_vm1, %v1487_v9  ;;  %v1479_v11 = vmul.f32 %v1610_v3, %v1470_v10 }
 0xcae   : > { %v1488_v12 = vadd.f32 %v1611_v7, %v1479_v11 }
 0xcb0   : > { %1490 = vst.msk [vmem:[%s466_s20 + $0x8] sm:$0xff] %vm494_vm1, %v1488_v12 }
 0xcb1 PF: > { %s25_s25 = sadd.s32 1, %s1907_s25  }
 0xcb2   : > { %p22_p3 = scmp.ge.s32.totalorder %s25_s25, 4  }
 0xcb4   :  { %24 = sbr.rel (!%p22_p3) target bundleno = 2 (0x2), region = 111 }
 0xcb9   :  { %1512 = vsyncpa [#allocation3], 1 }
 0xcba   :  { %1514 = vsyncpa [#allocation3 + $0x1], 1 }
 0xcbb   :  { %1515 = vsyncpa [#allocation5], 1 }

// kernel: _lambda_.5
= control target key start
LH: loop header
LB: loop body
LE: loop exit
PB: predicated region body
PF: predicated region fallthrough
CT: control target
= control target key end

     0   :  { %s2205_s0 = inlined_call_operand.vmem [shape: f32[2,8,32], index: 0, kind: input, shape index: {}]   ;;  %s2206_s1 = inlined_call_operand.vmem [shape: bf16[32,96], index: 1, kind: input, shape index: {}]   ;;  %s2207_s2 = inlined_call_operand.vmem [shape: f32[1,96], index: 2, kind: input, shape index: {}]   ;;  %s2208_s3 = inlined_call_operand.vmem [shape: bf16[32,32], index: 3, kind: input, shape index: {}]   ;;  %s2209_s4 = inlined_call_operand.vmem [shape: f32[1,32], index: 4, kind: input, shape index: {}]   ;;  %s2210_s5 = inlined_call_operand.vmem [shape: f32[1,32], index: 5, kind: input, shape index: {}]   ;;  %s2211_s6 = inlined_call_operand.vmem [shape: f32[1,32], index: 6, kind: input, shape index: {}]   ;;  %s2212_s7 = inlined_call_operand.vmem [shape: bf16[32,64], index: 7, kind: input, shape index: {}]   ;;  %s2213_s8 = inlined_call_operand.vmem [shape: f32[1,64], index: 8, kind: input, shape index: {}]   ;;  %s2214_s9 = inlined_call_operand.vmem [shape: bf16[64,32], index: 9, kind: input, shape index: {}]   ;;  %s2215_s10 = inlined_call_operand.vmem [shape: f32[1,32], index: 10, kind: input, shape index: {}]   ;;  %s2216_s11 = inlined_call_operand.vmem [shape: f32[1,32], index: 11, kind: input, shape index: {}]   ;;  %s2217_s12 = inlined_call_operand.vmem [shape: f32[1,32], index: 12, kind: input, shape index: {}]   ;;  %s2218_s13 = inlined_call_operand.vmem [shape: f32[1,32], index: 13, kind: input, shape index: {}]   ;;  %s2219_s14 = inlined_call_operand.vmem [shape: f32[1,32], index: 14, kind: input, shape index: {}]   ;;  %s2220_s15 = inlined_call_operand.hbm [shape: f32[2,8,32], index: 15, kind: output, shape index: {}]  }
   0x1   :  { %2221 = sst [smem:[#allocation6_spill]] %s2205_s0 }
   0x2   :  { %2222 = sst [smem:[#allocation7_spill]] %s2206_s1 }
   0x3   :  { %2223 = sst [smem:[#allocation8_spill]] %s2207_s2 }
   0x4   :  { %2224 = sst [smem:[#allocation9_spill]] %s2208_s3 }
   0x5   :  { %2225 = sst [smem:[#allocation10_spill]] %s2209_s4 }
   0x6   :  { %2226 = sst [smem:[#allocation11_spill]] %s2210_s5 }
   0x7   :  { %20 = vsyncpa [#allocation3], 0 }
   0x8   :  { %22 = vsyncpa [#allocation3 + $0x1], 0  ;;  %s1940_s18 = smov 0   ;;  %s1942_s19 = smov 0  }
   0x9   :  { %s1944_s20 = smov 0   ;;  %s1946_s21 = smov 0  }
   0xa LB: > { %s1961_s22 = sadd.s32 4294967295, %s1844_s21   ;;  %s1524_s23 = sadd.s32 4294967294, %s1844_s21   ;;  %s1844_s21 = sphi %s1946_s21, %s2240_s21   ;;  %s1840_s20 = sphi %s1944_s20, %s2239_s20   ;;  %s1836_s19 = sphi %s1942_s19, %s2238_s19   ;;  %s1832_s18 = sphi %s1940_s18, %s2237_s18  }
   0xb   : > { %s1965_s24 = sadd.s32 1, %s1844_s21   ;;  %s355_s25 = sadd.s32 1, %s1840_s20 }
   0xc   : > { %s352_s26 = ssub.s32 %s1844_s21, %s1965_s24  ;;  %p365_p0 = scmp.ne.s32.totalorder %s1840_s20, %s1836_s19 }
   0xd   : > { %p353_p1 = scmp.eq.s32.totalorder %s352_s26, 0  ;;  %p366_p2 = scmp.eq.s32.totalorder %s1961_s22, 1 }
   0xe   : > { %p371_p3 = scmp.ne.s32.totalorder %s1836_s19, %s1832_s18  ;;  %p372_p4 = scmp.eq.s32.totalorder %s1524_s23, 1 }
   0xf   : > { %s1976_s27 = scalar_select %p353_p1, %s1840_s20, %s355_s25  }
  0x10   : > { %p1978_p5 = por %p366_p2, %p365_p0  ;;  %p1982_p6 = por %p372_p4, %p371_p3 }
  0x11   : > { %2227 = sst [smem:[#allocation5_spill]] %s1976_s27  ;;  %p1527_p7 = scmp.ge.s32.totalorder %s1844_s21, 1 }
  0x12   : > { %p439_p8 = scmp.lt.s32.totalorder %s1844_s21, 3 }
  0x14   : > { %p440_p9 = pnand %p1527_p7, %p439_p8 }
  0x15   : > { %s2230_s1 = sld [smem:[#allocation7_spill]] (!%p440_p9)  ;;  %p486_p10 = scmp.lt.s32.totalorder (!%p440_p9), %s1961_s22, 1 }
  0x16   : > { %443 = sbr.rel (%p440_p9) target bundleno = 3517 (0xdbd), region = 80  ;;  %s2231_s0 = sld [smem:[#allocation6_spill]] (!%p440_p9) }
  0x17   : > { %s2232_s2 = sld [smem:[#allocation8_spill]] (!%p440_p9)  ;;  %s1851_s30 = smov (!%p440_p9), 120  }
  0x18   : > { %s1852_s16 = smov (!%p440_p9), 80   ;;  %s2233_s3 = sld [smem:[#allocation9_spill]] (!%p440_p9) }
  0x19   : > { %s1857_s23 = smov (!%p440_p9), 72   ;;  %s2234_s4 = sld [smem:[#allocation10_spill]] (!%p440_p9) }
  0x1a   : > { %s2235_s5 = sld [smem:[#allocation11_spill]] (!%p440_p9)  ;;  %s1564_s17 = sshll.u32 (!%p440_p9), %s1961_s22, 7 }
  0x1b   : > { %v1754_v0 = vld [vmem:[%s2230_s1 + $0x8] sm:$0xff]   ;;  %v1846_v1 = vmov 0.0   ;;  %v1755_v2 = vld [vmem:[%s2230_s1] sm:$0xff]   ;;  %vm1847_vm0 = vmmov 0   ;;  %s487_s25 = scalar_select %p486_p10, %s1961_s22, 1  ;;  %vm516_vm1 = vcmask 261120  }
  0x1c   : > { %1602 = vmatprep.subr.bf16.mxu1 %v1846_v1  ;;  %1616 = vmatprep.subr.bf16.mxu0 %v1846_v1  ;;  %vm571_vm2 = vcmask 64512   ;;  %vm633_vm3 = vcmask 1043456   ;;  %vm1347_vm4 = vcmask 523264  }
  0x1d   : > { %1603 = vmatpush3.bf16.msra.mxu1 %v1754_v0  ;;  %1606 = vmatprep.mubr.msk.bf16.mxu1 %vm1847_vm0, %v1846_v1  ;;  %s1529_s26 = sshll.u32 %s487_s25, 3  ;;  %v1530_v5 = vld [vmem:[%s2232_s2] ss:$0 sm:$0xff]  ;;  %s1849_s25 = smov 96  }
  0x1e   : > { %1604 = vmatprep.subr.bf16.mxu1 %v1846_v1  ;;  %1618 = vmatprep.mubr.msk.bf16.mxu0 %vm1847_vm0, %v1846_v1  ;;  %s489_s27 = scalar_lea.vmem %s2231_s0, %s1529_s26  ;;  %s1850_s26 = smov 88   ;;  %v563_v32 = vld [vmem:[%s2233_s3] sm:$0xf]  ;;  %v564_v62 = vld [vmem:[%s2233_s3 + $0x4] sm:$0xf] }
  0x1f   : > { %v2007_v3 = vld [vmem:[%s489_s27] sm:$0xff]  ;;  %s1848_s27 = smov 64   ;;  %v684_v33 = vsel %vm633_vm3, %v563_v32, 0  ;;  %v849_v63 = vsel %vm633_vm3, %v564_v62, 0 }
  0x20   : > { %v492_v4 = vpack.c.bf16 %v2007_v3, %v2007_v3 }
  0x21   : > { %1605 = vmatpush3.bf16.msra.mxu1 %v1755_v2 }
  0x22   : > { %1610 = vmatprep.subr.bf16.mxu1 %v1846_v1 }
  0x24   : > { %1607 = vmatmul.mubr.msk.bf16.vlgmr.msra.gmra.mxu1 %vm516_vm1, %v492_v4 }
  0x25   : > { %1612 = vmatprep.mubr.msk.bf16.mxu1 %vm1847_vm0, %v1846_v1 }
  0xe4   : > { %v554_v6 = vpop.f32.mrf.mxu1 }
  0xe5   : > { %v555_v7 = vadd.f32 %v1530_v5, %v554_v6 }
  0xe6   : > { %v1608_v8 = vpop.f32.mrf.mxu1 }
  0xe7   : > { %v2017_v9 = vpack.c.bf16 %v555_v7, %v555_v7  ;;  %v560_v12 = vmul.f32 0.35355338, %v555_v7 }
  0xe8   : > { %v557_v10 = vpop.f32.mrf.mxu1 }
  0xe9   : > { %628 = vrot.lane.b32.xlu1 %v2017_v9, %s1848_s27  ;;  %569 = vrot.lane.b32.xlu0 %v2017_v9, %s1849_s25  ;;  %v2022_v13 = vpack.c.bf16 %v560_v12, %v560_v12  ;;  %s1853_s27 = smov 56   ;;  %s1854_s25 = smov 112  }
  0xea   : > { %v1609_v11 = vpop.f32.mrf.mxu1 }
  0xed   : > { %736 = vrot.lane.b32.xlu1 %v2017_v9, %s1850_s26  ;;  %s1855_s26 = smov 48  }
  0xf1   : > { %734 = vrot.lane.b32.xlu1 %v2022_v13, %s1851_s30  ;;  %s1856_s30 = smov 104  }
 0x15b   : > { %v629_v14 = vpop.permute.xlu1 %628  ;;  %v570_v15 = vpop.permute.xlu0 %569 }
 0x15c   : > { %v576_v16 = vsel %vm571_vm2, %v570_v15, 0  ;;  %v635_v17 = vsel %vm633_vm3, %v629_v14, 0 }
 0x15d   : > { %1611 = vmatpush3.bf16.xpose.msra.mxu1 %v576_v16  ;;  %1617 = vmatpush3.bf16.msra.mxu0 %v635_v17 }
 0x15e   : > { %1628 = vmatprep.subr.bf16.mxu0 %v1846_v1  ;;  %1622 = vmatprep.subr.bf16.mxu1 %v1846_v1 }
 0x15f   : > { %v737_v27 = vpop.permute.xlu1 %736 }
 0x160   : > { %v742_v30 = vsel %vm571_vm2, %v737_v27, 0  ;;  %v1537_v27 = vld [vmem:[%s2234_s4] ss:$0 sm:$0xff]  ;;  %s1463_s4 = scalar_lea.hbm %s2220_s15, %s1564_s17 }
 0x163   : > { %v735_v31 = vpop.permute.xlu1 %734 }
 0x164   : > { %1613 = vmatmul.mubr.msk.bf16.vlgmr.msra.gmra.mxu1 %vm571_vm2, %v2022_v13 }
 0x165   : > { %1624 = vmatprep.mubr.msk.bf16.mxu1 %vm1847_vm0, %v1846_v1  ;;  %1623 = vmatpush3.bf16.msra.mxu1 %v684_v33 }
 0x166   : > { %1634 = vmatprep.subr.bf16.mxu1 %v1846_v1 }
 0x224   : > { %v612_v18 = vpop.f32.mrf.mxu1 }
 0x225   : > { %v618_v19 = vsel %vm571_vm2, %v612_v18, -inf }
 0x226   : > { %619 = vmax.xlane.f32.xlu0 %v618_v19  ;;  %v1614_v20 = vpop.f32.mrf.mxu1 }
 0x228   : > { %v615_v21 = vpop.f32.mrf.mxu1 }
 0x22a   : > { %v1615_v22 = vpop.f32.mrf.mxu1 }
 0x2af   : > { %v620_v23 = vpop.xlane.xlu0 %619 }
 0x2b0   : > { %v621_v24 = vsub.f32 %v612_v18, %v620_v23 }
 0x2b2   : > { %v622_v25 = vmul.f32 1.442695, %v621_v24 }
 0x2b4   : > { %1762 = vpow2.f32 %v622_v25 }
 0x2c1   : > { %v1763_v26 = vpop.eup %1762 }
 0x2c2   : > { %v624_v28 = vsel %vm571_vm2, %v1763_v26, 0.0  ;;  %v627_v29 = vpack.c.bf16 %v1763_v26, %v1763_v26 }
 0x2c3   : > { %625 = vadd.xlane.f32.xlu1 %v624_v28 }
 0x2c4   : > { %1619 = vmatmul.mubr.msk.bf16.vlgmr.msra.gmra.mxu0 %vm571_vm2, %v627_v29 }
 0x2c5   : > { %1629 = vmatpush3.bf16.xpose.msra.mxu0 %v742_v30  ;;  %1630 = vmatprep.mubr.msk.bf16.mxu0 %vm1847_vm0, %v1846_v1 }
 0x2c6   : > { %1640 = vmatprep.subr.bf16.mxu0 %v1846_v1 }
 0x2cc   : > { %1631 = vmatmul.mubr.msk.bf16.vlgmr.msra.gmra.mxu0 %vm571_vm2, %v735_v31 }
 0x2cd   : > { %1642 = vmatprep.mubr.msk.bf16.mxu0 %vm1847_vm0, %v1846_v1  ;;  %1641 = vmatpush3.bf16.msra.mxu0 %v849_v63 }
 0x2ce   : > { %1652 = vmatprep.subr.bf16.mxu0 %v1846_v1 }
 0x2d4   : > { %894 = vrot.lane.b32.xlu1 %v2017_v9, %s1852_s16  ;;  %s1858_s16 = smov 40  }
 0x34c   : > { %v626_v34 = vpop.xlane.xlu1 %625 }
 0x34d   : > { %1764 = vrcp.f32 %v626_v34  ;;  %v565_v34 = vld [vmem:[%s2233_s3 + $0x8] sm:$0xf] }
 0x350   : > { %v895_v53 = vpop.permute.xlu1 %894 }
 0x351   : > { %v900_v56 = vsel %vm571_vm2, %v895_v53, 0 }
 0x35a   : > { %v1765_v35 = vpop.eup %1764 }
 0x384   : > { %v671_v36 = vpop.f32.mrf.mxu0 }
 0x385   : > { %v678_v37 = vmul.f32 %v1765_v35, %v671_v36  ;;  %v1007_v35 = vsel %vm633_vm3, %v565_v34, 0 }
 0x386   : > { %v1620_v38 = vpop.f32.mrf.mxu0 }
 0x387   : > { %v679_v39 = vpack.c.bf16 %v678_v37, %v678_v37 }
 0x388   : > { %v674_v40 = vpop.f32.mrf.mxu0 }
 0x389   : > { %1625 = vmatmul.mubr.msk.bf16.vlgmr.msra.gmra.mxu1 %vm571_vm2, %v679_v39 }
 0x38a   : > { %v1621_v41 = vpop.f32.mrf.mxu0  ;;  %1636 = vmatprep.mubr.msk.bf16.mxu1 %vm1847_vm0, %v1846_v1 }
 0x38c   : > { %v778_v42 = vpop.f32.mrf.mxu0 }
 0x38d   : > { %v784_v43 = vsel %vm571_vm2, %v778_v42, -inf }
 0x38e   : > { %785 = vmax.xlane.f32.xlu0 %v784_v43  ;;  %v1632_v44 = vpop.f32.mrf.mxu0 }
 0x390   : > { %v781_v45 = vpop.f32.mrf.mxu0 }
 0x392   : > { %v1633_v46 = vpop.f32.mrf.mxu0 }
 0x3a4   : > { %794 = vrot.lane.b32.xlu0 %v2017_v9, %s1853_s27  ;;  %s483_s27 = sand.u32 1, %s1836_s19  }
 0x3a8   : > { %892 = vrot.lane.b32.xlu0 %v2022_v13, %s1854_s25  ;;  %s1528_s25 = sshll.u32 %s483_s27, 3 }
 0x417   : > { %v786_v47 = vpop.xlane.xlu0 %785 }
 0x418   : > { %v787_v48 = vsub.f32 %v778_v42, %v786_v47 }
 0x41a   : > { %v788_v49 = vmul.f32 1.442695, %v787_v48 }
 0x41b   : > { %v795_v50 = vpop.permute.xlu0 %794 }
 0x41c   : > { %1766 = vpow2.f32 %v788_v49  ;;  %v800_v51 = vsel %vm633_vm3, %v795_v50, 0 }
 0x41d   : > { %1635 = vmatpush3.bf16.msra.mxu1 %v800_v51 }
 0x41e   : > { %1646 = vmatprep.subr.bf16.mxu1 %v1846_v1 }
 0x41f   : > { %v893_v57 = vpop.permute.xlu0 %892 }
 0x429   : > { %v1767_v52 = vpop.eup %1766 }
 0x42a   : > { %v790_v54 = vsel %vm571_vm2, %v1767_v52, 0.0  ;;  %v793_v55 = vpack.c.bf16 %v1767_v52, %v1767_v52 }
 0x42b   : > { %791 = vadd.xlane.f32.xlu0 %v790_v54 }
 0x42c   : > { %1637 = vmatmul.mubr.msk.bf16.vlgmr.msra.gmra.mxu1 %vm571_vm2, %v793_v55 }
 0x42d   : > { %1647 = vmatpush3.bf16.xpose.msra.mxu1 %v900_v56  ;;  %1648 = vmatprep.mubr.msk.bf16.mxu1 %vm1847_vm0, %v1846_v1 }
 0x42e   : > { %1658 = vmatprep.subr.bf16.mxu1 %v1846_v1 }
 0x434   : > { %1649 = vmatmul.mubr.msk.bf16.vlgmr.msra.gmra.mxu1 %vm571_vm2, %v893_v57 }
 0x435   : > { %1660 = vmatprep.mubr.msk.bf16.mxu1 %vm1847_vm0, %v1846_v1  ;;  %1659 = vmatpush3.bf16.msra.mxu1 %v1007_v35  ;;  %v1760_v35 = vld [vmem:[%s2214_s9 + $0x8] sm:$0xff]  }
 0x436   : > { %1670 = vmatprep.subr.bf16.mxu1 %v1846_v1 }
 0x441   : > { %952 = vrot.lane.b32.xlu0 %v2017_v9, %s1855_s26 }
 0x445   : > { %1050 = vrot.lane.b32.xlu0 %v2022_v13, %s1856_s30  ;;  %s1859_s30 = smov [#allocation2]  }
 0x446   : > { %s1788_s0 = sshll.u32 %s1859_s30, 4  ;;  %s1789_s0 = int_to_ptr.vmem [resolvable:$false] %s1788_s0 }
 0x447   : > { %s1790_s22 = scalar_lea.vmem %s1789_s0, 256 }
 0x449   : > { %v720_v58 = vpop.f32.mrf.mxu1 }
 0x44a   : > { %v732_v28 = vadd.f32 %v1537_v27, %v720_v58 }
 0x44b   : > { %v1626_v59 = vpop.f32.mrf.mxu1 }
 0x44d   : > { %v723_v60 = vpop.f32.mrf.mxu1 }
 0x44f   : > { %v1627_v61 = vpop.f32.mrf.mxu1 }
 0x4b4   : > { %v792_v0 = vpop.xlane.xlu0 %791 }
 0x4b5   : > { %1768 = vrcp.f32 %v792_v0 }
 0x4b8   : > { %v953_v6 = vpop.permute.xlu0 %952 }
 0x4b9   : > { %v958_v11 = vsel %vm633_vm3, %v953_v6, 0 }
 0x4bc   : > { %v1051_v26 = vpop.permute.xlu0 %1050 }
 0x4c2   : > { %v1769_v2 = vpop.eup %1768 }
 0x4ec   : > { %v836_v4 = vpop.f32.mrf.mxu1 }
 0x4ed   : > { %v843_v5 = vmul.f32 %v1769_v2, %v836_v4 }
 0x4ee   : > { %v1638_v7 = vpop.f32.mrf.mxu1 }
 0x4ef   : > { %v844_v8 = vpack.c.bf16 %v843_v5, %v843_v5 }
 0x4f0   : > { %v839_v10 = vpop.f32.mrf.mxu1 }
 0x4f1   : > { %1643 = vmatmul.mubr.msk.bf16.vlgmr.msra.gmra.mxu0 %vm571_vm2, %v844_v8 }
 0x4f2   : > { %1653 = vmatpush3.bf16.msra.mxu0 %v958_v11  ;;  %v1639_v12 = vpop.f32.mrf.mxu1  ;;  %1654 = vmatprep.mubr.msk.bf16.mxu0 %vm1847_vm0, %v1846_v1 }
 0x4f3   : > { %1664 = vmatprep.subr.bf16.mxu0 %v1846_v1 }
 0x4f4   : > { %v936_v13 = vpop.f32.mrf.mxu1 }
 0x4f5   : > { %v942_v14 = vsel %vm571_vm2, %v936_v13, -inf }
 0x4f6   : > { %943 = vmax.xlane.f32.xlu1 %v942_v14  ;;  %v1650_v15 = vpop.f32.mrf.mxu1 }
 0x4f8   : > { %v939_v16 = vpop.f32.mrf.mxu1 }
 0x4fa   : > { %v1651_v17 = vpop.f32.mrf.mxu1 }
 0x507   : > { %1052 = vrot.lane.b32.xlu1 %v2017_v9, %s1857_s23  ;;  %s485_s23 = scalar_lea.vmem [#allocation2], %s1528_s25 }
 0x508   : > { %s1465_s1 = sshll.u32 %s485_s23, 4  ;;  %s1466_s1 = int_to_ptr.vmem [resolvable:$true] %s1465_s1 }
 0x509   : > { %s1784_s26 = scalar_lea.vmem %s1466_s1, 128  ;;  %p1791_p0 = scmp.lt.s32.totalorder %s1466_s1, %s1789_s0 }
 0x50a   : > { %p1785_p11 = scmp.ne.s32.totalorder %s1466_s1, %s1784_s26  ;;  %p1792_p1 = scmp.lt.s32.totalorder %s1790_s22, %s1784_s26 }
 0x50c   : > { %p1786_p12 = pnand %p1785_p11, %p1978_p5  ;;  %p1793_p2 = por %p1792_p1, %p1791_p0 }
 0x50e   : > { %p1787_p13 = pneg %p1786_p12 }
 0x510   : > { %p1794_p3 = pnand %p1793_p2, %p1787_p13 }
 0x57f   : > { %v944_v18 = vpop.xlane.xlu1 %943 }
 0x580   : > { %v945_v19 = vsub.f32 %v936_v13, %v944_v18 }
 0x582   : > { %v946_v20 = vmul.f32 1.442695, %v945_v19 }
 0x583   : > { %v1053_v22 = vpop.permute.xlu1 %1052 }
 0x584   : > { %1770 = vpow2.f32 %v946_v20  ;;  %v1058_v25 = vsel %vm571_vm2, %v1053_v22, 0  ;;  %v1756_v22 = vld [vmem:[%s2212_s7 + $0x8] sm:$0xff]  }
 0x591   : > { %v1771_v21 = vpop.eup %1770 }
 0x592   : > { %v948_v23 = vsel %vm571_vm2, %v1771_v21, 0.0  ;;  %v951_v24 = vpack.c.bf16 %v1771_v21, %v1771_v21 }
 0x593   : > { %949 = vadd.xlane.f32.xlu1 %v948_v23  ;;  %v1758_v23 = vld [vmem:[%s2214_s9 + $0x18] sm:$0xff]  }
 0x594   : > { %1655 = vmatmul.mubr.msk.bf16.vlgmr.msra.gmra.mxu0 %vm571_vm2, %v951_v24  ;;  %v1759_v24 = vld [vmem:[%s2214_s9 + $0x10] sm:$0xff]  }
 0x595   : > { %1665 = vmatpush3.bf16.xpose.msra.mxu0 %v1058_v25  ;;  %1666 = vmatprep.mubr.msk.bf16.mxu0 %vm1847_vm0, %v1846_v1 }
 0x596   : > { %1676 = vmatprep.subr.bf16.mxu0 %v1846_v1 }
 0x59c   : > { %1667 = vmatmul.mubr.msk.bf16.vlgmr.msra.gmra.mxu0 %vm571_vm2, %v1051_v26 }
 0x59d   : > { %1678 = vmatprep.mubr.msk.bf16.mxu0 %vm1847_vm0, %v1846_v1 }
 0x5b1   : > { %v885_v29 = vpop.f32.mrf.mxu0 }
 0x5b2   : > { %v891_v30 = vadd.f32 %v885_v29, %v732_v28  ;;  %v1547_v29 = vld [vmem:[%s2235_s5] ss:$0 sm:$0xff]  ;;  %s1452_s5 = scalar_lea.sflag [#allocation3], %s483_s27 }
 0x5b3   : > { %v1644_v31 = vpop.f32.mrf.mxu0 }
 0x5b4   : > { %v1548_v31 = vld [vmem:[%s2211_s6] ss:$0 sm:$0xff] }
 0x5b5   : > { %v888_v32 = vpop.f32.mrf.mxu0 }
 0x5b7   : > { %v1645_v33 = vpop.f32.mrf.mxu0 }
 0x61c   : > { %v950_v36 = vpop.xlane.xlu1 %949 }
 0x61d   : > { %1772 = vrcp.f32 %v950_v36  ;;  %v1761_v36 = vld [vmem:[%s2214_s9] sm:$0xff]  }
 0x62a   : > { %v1773_v37 = vpop.eup %1772 }
 0x654   : > { %v994_v38 = vpop.f32.mrf.mxu0 }
 0x655   : > { %v1001_v39 = vmul.f32 %v1773_v37, %v994_v38  ;;  %v1549_v37 = vld [vmem:[%s2213_s8] ss:$0 sm:$0xff] }
 0x656   : > { %v1656_v40 = vpop.f32.mrf.mxu0 }
 0x657   : > { %v1002_v41 = vpack.c.bf16 %v1001_v39, %v1001_v39 }
 0x658   : > { %v997_v42 = vpop.f32.mrf.mxu0 }
 0x659   : > { %1661 = vmatmul.mubr.msk.bf16.vlgmr.msra.gmra.mxu1 %vm571_vm2, %v1002_v41 }
 0x65a   : > { %v1657_v43 = vpop.f32.mrf.mxu0  ;;  %1672 = vmatprep.mubr.msk.bf16.mxu1 %vm1847_vm0, %v1846_v1 }
 0x65c   : > { %v1094_v44 = vpop.f32.mrf.mxu0 }
 0x65d   : > { %v1100_v45 = vsel %vm571_vm2, %v1094_v44, -inf }
 0x65e   : > { %1101 = vmax.xlane.f32.xlu0 %v1100_v45  ;;  %v1668_v46 = vpop.f32.mrf.mxu0 }
 0x660   : > { %v1097_v47 = vpop.f32.mrf.mxu0 }
 0x662   : > { %v1669_v48 = vpop.f32.mrf.mxu0 }
 0x674   : > { %1110 = vrot.lane.b32.xlu0 %v2017_v9, %s1858_s16  ;;  %v566_v9 = vld [vmem:[%s2233_s3 + $0xc] sm:$0xf] }
 0x675   : > { %v1165_v57 = vsel %vm633_vm3, %v566_v9, 0 }
 0x676   : > { %1677 = vmatpush3.bf16.msra.mxu0 %v1165_v57 }
 0x677   : > { %1690 = vmatprep.subr.bf16.mxu0 %v1846_v1 }
 0x6e7   : > { %v1102_v49 = vpop.xlane.xlu0 %1101 }
 0x6e8   : > { %v1103_v50 = vsub.f32 %v1094_v44, %v1102_v49 }
 0x6ea   : > { %v1104_v51 = vmul.f32 1.442695, %v1103_v50 }
 0x6eb   : > { %v1111_v52 = vpop.permute.xlu0 %1110 }
 0x6ec   : > { %1774 = vpow2.f32 %v1104_v51  ;;  %v1116_v53 = vsel %vm633_vm3, %v1111_v52, 0 }
 0x6ed   : > { %1671 = vmatpush3.bf16.msra.mxu1 %v1116_v53 }
 0x6ee   : > { %1682 = vmatprep.subr.bf16.mxu1 %v1846_v1 }
 0x6f9   : > { %v1775_v54 = vpop.eup %1774 }
 0x6fa   : > { %v1106_v55 = vsel %vm571_vm2, %v1775_v54, 0.0  ;;  %v1109_v56 = vpack.c.bf16 %v1775_v54, %v1775_v54 }
 0x6fb   : > { %1107 = vadd.xlane.f32.xlu1 %v1106_v55 }
 0x6fc   : > { %1673 = vmatmul.mubr.msk.bf16.vlgmr.msra.gmra.mxu1 %vm571_vm2, %v1109_v56 }
 0x6fd   : > { %1686 = vmatprep.mubr.msk.bf16.mxu1 %vm1847_vm0, %v1846_v1  ;;  %1683 = vmatpush3.bf16.msra.mxu1 %v1756_v22 }
 0x6fe   : > { %1684 = vmatprep.subr.bf16.mxu1 %v1846_v1 }
 0x719   : > { %v1043_v58 = vpop.f32.mrf.mxu1 }
 0x71a   : > { %v1049_v59 = vadd.f32 %v1043_v58, %v891_v30 }
 0x71b   : > { %v1662_v60 = vpop.f32.mrf.mxu1 }
 0x71c   : > { %v1559_v60 = vld [vmem:[%s2216_s11] ss:$0 sm:$0xff] }
 0x71d   : > { %v1046_v61 = vpop.f32.mrf.mxu1 }
 0x71f   : > { %v1663_v62 = vpop.f32.mrf.mxu1 }
 0x720   : > { %v1560_v62 = vld [vmem:[%s2217_s12] ss:$0 sm:$0xff] }
 0x784   : > { %v1108_v63 = vpop.xlane.xlu1 %1107 }
 0x785   : > { %1776 = vrcp.f32 %v1108_v63 }
 0x792   : > { %v1777_v0 = vpop.eup %1776 }
 0x7bc   : > { %v1152_v2 = vpop.f32.mrf.mxu1 }
 0x7bd   : > { %v1159_v4 = vmul.f32 %v1777_v0, %v1152_v2 }
 0x7be   : > { %v1674_v5 = vpop.f32.mrf.mxu1 }
 0x7bf   : > { %v1160_v6 = vpack.c.bf16 %v1159_v4, %v1159_v4 }
 0x7c0   : > { %v1155_v7 = vpop.f32.mrf.mxu1 }
 0x7c1   : > { %1679 = vmatmul.mubr.msk.bf16.vlgmr.msra.gmra.mxu0 %vm571_vm2, %v1160_v6 }
 0x7c2   : > { %v1675_v8 = vpop.f32.mrf.mxu1  ;;  %1698 = vmatprep.mubr.msk.bf16.mxu0 %vm1847_vm0, %v1846_v1  ;;  %1691 = vmatpush3.bf16.msra.mxu0 %v1758_v23 }
 0x7c3   : > { %1692 = vmatprep.subr.bf16.mxu0 %v1846_v1 }
 0x7c6   : > { %1693 = vmatpush3.bf16.msra.mxu0 %v1759_v24 }
 0x7c7   : > { %1694 = vmatprep.subr.bf16.mxu0 %v1846_v1 }
 0x7ca   : > { %1695 = vmatpush3.bf16.msra.mxu0 %v1760_v35 }
 0x7cb   : > { %1696 = vmatprep.subr.bf16.mxu0 %v1846_v1  ;;  %v1553_v1 = vld [vmem:[%s2215_s10] ss:$0 sm:$0xff] }
 0x7ce   : > { %1697 = vmatpush3.bf16.msra.mxu0 %v1761_v36 }
 0x881   : > { %v1201_v10 = vpop.f32.mrf.mxu0 }
 0x882   : > { %v1207_v11 = vadd.f32 %v1201_v10, %v1049_v59 }
 0x883   : > { %v1680_v12 = vpop.f32.mrf.mxu0 }
 0x884   : > { %v1208_v13 = vadd.f32 %v1207_v11, %v2007_v3  ;;  %v1757_v3 = vld [vmem:[%s2212_s7] sm:$0xff]  }
 0x885   : > { %v1204_v14 = vpop.f32.mrf.mxu0  ;;  %1685 = vmatpush3.bf16.msra.mxu1 %v1757_v3 }
 0x886   : > { %v1209_v15 = vsel %vm516_vm1, %v1208_v13, 0.0  ;;  %v1561_v14 = vld [vmem:[%s2218_s13] ss:$0 sm:$0xff] }
 0x887   : > { %1210 = vadd.xlane.f32.xlu1 %v1209_v15  ;;  %v1681_v16 = vpop.f32.mrf.mxu0 }
 0x888   : > { %v1562_v16 = vld [vmem:[%s2219_s14] ss:$0 sm:$0xff] }
 0x910   : > { %v1211_v17 = vpop.xlane.xlu1 %1210 }
 0x911   : > { %v1213_v18 = vmul.f32 0.03125, %v1211_v17 }
 0x913   : > { %v1214_v19 = vsub.f32 %v1208_v13, %v1213_v18 }
 0x915   : > { %v1215_v20 = vmul.f32 %v1214_v19, %v1214_v19 }
 0x917   : > { %v1216_v21 = vsel %vm516_vm1, %v1215_v20, 0.0 }
 0x918   : > { %1217 = vadd.xlane.f32.xlu1 %v1216_v21 }
 0x9a1   : > { %v1218_v25 = vpop.xlane.xlu1 %1217 }
 0x9a2   : > { %v1219_v26 = vmul.f32 0.03125, %v1218_v25 }
 0x9a4   : > { %v1220_v27 = vadd.f32 1e-05, %v1219_v26 }
 0x9a6   : > { %1778 = vrsqrt.f32 %v1220_v27 }
 0x9b3   : > { %v1779_v28 = vpop.eup %1778 }
 0x9b4   : > { %v1222_v30 = vmul.f32 %v1779_v28, %v1214_v19 }
 0x9b6   : > { %v1230_v32 = vmul.f32 %v1547_v29, %v1222_v30 }
 0x9b8   : > { %v1238_v33 = vadd.f32 %v1548_v31, %v1230_v32 }
 0x9ba   : > { %v1239_v34 = vpack.c.bf16 %v1238_v33, %v1238_v33 }
 0x9bc   : > { %1687 = vmatmul.mubr.msk.bf16.vlgmr.msra.gmra.mxu1 %vm516_vm1, %v1239_v34 }
 0xa7c   : > { %v1300_v38 = vpop.f32.mrf.mxu1 }
 0xa7d   : > { %v1301_v39 = vadd.f32 %v1549_v37, %v1300_v38 }
 0xa7e   : > { %v1688_v40 = vpop.f32.mrf.mxu1 }
 0xa7f   : > { %v1306_v41 = vmax.f32 %v1301_v39, 0.0 }
 0xa80   : > { %v1303_v42 = vpop.f32.mrf.mxu1 }
 0xa81   : > { %v1307_v43 = vpack.c.bf16 %v1306_v41, %v1306_v41 }
 0xa82   : > { %v1689_v44 = vpop.f32.mrf.mxu1 }
 0xa83   : > { %1699 = vmatmul.mubr.msk.bf16.vlgmr.msra.gmra.mxu0 %vm1347_vm4, %v1307_v43 }
 0xb43   : > { %v1385_v45 = vpop.f32.mrf.mxu0 }
 0xb44   : > { %v1386_v46 = vadd.f32 %v1553_v1, %v1385_v45 }
 0xb45   : > { %v1700_v47 = vpop.f32.mrf.mxu0 }
 0xb46   : > { %v1391_v48 = vadd.f32 %v1386_v46, %v1238_v33 }
 0xb47   : > { %v1388_v49 = vpop.f32.mrf.mxu0 }
 0xb48   : > { %v1392_v50 = vsel %vm516_vm1, %v1391_v48, 0.0 }
 0xb49   : > { %1393 = vadd.xlane.f32.xlu1 %v1392_v50  ;;  %v1701_v51 = vpop.f32.mrf.mxu0 }
 0xbd2   : > { %v1394_v52 = vpop.xlane.xlu1 %1393 }
 0xbd3   : > { %v1395_v53 = vmul.f32 0.03125, %v1394_v52 }
 0xbd5   : > { %v1396_v54 = vsub.f32 %v1391_v48, %v1395_v53 }
 0xbd7   : > { %v1397_v55 = vmul.f32 %v1396_v54, %v1396_v54 }
 0xbd9   : > { %v1398_v56 = vsel %vm516_vm1, %v1397_v55, 0.0 }
 0xbda   : > { %1399 = vadd.xlane.f32.xlu1 %v1398_v56 }
 0xc63   : > { %v1400_v9 = vpop.xlane.xlu1 %1399 }
 0xc64   : > { %v1401_v57 = vmul.f32 0.03125, %v1400_v9 }
 0xc66   : > { %v1402_v58 = vadd.f32 1e-05, %v1401_v57 }
 0xc68   : > { %1780 = vrsqrt.f32 %v1402_v58 }
 0xc75   : > { %v1781_v59 = vpop.eup %1780 }
 0xc76   : > { %v1404_v61 = vmul.f32 %v1781_v59, %v1396_v54 }
 0xc78   : > { %v1412_v63 = vmul.f32 %v1559_v60, %v1404_v61 }
 0xc7a   : > { %v1420_v0 = vadd.f32 %v1560_v62, %v1412_v63 }
 0xc7c   : > { %v1421_v2 = vsel %vm516_vm1, %v1420_v0, 0.0 }
 0xc7d   : > { %1422 = vadd.xlane.f32.xlu1 %v1421_v2 }
 0xd06   : > { %v1423_v4 = vpop.xlane.xlu1 %1422 }
 0xd07   : > { %v1424_v5 = vmul.f32 0.03125, %v1423_v4 }
 0xd09   : > { %v1425_v6 = vsub.f32 %v1420_v0, %v1424_v5 }
 0xd0b   : > { %v1426_v7 = vmul.f32 %v1425_v6, %v1425_v6 }
 0xd0d   : > { %v1427_v8 = vsel %vm516_vm1, %v1426_v7, 0.0 }
 0xd0e   : > { %1428 = vadd.xlane.f32.xlu0 %v1427_v8 }
 0xd97   : > { %v1429_v10 = vpop.xlane.xlu0 %1428 }
 0xd98   : > { %v1430_v11 = vmul.f32 0.03125, %v1429_v10 }
 0xd9a   : > { %v1431_v12 = vadd.f32 1e-05, %v1430_v11 }
 0xd9c   : > { %1782 = vrsqrt.f32 %v1431_v12 }
 0xda9   : > { %v1783_v13 = vpop.eup %1782 }
 0xdaa   : > { %v1433_v15 = vmul.f32 %v1783_v13, %v1425_v6 }
 0xdac   : > { %v1441_v17 = vmul.f32 %v1561_v14, %v1433_v15 }
 0xdae   : > { %v1449_v18 = vadd.f32 %v1562_v16, %v1441_v17 }
 0xdb0   : > { %1450 = vst.msk [vmem:[%s485_s23] sm:$0xff] %vm516_vm1, %v1449_v18 }
 0xdb1   : > { %1797 = shalt.err (!%p1794_p3)
}
 0xdb2   : > { %s1798_s2 = scalar_lea.hbm %s1463_s4, 128  ;;  %s1802_s25 = scalar_lea.hbm %s2220_s15, 256 }
 0xdb3   : > { %p1799_p4 = scmp.ne.s32.totalorder %s1463_s4, %s1798_s2  ;;  %p1803_p9 = scmp.lt.s32.totalorder %s1463_s4, %s2220_s15 }
 0xdb4   : > { %p1804_p10 = scmp.lt.s32.totalorder %s1802_s25, %s1798_s2 }
 0xdb5   : > { %p1800_p7 = pnand %p1799_p4, %p1978_p5 }
 0xdb6   : > { %p1805_p11 = por %p1804_p10, %p1803_p9 }
 0xdb7   : > { %p1801_p8 = pneg %p1800_p7 }
 0xdb9   : > { %p1806_p12 = pnand %p1805_p11, %p1801_p8 }
 0xdbb   : > { %1809 = shalt.err (!%p1806_p12)
}
 0xdbc   : > { %1702 = dma.vmem_to_hbm [thread:$0]  (%p1978_p5), %s1466_s1, 128, %s1463_s4, %s1452_s5  }
 0xdbd PF: > { %p1708_p13 = scmp.ge.s32.totalorder %s1844_s21, 2  ;;  %s1477_s23 = sand.u32 1, %s1832_s18  }
 0xdbe   : > { %s1478_s26 = scalar_lea.sflag [#allocation3], %s1477_s23 }
 0xdbf   : > { %p1705_p0 = pnand %p1708_p13, %p1982_p6 }
 0xdc1   : > { %p1706_p1 = pneg %p1705_p0 }
 0xdc3   : > { %1827 = dma.done.wait (%p1706_p1), %s1478_s26, 128  }
 0xdc4   : > { %1829 = vsyncadd (%p1706_p1), %s1478_s26, 4294967168  ;;  %s2236_s30 = sld [smem:[#allocation5_spill]]  ;;  %p25_p2 = scmp.ge.s32.totalorder %s1965_s24, 4  }
 0xdc5   : > { %s2237_s18 = smov %s1836_s19  ;;  %s2238_s19 = smov %s1840_s20 }
 0xdc6   : > { %s2240_s21 = smov %s1965_s24  ;;  %27 = sbr.rel (!%p25_p2) target bundleno = 10 (0xa), region = 115 }
 0xdca   : > { %s2239_s20 = smov %s2236_s30 }
 0xdcb   :  { %1483 = vsyncpa [#allocation3], 1 }
 0xdcc   :  { %1485 = vsyncpa [#allocation3 + $0x1], 1 }

</bundles_post_ra>
